<compile_context>
chip_gen: v7x
topology: tpu7x:2x2x1
jax: 0.10.0
libtpu: 0.0.40
codegen_flags: <defaults>
</compile_context>

<pallas_src>
import math
import functools

import jax
import jax.numpy as jnp
from jax.experimental import pallas as pl
from jax.experimental.pallas import tpu as pltpu


# ----------------------------- configuration -----------------------------
B = 2
C_IN = 32                       # in_channels
H = W = 8                       # spatial
N = H * W                       # tokens per image (64)
NUM_HEADS = 8
INTER_C = C_IN // 2             # inter_channels = in_channels // 2 -> 16
HEAD_DIM = INTER_C // NUM_HEADS # -> 2
NUM_GLOBAL_TOKENS = 1
BN_EPS = 1e-5
HEADS_PER_GROUP = 2             # 2 heads * 64 tokens = one 128-lane tile per group


# ------------------------------- kernel ----------------------------------
def _nonlocal_kernel(xt_ref, xo_ref,
                     wqt_ref, bq_ref, wkt_ref, bk_ref,
                     wvz_ref, bvz_ref, shift_ref,
                     kmask_ref, bcast_ref, bsum_ref,
                     z_ref, attn_ref,
                     *, num_heads, heads_per_group, n_tok, c_in):
    xt = xt_ref[0]                                  # (C, N) this branch, channel-major
    xo = xo_ref[0]                                  # (C, N) other branch, channel-major

    # ---- projections (softmax scale already folded into Wq / bq host-side) ----
    q = (jnp.dot(wqt_ref[...], xo, preferred_element_type=jnp.float32)
         + bq_ref[...]).T                           # (N, IC)
    k_t = (jnp.dot(wkt_ref[...], xt, preferred_element_type=jnp.float32)
           + bk_ref[...])                           # (IC, N) channel-major keys
    # Per-head value @ (W_z * bn_scale), all heads concatenated along lanes.
    vz = (jnp.dot(xt.T, wvz_ref[...], preferred_element_type=jnp.float32)
          + bvz_ref[...])                           # (N, heads*C)

    num_groups = num_heads // heads_per_group
    gn = heads_per_group * n_tok                    # lanes per head-group (128)

    y = jnp.zeros((n_tok, c_in), jnp.float32)
    for g in range(num_groups):
        # Per-head-masked, lane-tiled keys for this group (mask is a hoisted constant).
        k_exp = (jnp.concatenate([k_t] * heads_per_group, axis=1)
                 * kmask_ref[:, g * gn:(g + 1) * gn])                          # (IC, gn)
        s = jnp.dot(q, k_exp, preferred_element_type=jnp.float32)              # (N, gn)

        # Per-head max (robust softmax), broadcast back to the slab via a constant matmul.
        mh = jnp.concatenate(
            [jnp.max(s[:, h * n_tok:(h + 1) * n_tok], axis=-1, keepdims=True)
             for h in range(heads_per_group)], axis=-1)                        # (N, hpg)
        m_slab = jnp.dot(mh, bcast_ref[...], preferred_element_type=jnp.float32)
        e = jnp.exp(s - m_slab)                                                # (N, gn)

        # Per-head denominators (sum over each 64-lane segment) and their broadcast.
        denom = jnp.dot(e, bsum_ref[...], preferred_element_type=jnp.float32)  # (N, hpg)
        inv = pl.reciprocal(denom, approx=False)    # exact: attention checked to 1e-4
        w = e * jnp.dot(inv, bcast_ref[...], preferred_element_type=jnp.float32)  # (N, gn)

        # Attention written directly in (B, heads, N, N) layout (no wrapper transpose).
        for h in range(heads_per_group):
            attn_ref[0, g * heads_per_group + h] = (
                w[:, h * n_tok:(h + 1) * n_tok].astype(attn_ref.dtype))

        # PV for this group's heads as one K=gn matmul: stack per-head value blocks
        # along sublanes (W_z and BN scale already folded into vz).
        vstack = jnp.concatenate(
            [vz[:, (g * heads_per_group + h) * c_in:(g * heads_per_group + h + 1) * c_in]
             for h in range(heads_per_group)], axis=0)                         # (gn, C)
        y = y + jnp.dot(w, vstack, preferred_element_type=jnp.float32)

    # BN shift; channel-major store so the wrapper reshape back to NCHW is free.
    z_ref[0] = (y.T + shift_ref[...]).astype(z_ref.dtype)


# ------------------------------- wrapper ----------------------------------
@jax.jit
def non_local_block(x_this_nchw, x_other_nchw, params):
    """Returns (z [B,C,H,W], attention_weights [B,heads,N,N])."""
    b, c, hgt, wid = x_this_nchw.shape
    n = hgt * wid
    heads, hd, ic = NUM_HEADS, HEAD_DIM, INTER_C
    hpg = HEADS_PER_GROUP

    # NCHW -> (B, C, N): free reshape, no wrapper-side transposes.
    x_this = x_this_nchw.reshape(b, c, n)
    x_other = x_other_nchw.reshape(b, c, n)

    # ---- parameter folding (tiny, traced once under jit) --------------------
    scale = 1.0 / math.sqrt(hd)
    wqt = params["wq"].T * scale                           # (IC, C), softmax scale folded
    bq_col = params["bq"].reshape(ic, 1) * scale           # (IC, 1)
    wkt = params["wk"].T                                   # (IC, C)
    bk_col = params["bk"].reshape(ic, 1)                   # (IC, 1)
    # Fold W_z (no-bias 1x1 conv) and the BatchNorm *scale* into per-head value
    # projections: Wvz[:, h*C:(h+1)*C] = Wv[:, h_slice] @ (Wz[h_slice, :] * bn_scale)
    wz_s = params["wz"] * params["bn_scale"]               # (IC, C), columns scaled
    wv_h = params["wv"].reshape(c, heads, hd)              # (C, H, hd)
    wz_h = wz_s.reshape(heads, hd, c)                      # (H, hd, C)
    wvz = jnp.einsum("chd,hdk->chk", wv_h, wz_h,
                     precision=jax.lax.Precision.HIGHEST).reshape(c, heads * c)
    bvz = jnp.einsum("hd,hdk->hk", params["bv"].reshape(heads, hd), wz_h,
                     precision=jax.lax.Precision.HIGHEST).reshape(1, heads * c)
    shift_col = params["bn_shift"].reshape(c, 1)           # (C, 1)

    # ---- constant selection matrices, hoisted out of the kernel body --------
    # kmask[c, h*N + j] = 1 iff channel c belongs to head h.
    kmask = (jnp.arange(ic)[:, None] // hd
             == jnp.arange(heads * n)[None, :] // n).astype(jnp.float32)   # (IC, heads*N)
    # Per-head-group broadcast / sum matrices (same pattern for every group).
    bcast = (jnp.arange(hpg)[:, None]
             == jnp.arange(hpg * n)[None, :] // n).astype(jnp.float32)     # (hpg, hpg*N)
    bsum = bcast.T                                                          # (hpg*N, hpg)

    kernel = functools.partial(_nonlocal_kernel, num_heads=heads,
                               heads_per_group=hpg, n_tok=n, c_in=c)
    full = lambda shape: pl.BlockSpec(shape, lambda i: (0,) * len(shape))

    z_cm, attn = pl.pallas_call(
        kernel,
        out_shape=(
            jax.ShapeDtypeStruct((b, c, n), jnp.float32),
            jax.ShapeDtypeStruct((b, heads, n, n), jnp.float32),
        ),
        grid_spec=pltpu.PrefetchScalarGridSpec(
            num_scalar_prefetch=0,
            grid=(b,),                     # one batch element per step; megacore on v7x
            in_specs=[
                pl.BlockSpec((1, c, n), lambda i: (i, 0, 0)),       # x_this  (C,N)
                pl.BlockSpec((1, c, n), lambda i: (i, 0, 0)),       # x_other (C,N)
                full((ic, c)),             # Wq^T (scale folded)
                full((ic, 1)),             # bq   (scale folded)
                full((ic, c)),             # Wk^T
                full((ic, 1)),             # bk
                full((c, heads * c)),      # Wvz  (Wv_h @ Wz_h * bn_scale, per head)
                full((1, heads * c)),      # bvz
                full((c, 1)),              # bn shift
                full((ic, heads * n)),     # per-head key mask        (constant)
                full((hpg, hpg * n)),      # per-head broadcast matrix (constant)
                full((hpg * n, hpg)),      # per-head sum matrix       (constant)
            ],
            out_specs=[
                pl.BlockSpec((1, c, n), lambda i: (i, 0, 0)),              # z (C,N)
                pl.BlockSpec((1, heads, n, n), lambda i: (i, 0, 0, 0)),    # attn (heads,N,N)
            ],
        ),
        compiler_params=pltpu.CompilerParams(
            dimension_semantics=("parallel",)),
    )(x_this, x_other, wqt, bq_col, wkt, bk_col, wvz, bvz, shift_col,
      kmask, bcast, bsum)

    z = z_cm.reshape(b, c, hgt, wid)
    return z, attn


# --------------------------- param construction ---------------------------
def make_params(key):
    ks = jax.random.split(key, 12)
    # Conv2d(C_IN, INTER_C, 1) weights stored transposed as (C_IN, INTER_C)
    # so token-major activations can do x(N,C) @ W(C,IC).
    wq = jax.random.normal(ks[0], (C_IN, INTER_C), jnp.float32) * 0.05
    wk = jax.random.normal(ks[1], (C_IN, INTER_C), jnp.float32) * 0.05
    wv = jax.random.normal(ks[2], (C_IN, INTER_C), jnp.float32) * 0.05
    bq = jax.random.normal(ks[3], (1, INTER_C), jnp.float32) * 0.01
    bk = jax.random.normal(ks[4], (1, INTER_C), jnp.float32) * 0.01
    bv = jax.random.normal(ks[5], (1, INTER_C), jnp.float32) * 0.01
    # W_z conv (no bias), stored transposed as (INTER_C, C_IN)
    wz = jax.random.normal(ks[6], (INTER_C, C_IN), jnp.float32) * 0.05
    # NOTE: the PyTorch module inits BN gamma/beta to 0 (so z == 0 at init).  We use
    # non-trivial eval-mode BN statistics so the test exercises the W_z / BatchNorm
    # output path; eval-mode BN is just a per-channel scale + shift.
    gamma = 1.0 + 0.1 * jax.random.normal(ks[7], (C_IN,), jnp.float32)
    beta = 0.1 * jax.random.normal(ks[8], (C_IN,), jnp.float32)
    running_mean = 0.1 * jax.random.normal(ks[9], (C_IN,), jnp.float32)
    running_var = jax.random.uniform(ks[10], (C_IN,), jnp.float32,
                                     minval=0.5, maxval=1.5)
    bn_scale = (gamma / jnp.sqrt(running_var + BN_EPS)).reshape(1, C_IN)
    bn_shift = (beta - running_mean * bn_scale[0]).reshape(1, C_IN)
    # global_tokens parameter exists in __init__ but is unused in this forward path.
    global_tokens = jax.random.normal(ks[11], (NUM_GLOBAL_TOKENS, INTER_C), jnp.float32)
    return dict(wq=wq, bq=bq, wk=wk, bk=bk, wv=wv, bv=bv, wz=wz,
                bn_scale=bn_scale, bn_shift=bn_shift,
                global_tokens=global_tokens)


# ----------------------------- pure-JAX reference --------------------------
def reference(x_this_nchw, x_other_nchw, p):
    with jax.default_matmul_precision("highest"):
        b, c, h, w = x_this_nchw.shape
        n = h * w
        xt = jnp.transpose(x_this_nchw.reshape(b, c, n), (0, 2, 1))   # (B,N,C)
        xo = jnp.transpose(x_other_nchw.reshape(b, c, n), (0, 2, 1))
        q = xo @ p["wq"] + p["bq"]
        k = xt @ p["wk"] + p["bk"]
        v = xt @ p["wv"] + p["bv"]

        def split_heads(t):  # (B,N,IC) -> (B,heads,N,hd): channel-major heads as in PyTorch
            return jnp.transpose(t.reshape(b, n, NUM_HEADS, HEAD_DIM), (0, 2, 1, 3))

        qh, kh, vh = split_heads(q), split_heads(k), split_heads(v)
        s = jnp.einsum("bhnd,bhmd->bhnm", qh, kh) / math.sqrt(HEAD_DIM)
        aw = jax.nn.softmax(s, axis=-1)
        o = jnp.einsum("bhnm,bhmd->bhnd", aw, vh)
        o = jnp.transpose(o, (0, 2, 1, 3)).reshape(b, n, INTER_C)
        y = o @ p["wz"]
        z = y * p["bn_scale"] + p["bn_shift"]
        z = jnp.transpose(z, (0, 2, 1)).reshape(b, c, h, w)
        return z, aw


# --------------------------------- main ------------------------------------
if __name__ == "__main__":
    key = jax.random.PRNGKey(0)
    k1, k2, k3 = jax.random.split(key, 3)
    x_this = jax.random.normal(k1, (B, C_IN, H, W), jnp.float32)
    x_other = jax.random.normal(k2, (B, C_IN, H, W), jnp.float32)
    params = make_params(k3)

    z, attn = non_local_block(x_this, x_other, params)
    jax.block_until_ready(z)
    jax.block_until_ready(attn)

    z_want, attn_want = reference(x_this, x_other, params)
    assert z.shape == (B, C_IN, H, W)
    assert attn.shape == (B, NUM_HEADS, N, N)
    assert jnp.allclose(attn, attn_want, atol=1e-4, rtol=1e-4), \
        float(jnp.max(jnp.abs(attn - attn_want)))
    assert jnp.allclose(z, z_want, atol=5e-4, rtol=5e-4), \
        float(jnp.max(jnp.abs(z - z_want)))

    print("KERNEL_OK")
</pallas_src>

<mosaic_0001>
module attributes {stable_mosaic.version = 11 : i64} {
  func.func @_nonlocal_kernel(%arg0: i32, %arg1: memref<1x32x64xf32, #tpu.memory_space<vmem>>, %arg2: memref<1x32x64xf32, #tpu.memory_space<vmem>>, %arg3: memref<16x32xf32, #tpu.memory_space<vmem>>, %arg4: memref<16x1xf32, #tpu.memory_space<vmem>>, %arg5: memref<16x32xf32, #tpu.memory_space<vmem>>, %arg6: memref<16x1xf32, #tpu.memory_space<vmem>>, %arg7: memref<32x256xf32, #tpu.memory_space<vmem>>, %arg8: memref<1x256xf32, #tpu.memory_space<vmem>>, %arg9: memref<32x1xf32, #tpu.memory_space<vmem>>, %arg10: memref<16x512xf32, #tpu.memory_space<vmem>>, %arg11: memref<2x128xf32, #tpu.memory_space<vmem>>, %arg12: memref<128x2xf32, #tpu.memory_space<vmem>>, %arg13: memref<1x32x64xf32, #tpu.memory_space<vmem>>, %arg14: memref<1x8x64x64xf32, #tpu.memory_space<vmem>>) attributes {dimension_semantics = [#tpu.dimension_semantics<parallel>], iteration_bounds = array<i64: 2>, scalar_prefetch = 0 : i64, scratch_operands = 0 : i64, tpu.core_type = #tpu.core_type<tc>, window_params = [{transform_indices = @transform_0, window_bounds = array<i64: 1, 32, 64>}, {transform_indices = @transform_1, window_bounds = array<i64: 1, 32, 64>}, {pipeline_mode = #tpu.pipeline_mode<synchronous>, transform_indices = @transform_2, window_bounds = array<i64: 16, 32>}, {pipeline_mode = #tpu.pipeline_mode<synchronous>, transform_indices = @transform_3, window_bounds = array<i64: 16, 1>}, {pipeline_mode = #tpu.pipeline_mode<synchronous>, transform_indices = @transform_4, window_bounds = array<i64: 16, 32>}, {pipeline_mode = #tpu.pipeline_mode<synchronous>, transform_indices = @transform_5, window_bounds = array<i64: 16, 1>}, {pipeline_mode = #tpu.pipeline_mode<synchronous>, transform_indices = @transform_6, window_bounds = array<i64: 32, 256>}, {pipeline_mode = #tpu.pipeline_mode<synchronous>, transform_indices = @transform_7, window_bounds = array<i64: 1, 256>}, {pipeline_mode = #tpu.pipeline_mode<synchronous>, transform_indices = @transform_8, window_bounds = array<i64: 32, 1>}, {pipeline_mode = #tpu.pipeline_mode<synchronous>, transform_indices = @transform_9, window_bounds = array<i64: 16, 512>}, {pipeline_mode = #tpu.pipeline_mode<synchronous>, transform_indices = @transform_10, window_bounds = array<i64: 2, 128>}, {pipeline_mode = #tpu.pipeline_mode<synchronous>, transform_indices = @transform_11, window_bounds = array<i64: 128, 2>}, {transform_indices = @transform_12, window_bounds = array<i64: 1, 32, 64>}, {transform_indices = @transform_13, window_bounds = array<i64: 1, 8, 64, 64>}]} {
    %c0 = arith.constant 0 : index
    %c0_0 = arith.constant 0 : index
    %c0_1 = arith.constant 0 : index
    %0 = vector.load %arg1[%c0, %c0_0, %c0_1] : memref<1x32x64xf32, #tpu.memory_space<vmem>>, vector<1x32x64xf32>
    %1 = vector.shape_cast %0 : vector<1x32x64xf32> to vector<32x64xf32>
    %c0_2 = arith.constant 0 : index
    %c0_3 = arith.constant 0 : index
    %c0_4 = arith.constant 0 : index
    %2 = vector.load %arg2[%c0_2, %c0_3, %c0_4] : memref<1x32x64xf32, #tpu.memory_space<vmem>>, vector<1x32x64xf32>
    %3 = vector.shape_cast %2 : vector<1x32x64xf32> to vector<32x64xf32>
    %c0_5 = arith.constant 0 : index
    %c0_6 = arith.constant 0 : index
    %4 = vector.load %arg3[%c0_5, %c0_6] : memref<16x32xf32, #tpu.memory_space<vmem>>, vector<16x32xf32>
    %cst = arith.constant dense<0.000000e+00> : vector<16x64xf32>
    %5 = tpu.matmul %4, %3, %cst {dimension_numbers = #tpu.dot_dimension_numbers<[1], [0], [0], [1], [0, 0, 1, 1], [], []>} : vector<16x32xf32>, vector<32x64xf32>, vector<16x64xf32> -> vector<16x64xf32>
    %c0_7 = arith.constant 0 : index
    %c0_8 = arith.constant 0 : index
    %6 = vector.load %arg4[%c0_7, %c0_8] : memref<16x1xf32, #tpu.memory_space<vmem>>, vector<16x1xf32>
    %7 = vector.broadcast %6 : vector<16x1xf32> to vector<16x64xf32>
    %8 = arith.addf %5, %7 : vector<16x64xf32>
    %9 = tpu.transpose %8, [1, 0] : vector<16x64xf32> -> vector<64x16xf32>
    %c0_9 = arith.constant 0 : index
    %c0_10 = arith.constant 0 : index
    %10 = vector.load %arg5[%c0_9, %c0_10] : memref<16x32xf32, #tpu.memory_space<vmem>>, vector<16x32xf32>
    %cst_11 = arith.constant dense<0.000000e+00> : vector<16x64xf32>
    %11 = tpu.matmul %10, %1, %cst_11 {dimension_numbers = #tpu.dot_dimension_numbers<[1], [0], [0], [1], [0, 0, 1, 1], [], []>} : vector<16x32xf32>, vector<32x64xf32>, vector<16x64xf32> -> vector<16x64xf32>
    %c0_12 = arith.constant 0 : index
    %c0_13 = arith.constant 0 : index
    %12 = vector.load %arg6[%c0_12, %c0_13] : memref<16x1xf32, #tpu.memory_space<vmem>>, vector<16x1xf32>
    %13 = vector.broadcast %12 : vector<16x1xf32> to vector<16x64xf32>
    %14 = arith.addf %11, %13 : vector<16x64xf32>
    %15 = tpu.transpose %1, [1, 0] : vector<32x64xf32> -> vector<64x32xf32>
    %c0_14 = arith.constant 0 : index
    %c0_15 = arith.constant 0 : index
    %16 = vector.load %arg7[%c0_14, %c0_15] : memref<32x256xf32, #tpu.memory_space<vmem>>, vector<32x256xf32>
    %cst_16 = arith.constant dense<0.000000e+00> : vector<64x256xf32>
    %17 = tpu.matmul %15, %16, %cst_16 {dimension_numbers = #tpu.dot_dimension_numbers<[1], [0], [0], [1], [0, 0, 1, 1], [], []>} : vector<64x32xf32>, vector<32x256xf32>, vector<64x256xf32> -> vector<64x256xf32>
    %c0_17 = arith.constant 0 : index
    %c0_18 = arith.constant 0 : index
    %18 = vector.load %arg8[%c0_17, %c0_18] : memref<1x256xf32, #tpu.memory_space<vmem>>, vector<1x256xf32>
    %19 = vector.broadcast %18 : vector<1x256xf32> to vector<64x256xf32>
    %20 = arith.addf %17, %19 : vector<64x256xf32>
    %cst_19 = arith.constant 0.000000e+00 : f32
    %21 = vector.broadcast %cst_19 : f32 to vector<64x32xf32>
    %22 = tpu.concatenate %14, %14 in 1 : vector<16x64xf32>, vector<16x64xf32> -> vector<16x128xf32>
    %c0_20 = arith.constant 0 : index
    %c0_21 = arith.constant 0 : index
    %23 = vector.load %arg10[%c0_20, %c0_21] : memref<16x512xf32, #tpu.memory_space<vmem>>, vector<16x128xf32>
    %24 = arith.mulf %22, %23 : vector<16x128xf32>
    %cst_22 = arith.constant dense<0.000000e+00> : vector<64x128xf32>
    %25 = tpu.matmul %9, %24, %cst_22 {dimension_numbers = #tpu.dot_dimension_numbers<[1], [0], [0], [1], [0, 0, 1, 1], [], []>} : vector<64x16xf32>, vector<16x128xf32>, vector<64x128xf32> -> vector<64x128xf32>
    %26 = vector.extract_strided_slice %25 {offsets = [0, 0], sizes = [64, 64], strides = [1, 1]} : vector<64x128xf32> to vector<64x64xf32>
    %cst_23 = arith.constant dense<0xFF800000> : vector<64xf32>
    %27 = vector.multi_reduction <maximumf>, %26, %cst_23 [1] : vector<64x64xf32> to vector<64xf32>
    %28 = vector.shape_cast %27 : vector<64xf32> to vector<64x1xf32>
    %29 = vector.extract_strided_slice %25 {offsets = [0, 64], sizes = [64, 64], strides = [1, 1]} : vector<64x128xf32> to vector<64x64xf32>
    %cst_24 = arith.constant dense<0xFF800000> : vector<64xf32>
    %30 = vector.multi_reduction <maximumf>, %29, %cst_24 [1] : vector<64x64xf32> to vector<64xf32>
    %31 = vector.shape_cast %30 : vector<64xf32> to vector<64x1xf32>
    %32 = tpu.concatenate %28, %31 in 1 : vector<64x1xf32>, vector<64x1xf32> -> vector<64x2xf32>
    %c0_25 = arith.constant 0 : index
    %c0_26 = arith.constant 0 : index
    %33 = vector.load %arg11[%c0_25, %c0_26] : memref<2x128xf32, #tpu.memory_space<vmem>>, vector<2x128xf32>
    %cst_27 = arith.constant dense<0.000000e+00> : vector<64x128xf32>
    %34 = tpu.matmul %32, %33, %cst_27 {dimension_numbers = #tpu.dot_dimension_numbers<[1], [0], [0], [1], [0, 0, 1, 1], [], []>} : vector<64x2xf32>, vector<2x128xf32>, vector<64x128xf32> -> vector<64x128xf32>
    %35 = arith.subf %25, %34 : vector<64x128xf32>
    %36 = math.exp %35 : vector<64x128xf32>
    %c0_28 = arith.constant 0 : index
    %c0_29 = arith.constant 0 : index
    %37 = vector.load %arg12[%c0_28, %c0_29] : memref<128x2xf32, #tpu.memory_space<vmem>>, vector<128x2xf32>
    %cst_30 = arith.constant dense<0.000000e+00> : vector<64x2xf32>
    %38 = tpu.matmul %36, %37, %cst_30 {dimension_numbers = #tpu.dot_dimension_numbers<[1], [0], [0], [1], [0, 0, 1, 1], [], []>} : vector<64x128xf32>, vector<128x2xf32>, vector<64x2xf32> -> vector<64x2xf32>
    %39 = tpu.reciprocal %38 : vector<64x2xf32> -> vector<64x2xf32>
    %c0_31 = arith.constant 0 : index
    %c0_32 = arith.constant 0 : index
    %40 = vector.load %arg11[%c0_31, %c0_32] : memref<2x128xf32, #tpu.memory_space<vmem>>, vector<2x128xf32>
    %cst_33 = arith.constant dense<0.000000e+00> : vector<64x128xf32>
    %41 = tpu.matmul %39, %40, %cst_33 {dimension_numbers = #tpu.dot_dimension_numbers<[1], [0], [0], [1], [0, 0, 1, 1], [], []>} : vector<64x2xf32>, vector<2x128xf32>, vector<64x128xf32> -> vector<64x128xf32>
    %42 = arith.mulf %36, %41 : vector<64x128xf32>
    %43 = vector.extract_strided_slice %42 {offsets = [0, 0], sizes = [64, 64], strides = [1, 1]} : vector<64x128xf32> to vector<64x64xf32>
    %c0_34 = arith.constant 0 : index
    %c0_35 = arith.constant 0 : index
    %c0_36 = arith.constant 0 : index
    %c0_37 = arith.constant 0 : index
    %44 = vector.load %arg14[%c0_34, %c0_35, %c0_36, %c0_37] : memref<1x8x64x64xf32, #tpu.memory_space<vmem>>, vector<1x1x64x64xf32>
    %45 = vector.shape_cast %44 : vector<1x1x64x64xf32> to vector<64x64xf32>
    %46 = vector.shape_cast %43 : vector<64x64xf32> to vector<1x1x64x64xf32>
    tpu.vector_store %arg14[%c0_34, %c0_35, %c0_36, %c0_37], %46 {strides = array<i32>} : memref<1x8x64x64xf32, #tpu.memory_space<vmem>>, vector<1x1x64x64xf32>,
    %47 = vector.extract_strided_slice %42 {offsets = [0, 64], sizes = [64, 64], strides = [1, 1]} : vector<64x128xf32> to vector<64x64xf32>
    %c0_38 = arith.constant 0 : index
    %c1 = arith.constant 1 : index
    %c0_39 = arith.constant 0 : index
    %c0_40 = arith.constant 0 : index
    %48 = vector.load %arg14[%c0_38, %c1, %c0_39, %c0_40] : memref<1x8x64x64xf32, #tpu.memory_space<vmem>>, vector<1x1x64x64xf32>
    %49 = vector.shape_cast %48 : vector<1x1x64x64xf32> to vector<64x64xf32>
    %50 = vector.shape_cast %47 : vector<64x64xf32> to vector<1x1x64x64xf32>
    tpu.vector_store %arg14[%c0_38, %c1, %c0_39, %c0_40], %50 {strides = array<i32>} : memref<1x8x64x64xf32, #tpu.memory_space<vmem>>, vector<1x1x64x64xf32>,
    %51 = vector.extract_strided_slice %20 {offsets = [0, 0], sizes = [64, 32], strides = [1, 1]} : vector<64x256xf32> to vector<64x32xf32>
    %52 = vector.extract_strided_slice %20 {offsets = [0, 32], sizes = [64, 32], strides = [1, 1]} : vector<64x256xf32> to vector<64x32xf32>
    %53 = tpu.concatenate %51, %52 in 0 : vector<64x32xf32>, vector<64x32xf32> -> vector<128x32xf32>
    %cst_41 = arith.constant dense<0.000000e+00> : vector<64x32xf32>
    %54 = tpu.matmul %42, %53, %cst_41 {dimension_numbers = #tpu.dot_dimension_numbers<[1], [0], [0], [1], [0, 0, 1, 1], [], []>} : vector<64x128xf32>, vector<128x32xf32>, vector<64x32xf32> -> vector<64x32xf32>
    %55 = arith.addf %21, %54 : vector<64x32xf32>
    %56 = tpu.concatenate %14, %14 in 1 : vector<16x64xf32>, vector<16x64xf32> -> vector<16x128xf32>
    %c0_42 = arith.constant 0 : index
    %c128 = arith.constant 128 : index
    %57 = vector.load %arg10[%c0_42, %c128] : memref<16x512xf32, #tpu.memory_space<vmem>>, vector<16x128xf32>
    %58 = arith.mulf %56, %57 : vector<16x128xf32>
    %cst_43 = arith.constant dense<0.000000e+00> : vector<64x128xf32>
    %59 = tpu.matmul %9, %58, %cst_43 {dimension_numbers = #tpu.dot_dimension_numbers<[1], [0], [0], [1], [0, 0, 1, 1], [], []>} : vector<64x16xf32>, vector<16x128xf32>, vector<64x128xf32> -> vector<64x128xf32>
    %60 = vector.extract_strided_slice %59 {offsets = [0, 0], sizes = [64, 64], strides = [1, 1]} : vector<64x128xf32> to vector<64x64xf32>
    %cst_44 = arith.constant dense<0xFF800000> : vector<64xf32>
    %61 = vector.multi_reduction <maximumf>, %60, %cst_44 [1] : vector<64x64xf32> to vector<64xf32>
    %62 = vector.shape_cast %61 : vector<64xf32> to vector<64x1xf32>
    %63 = vector.extract_strided_slice %59 {offsets = [0, 64], sizes = [64, 64], strides = [1, 1]} : vector<64x128xf32> to vector<64x64xf32>
    %cst_45 = arith.constant dense<0xFF800000> : vector<64xf32>
    %64 = vector.multi_reduction <maximumf>, %63, %cst_45 [1] : vector<64x64xf32> to vector<64xf32>
    %65 = vector.shape_cast %64 : vector<64xf32> to vector<64x1xf32>
    %66 = tpu.concatenate %62, %65 in 1 : vector<64x1xf32>, vector<64x1xf32> -> vector<64x2xf32>
    %c0_46 = arith.constant 0 : index
    %c0_47 = arith.constant 0 : index
    %67 = vector.load %arg11[%c0_46, %c0_47] : memref<2x128xf32, #tpu.memory_space<vmem>>, vector<2x128xf32>
    %cst_48 = arith.constant dense<0.000000e+00> : vector<64x128xf32>
    %68 = tpu.matmul %66, %67, %cst_48 {dimension_numbers = #tpu.dot_dimension_numbers<[1], [0], [0], [1], [0, 0, 1, 1], [], []>} : vector<64x2xf32>, vector<2x128xf32>, vector<64x128xf32> -> vector<64x128xf32>
    %69 = arith.subf %59, %68 : vector<64x128xf32>
    %70 = math.exp %69 : vector<64x128xf32>
    %c0_49 = arith.constant 0 : index
    %c0_50 = arith.constant 0 : index
    %71 = vector.load %arg12[%c0_49, %c0_50] : memref<128x2xf32, #tpu.memory_space<vmem>>, vector<128x2xf32>
    %cst_51 = arith.constant dense<0.000000e+00> : vector<64x2xf32>
    %72 = tpu.matmul %70, %71, %cst_51 {dimension_numbers = #tpu.dot_dimension_numbers<[1], [0], [0], [1], [0, 0, 1, 1], [], []>} : vector<64x128xf32>, vector<128x2xf32>, vector<64x2xf32> -> vector<64x2xf32>
    %73 = tpu.reciprocal %72 : vector<64x2xf32> -> vector<64x2xf32>
    %c0_52 = arith.constant 0 : index
    %c0_53 = arith.constant 0 : index
    %74 = vector.load %arg11[%c0_52, %c0_53] : memref<2x128xf32, #tpu.memory_space<vmem>>, vector<2x128xf32>
    %cst_54 = arith.constant dense<0.000000e+00> : vector<64x128xf32>
    %75 = tpu.matmul %73, %74, %cst_54 {dimension_numbers = #tpu.dot_dimension_numbers<[1], [0], [0], [1], [0, 0, 1, 1], [], []>} : vector<64x2xf32>, vector<2x128xf32>, vector<64x128xf32> -> vector<64x128xf32>
    %76 = arith.mulf %70, %75 : vector<64x128xf32>
    %77 = vector.extract_strided_slice %76 {offsets = [0, 0], sizes = [64, 64], strides = [1, 1]} : vector<64x128xf32> to vector<64x64xf32>
    %c0_55 = arith.constant 0 : index
    %c2 = arith.constant 2 : index
    %c0_56 = arith.constant 0 : index
    %c0_57 = arith.constant 0 : index
    %78 = vector.load %arg14[%c0_55, %c2, %c0_56, %c0_57] : memref<1x8x64x64xf32, #tpu.memory_space<vmem>>, vector<1x1x64x64xf32>
    %79 = vector.shape_cast %78 : vector<1x1x64x64xf32> to vector<64x64xf32>
    %80 = vector.shape_cast %77 : vector<64x64xf32> to vector<1x1x64x64xf32>
    tpu.vector_store %arg14[%c0_55, %c2, %c0_56, %c0_57], %80 {strides = array<i32>} : memref<1x8x64x64xf32, #tpu.memory_space<vmem>>, vector<1x1x64x64xf32>,
    %81 = vector.extract_strided_slice %76 {offsets = [0, 64], sizes = [64, 64], strides = [1, 1]} : vector<64x128xf32> to vector<64x64xf32>
    %c0_58 = arith.constant 0 : index
    %c3 = arith.constant 3 : index
    %c0_59 = arith.constant 0 : index
    %c0_60 = arith.constant 0 : index
    %82 = vector.load %arg14[%c0_58, %c3, %c0_59, %c0_60] : memref<1x8x64x64xf32, #tpu.memory_space<vmem>>, vector<1x1x64x64xf32>
    %83 = vector.shape_cast %82 : vector<1x1x64x64xf32> to vector<64x64xf32>
    %84 = vector.shape_cast %81 : vector<64x64xf32> to vector<1x1x64x64xf32>
    tpu.vector_store %arg14[%c0_58, %c3, %c0_59, %c0_60], %84 {strides = array<i32>} : memref<1x8x64x64xf32, #tpu.memory_space<vmem>>, vector<1x1x64x64xf32>,
    %85 = vector.extract_strided_slice %20 {offsets = [0, 64], sizes = [64, 32], strides = [1, 1]} : vector<64x256xf32> to vector<64x32xf32>
    %86 = vector.extract_strided_slice %20 {offsets = [0, 96], sizes = [64, 32], strides = [1, 1]} : vector<64x256xf32> to vector<64x32xf32>
    %87 = tpu.concatenate %85, %86 in 0 : vector<64x32xf32>, vector<64x32xf32> -> vector<128x32xf32>
    %cst_61 = arith.constant dense<0.000000e+00> : vector<64x32xf32>
    %88 = tpu.matmul %76, %87, %cst_61 {dimension_numbers = #tpu.dot_dimension_numbers<[1], [0], [0], [1], [0, 0, 1, 1], [], []>} : vector<64x128xf32>, vector<128x32xf32>, vector<64x32xf32> -> vector<64x32xf32>
    %89 = arith.addf %55, %88 : vector<64x32xf32>
    %90 = tpu.concatenate %14, %14 in 1 : vector<16x64xf32>, vector<16x64xf32> -> vector<16x128xf32>
    %c0_62 = arith.constant 0 : index
    %c256 = arith.constant 256 : index
    %91 = vector.load %arg10[%c0_62, %c256] : memref<16x512xf32, #tpu.memory_space<vmem>>, vector<16x128xf32>
    %92 = arith.mulf %90, %91 : vector<16x128xf32>
    %cst_63 = arith.constant dense<0.000000e+00> : vector<64x128xf32>
    %93 = tpu.matmul %9, %92, %cst_63 {dimension_numbers = #tpu.dot_dimension_numbers<[1], [0], [0], [1], [0, 0, 1, 1], [], []>} : vector<64x16xf32>, vector<16x128xf32>, vector<64x128xf32> -> vector<64x128xf32>
    %94 = vector.extract_strided_slice %93 {offsets = [0, 0], sizes = [64, 64], strides = [1, 1]} : vector<64x128xf32> to vector<64x64xf32>
    %cst_64 = arith.constant dense<0xFF800000> : vector<64xf32>
    %95 = vector.multi_reduction <maximumf>, %94, %cst_64 [1] : vector<64x64xf32> to vector<64xf32>
    %96 = vector.shape_cast %95 : vector<64xf32> to vector<64x1xf32>
    %97 = vector.extract_strided_slice %93 {offsets = [0, 64], sizes = [64, 64], strides = [1, 1]} : vector<64x128xf32> to vector<64x64xf32>
    %cst_65 = arith.constant dense<0xFF800000> : vector<64xf32>
    %98 = vector.multi_reduction <maximumf>, %97, %cst_65 [1] : vector<64x64xf32> to vector<64xf32>
    %99 = vector.shape_cast %98 : vector<64xf32> to vector<64x1xf32>
    %100 = tpu.concatenate %96, %99 in 1 : vector<64x1xf32>, vector<64x1xf32> -> vector<64x2xf32>
    %c0_66 = arith.constant 0 : index
    %c0_67 = arith.constant 0 : index
    %101 = vector.load %arg11[%c0_66, %c0_67] : memref<2x128xf32, #tpu.memory_space<vmem>>, vector<2x128xf32>
    %cst_68 = arith.constant dense<0.000000e+00> : vector<64x128xf32>
    %102 = tpu.matmul %100, %101, %cst_68 {dimension_numbers = #tpu.dot_dimension_numbers<[1], [0], [0], [1], [0, 0, 1, 1], [], []>} : vector<64x2xf32>, vector<2x128xf32>, vector<64x128xf32> -> vector<64x128xf32>
    %103 = arith.subf %93, %102 : vector<64x128xf32>
    %104 = math.exp %103 : vector<64x128xf32>
    %c0_69 = arith.constant 0 : index
    %c0_70 = arith.constant 0 : index
    %105 = vector.load %arg12[%c0_69, %c0_70] : memref<128x2xf32, #tpu.memory_space<vmem>>, vector<128x2xf32>
    %cst_71 = arith.constant dense<0.000000e+00> : vector<64x2xf32>
    %106 = tpu.matmul %104, %105, %cst_71 {dimension_numbers = #tpu.dot_dimension_numbers<[1], [0], [0], [1], [0, 0, 1, 1], [], []>} : vector<64x128xf32>, vector<128x2xf32>, vector<64x2xf32> -> vector<64x2xf32>
    %107 = tpu.reciprocal %106 : vector<64x2xf32> -> vector<64x2xf32>
    %c0_72 = arith.constant 0 : index
    %c0_73 = arith.constant 0 : index
    %108 = vector.load %arg11[%c0_72, %c0_73] : memref<2x128xf32, #tpu.memory_space<vmem>>, vector<2x128xf32>
    %cst_74 = arith.constant dense<0.000000e+00> : vector<64x128xf32>
    %109 = tpu.matmul %107, %108, %cst_74 {dimension_numbers = #tpu.dot_dimension_numbers<[1], [0], [0], [1], [0, 0, 1, 1], [], []>} : vector<64x2xf32>, vector<2x128xf32>, vector<64x128xf32> -> vector<64x128xf32>
    %110 = arith.mulf %104, %109 : vector<64x128xf32>
    %111 = vector.extract_strided_slice %110 {offsets = [0, 0], sizes = [64, 64], strides = [1, 1]} : vector<64x128xf32> to vector<64x64xf32>
    %c0_75 = arith.constant 0 : index
    %c4 = arith.constant 4 : index
    %c0_76 = arith.constant 0 : index
    %c0_77 = arith.constant 0 : index
    %112 = vector.load %arg14[%c0_75, %c4, %c0_76, %c0_77] : memref<1x8x64x64xf32, #tpu.memory_space<vmem>>, vector<1x1x64x64xf32>
    %113 = vector.shape_cast %112 : vector<1x1x64x64xf32> to vector<64x64xf32>
    %114 = vector.shape_cast %111 : vector<64x64xf32> to vector<1x1x64x64xf32>
    tpu.vector_store %arg14[%c0_75, %c4, %c0_76, %c0_77], %114 {strides = array<i32>} : memref<1x8x64x64xf32, #tpu.memory_space<vmem>>, vector<1x1x64x64xf32>,
    %115 = vector.extract_strided_slice %110 {offsets = [0, 64], sizes = [64, 64], strides = [1, 1]} : vector<64x128xf32> to vector<64x64xf32>
    %c0_78 = arith.constant 0 : index
    %c5 = arith.constant 5 : index
    %c0_79 = arith.constant 0 : index
    %c0_80 = arith.constant 0 : index
    %116 = vector.load %arg14[%c0_78, %c5, %c0_79, %c0_80] : memref<1x8x64x64xf32, #tpu.memory_space<vmem>>, vector<1x1x64x64xf32>
    %117 = vector.shape_cast %116 : vector<1x1x64x64xf32> to vector<64x64xf32>
    %118 = vector.shape_cast %115 : vector<64x64xf32> to vector<1x1x64x64xf32>
    tpu.vector_store %arg14[%c0_78, %c5, %c0_79, %c0_80], %118 {strides = array<i32>} : memref<1x8x64x64xf32, #tpu.memory_space<vmem>>, vector<1x1x64x64xf32>,
    %119 = vector.extract_strided_slice %20 {offsets = [0, 128], sizes = [64, 32], strides = [1, 1]} : vector<64x256xf32> to vector<64x32xf32>
    %120 = vector.extract_strided_slice %20 {offsets = [0, 160], sizes = [64, 32], strides = [1, 1]} : vector<64x256xf32> to vector<64x32xf32>
    %121 = tpu.concatenate %119, %120 in 0 : vector<64x32xf32>, vector<64x32xf32> -> vector<128x32xf32>
    %cst_81 = arith.constant dense<0.000000e+00> : vector<64x32xf32>
    %122 = tpu.matmul %110, %121, %cst_81 {dimension_numbers = #tpu.dot_dimension_numbers<[1], [0], [0], [1], [0, 0, 1, 1], [], []>} : vector<64x128xf32>, vector<128x32xf32>, vector<64x32xf32> -> vector<64x32xf32>
    %123 = arith.addf %89, %122 : vector<64x32xf32>
    %124 = tpu.concatenate %14, %14 in 1 : vector<16x64xf32>, vector<16x64xf32> -> vector<16x128xf32>
    %c0_82 = arith.constant 0 : index
    %c384 = arith.constant 384 : index
    %125 = vector.load %arg10[%c0_82, %c384] : memref<16x512xf32, #tpu.memory_space<vmem>>, vector<16x128xf32>
    %126 = arith.mulf %124, %125 : vector<16x128xf32>
    %cst_83 = arith.constant dense<0.000000e+00> : vector<64x128xf32>
    %127 = tpu.matmul %9, %126, %cst_83 {dimension_numbers = #tpu.dot_dimension_numbers<[1], [0], [0], [1], [0, 0, 1, 1], [], []>} : vector<64x16xf32>, vector<16x128xf32>, vector<64x128xf32> -> vector<64x128xf32>
    %128 = vector.extract_strided_slice %127 {offsets = [0, 0], sizes = [64, 64], strides = [1, 1]} : vector<64x128xf32> to vector<64x64xf32>
    %cst_84 = arith.constant dense<0xFF800000> : vector<64xf32>
    %129 = vector.multi_reduction <maximumf>, %128, %cst_84 [1] : vector<64x64xf32> to vector<64xf32>
    %130 = vector.shape_cast %129 : vector<64xf32> to vector<64x1xf32>
    %131 = vector.extract_strided_slice %127 {offsets = [0, 64], sizes = [64, 64], strides = [1, 1]} : vector<64x128xf32> to vector<64x64xf32>
    %cst_85 = arith.constant dense<0xFF800000> : vector<64xf32>
    %132 = vector.multi_reduction <maximumf>, %131, %cst_85 [1] : vector<64x64xf32> to vector<64xf32>
    %133 = vector.shape_cast %132 : vector<64xf32> to vector<64x1xf32>
    %134 = tpu.concatenate %130, %133 in 1 : vector<64x1xf32>, vector<64x1xf32> -> vector<64x2xf32>
    %c0_86 = arith.constant 0 : index
    %c0_87 = arith.constant 0 : index
    %135 = vector.load %arg11[%c0_86, %c0_87] : memref<2x128xf32, #tpu.memory_space<vmem>>, vector<2x128xf32>
    %cst_88 = arith.constant dense<0.000000e+00> : vector<64x128xf32>
    %136 = tpu.matmul %134, %135, %cst_88 {dimension_numbers = #tpu.dot_dimension_numbers<[1], [0], [0], [1], [0, 0, 1, 1], [], []>} : vector<64x2xf32>, vector<2x128xf32>, vector<64x128xf32> -> vector<64x128xf32>
    %137 = arith.subf %127, %136 : vector<64x128xf32>
    %138 = math.exp %137 : vector<64x128xf32>
    %c0_89 = arith.constant 0 : index
    %c0_90 = arith.constant 0 : index
    %139 = vector.load %arg12[%c0_89, %c0_90] : memref<128x2xf32, #tpu.memory_space<vmem>>, vector<128x2xf32>
    %cst_91 = arith.constant dense<0.000000e+00> : vector<64x2xf32>
    %140 = tpu.matmul %138, %139, %cst_91 {dimension_numbers = #tpu.dot_dimension_numbers<[1], [0], [0], [1], [0, 0, 1, 1], [], []>} : vector<64x128xf32>, vector<128x2xf32>, vector<64x2xf32> -> vector<64x2xf32>
    %141 = tpu.reciprocal %140 : vector<64x2xf32> -> vector<64x2xf32>
    %c0_92 = arith.constant 0 : index
    %c0_93 = arith.constant 0 : index
    %142 = vector.load %arg11[%c0_92, %c0_93] : memref<2x128xf32, #tpu.memory_space<vmem>>, vector<2x128xf32>
    %cst_94 = arith.constant dense<0.000000e+00> : vector<64x128xf32>
    %143 = tpu.matmul %141, %142, %cst_94 {dimension_numbers = #tpu.dot_dimension_numbers<[1], [0], [0], [1], [0, 0, 1, 1], [], []>} : vector<64x2xf32>, vector<2x128xf32>, vector<64x128xf32> -> vector<64x128xf32>
    %144 = arith.mulf %138, %143 : vector<64x128xf32>
    %145 = vector.extract_strided_slice %144 {offsets = [0, 0], sizes = [64, 64], strides = [1, 1]} : vector<64x128xf32> to vector<64x64xf32>
    %c0_95 = arith.constant 0 : index
    %c6 = arith.constant 6 : index
    %c0_96 = arith.constant 0 : index
    %c0_97 = arith.constant 0 : index
    %146 = vector.load %arg14[%c0_95, %c6, %c0_96, %c0_97] : memref<1x8x64x64xf32, #tpu.memory_space<vmem>>, vector<1x1x64x64xf32>
    %147 = vector.shape_cast %146 : vector<1x1x64x64xf32> to vector<64x64xf32>
    %148 = vector.shape_cast %145 : vector<64x64xf32> to vector<1x1x64x64xf32>
    tpu.vector_store %arg14[%c0_95, %c6, %c0_96, %c0_97], %148 {strides = array<i32>} : memref<1x8x64x64xf32, #tpu.memory_space<vmem>>, vector<1x1x64x64xf32>,
    %149 = vector.extract_strided_slice %144 {offsets = [0, 64], sizes = [64, 64], strides = [1, 1]} : vector<64x128xf32> to vector<64x64xf32>
    %c0_98 = arith.constant 0 : index
    %c7 = arith.constant 7 : index
    %c0_99 = arith.constant 0 : index
    %c0_100 = arith.constant 0 : index
    %150 = vector.load %arg14[%c0_98, %c7, %c0_99, %c0_100] : memref<1x8x64x64xf32, #tpu.memory_space<vmem>>, vector<1x1x64x64xf32>
    %151 = vector.shape_cast %150 : vector<1x1x64x64xf32> to vector<64x64xf32>
    %152 = vector.shape_cast %149 : vector<64x64xf32> to vector<1x1x64x64xf32>
    tpu.vector_store %arg14[%c0_98, %c7, %c0_99, %c0_100], %152 {strides = array<i32>} : memref<1x8x64x64xf32, #tpu.memory_space<vmem>>, vector<1x1x64x64xf32>,
    %153 = vector.extract_strided_slice %20 {offsets = [0, 192], sizes = [64, 32], strides = [1, 1]} : vector<64x256xf32> to vector<64x32xf32>
    %154 = vector.extract_strided_slice %20 {offsets = [0, 224], sizes = [64, 32], strides = [1, 1]} : vector<64x256xf32> to vector<64x32xf32>
    %155 = tpu.concatenate %153, %154 in 0 : vector<64x32xf32>, vector<64x32xf32> -> vector<128x32xf32>
    %cst_101 = arith.constant dense<0.000000e+00> : vector<64x32xf32>
    %156 = tpu.matmul %144, %155, %cst_101 {dimension_numbers = #tpu.dot_dimension_numbers<[1], [0], [0], [1], [0, 0, 1, 1], [], []>} : vector<64x128xf32>, vector<128x32xf32>, vector<64x32xf32> -> vector<64x32xf32>
    %157 = arith.addf %123, %156 : vector<64x32xf32>
    %158 = tpu.transpose %157, [1, 0] : vector<64x32xf32> -> vector<32x64xf32>
    %c0_102 = arith.constant 0 : index
    %c0_103 = arith.constant 0 : index
    %159 = vector.load %arg9[%c0_102, %c0_103] : memref<32x1xf32, #tpu.memory_space<vmem>>, vector<32x1xf32>
    %160 = vector.broadcast %159 : vector<32x1xf32> to vector<32x64xf32>
    %161 = arith.addf %158, %160 : vector<32x64xf32>
    %c0_104 = arith.constant 0 : index
    %c0_105 = arith.constant 0 : index
    %c0_106 = arith.constant 0 : index
    %162 = vector.load %arg13[%c0_104, %c0_105, %c0_106] : memref<1x32x64xf32, #tpu.memory_space<vmem>>, vector<1x32x64xf32>
    %163 = vector.shape_cast %162 : vector<1x32x64xf32> to vector<32x64xf32>
    %164 = vector.shape_cast %161 : vector<32x64xf32> to vector<1x32x64xf32>
    tpu.vector_store %arg13[%c0_104, %c0_105, %c0_106], %164 {strides = array<i32>} : memref<1x32x64xf32, #tpu.memory_space<vmem>>, vector<1x32x64xf32>,
    return
  }
  func.func @transform_0(%arg0: i32) -> (i32, i32, i32) {
    %c0_i32 = arith.constant 0 : i32
    %c0_i32_0 = arith.constant 0 : i32
    %c0_i32_1 = arith.constant 0 : i32
    return %arg0, %c0_i32, %c0_i32_0 : i32, i32, i32
  }
  func.func @transform_1(%arg0: i32) -> (i32, i32, i32) {
    %c0_i32 = arith.constant 0 : i32
    %c0_i32_0 = arith.constant 0 : i32
    %c0_i32_1 = arith.constant 0 : i32
    return %arg0, %c0_i32, %c0_i32_0 : i32, i32, i32
  }
  func.func @transform_2(%arg0: i32) -> (i32, i32) {
    %c0_i32 = arith.constant 0 : i32
    %c0_i32_0 = arith.constant 0 : i32
    %c0_i32_1 = arith.constant 0 : i32
    return %c0_i32, %c0_i32_0 : i32, i32
  }
  func.func @transform_3(%arg0: i32) -> (i32, i32) {
    %c0_i32 = arith.constant 0 : i32
    %c0_i32_0 = arith.constant 0 : i32
    %c0_i32_1 = arith.constant 0 : i32
    return %c0_i32, %c0_i32_0 : i32, i32
  }
  func.func @transform_4(%arg0: i32) -> (i32, i32) {
    %c0_i32 = arith.constant 0 : i32
    %c0_i32_0 = arith.constant 0 : i32
    %c0_i32_1 = arith.constant 0 : i32
    return %c0_i32, %c0_i32_0 : i32, i32
  }
  func.func @transform_5(%arg0: i32) -> (i32, i32) {
    %c0_i32 = arith.constant 0 : i32
    %c0_i32_0 = arith.constant 0 : i32
    %c0_i32_1 = arith.constant 0 : i32
    return %c0_i32, %c0_i32_0 : i32, i32
  }
  func.func @transform_6(%arg0: i32) -> (i32, i32) {
    %c0_i32 = arith.constant 0 : i32
    %c0_i32_0 = arith.constant 0 : i32
    %c0_i32_1 = arith.constant 0 : i32
    return %c0_i32, %c0_i32_0 : i32, i32
  }
  func.func @transform_7(%arg0: i32) -> (i32, i32) {
    %c0_i32 = arith.constant 0 : i32
    %c0_i32_0 = arith.constant 0 : i32
    %c0_i32_1 = arith.constant 0 : i32
    return %c0_i32, %c0_i32_0 : i32, i32
  }
  func.func @transform_8(%arg0: i32) -> (i32, i32) {
    %c0_i32 = arith.constant 0 : i32
    %c0_i32_0 = arith.constant 0 : i32
    %c0_i32_1 = arith.constant 0 : i32
    return %c0_i32, %c0_i32_0 : i32, i32
  }
  func.func @transform_9(%arg0: i32) -> (i32, i32) {
    %c0_i32 = arith.constant 0 : i32
    %c0_i32_0 = arith.constant 0 : i32
    %c0_i32_1 = arith.constant 0 : i32
    return %c0_i32, %c0_i32_0 : i32, i32
  }
  func.func @transform_10(%arg0: i32) -> (i32, i32) {
    %c0_i32 = arith.constant 0 : i32
    %c0_i32_0 = arith.constant 0 : i32
    %c0_i32_1 = arith.constant 0 : i32
    return %c0_i32, %c0_i32_0 : i32, i32
  }
  func.func @transform_11(%arg0: i32) -> (i32, i32) {
    %c0_i32 = arith.constant 0 : i32
    %c0_i32_0 = arith.constant 0 : i32
    %c0_i32_1 = arith.constant 0 : i32
    return %c0_i32, %c0_i32_0 : i32, i32
  }
  func.func @transform_12(%arg0: i32) -> (i32, i32, i32) {
    %c0_i32 = arith.constant 0 : i32
    %c0_i32_0 = arith.constant 0 : i32
    %c0_i32_1 = arith.constant 0 : i32
    return %arg0, %c0_i32, %c0_i32_0 : i32, i32, i32
  }
  func.func @transform_13(%arg0: i32) -> (i32, i32, i32, i32) {
    %c0_i32 = arith.constant 0 : i32
    %c0_i32_0 = arith.constant 0 : i32
    %c0_i32_1 = arith.constant 0 : i32
    %c0_i32_2 = arith.constant 0 : i32
    return %arg0, %c0_i32, %c0_i32_0, %c0_i32_1 : i32, i32, i32, i32
  }
}

</mosaic_0001>

<bundles_post_ra>
// kernel: non_local_block.1
= control target key start
LH: loop header
LB: loop body
LE: loop exit
PB: predicated region body
PF: predicated region fallthrough
CT: control target
= control target key end

     0   :  { %19 = vsyncpa [#allocation3], 0  ;;  %s7498_s0 = inlined_call_operand.vmem [shape: f32[2,32,64], index: 0, kind: input, shape index: {}]   ;;  %s7499_s1 = inlined_call_operand.vmem [shape: f32[2,32,64], index: 1, kind: input, shape index: {}]   ;;  %s7500_s2 = inlined_call_operand.vmem [shape: f32[16,32], index: 2, kind: input, shape index: {}]   ;;  %s7501_s3 = inlined_call_operand.vmem [shape: f32[16,1], index: 3, kind: input, shape index: {}]   ;;  %s7502_s4 = inlined_call_operand.vmem [shape: f32[16,32], index: 4, kind: input, shape index: {}]   ;;  %s7503_s5 = inlined_call_operand.vmem [shape: f32[16,1], index: 5, kind: input, shape index: {}]   ;;  %s7504_s6 = inlined_call_operand.vmem [shape: f32[32,256], index: 6, kind: input, shape index: {}]   ;;  %s7505_s7 = inlined_call_operand.vmem [shape: f32[1,256], index: 7, kind: input, shape index: {}]   ;;  %s7506_s8 = inlined_call_operand.vmem [shape: f32[32,1], index: 8, kind: input, shape index: {}]   ;;  %s7507_s9 = inlined_call_operand.vmem [shape: f32[16,512], index: 9, kind: input, shape index: {}]   ;;  %s7508_s10 = inlined_call_operand.vmem [shape: f32[2,128], index: 10, kind: input, shape index: {}]   ;;  %s7509_s11 = inlined_call_operand.vmem [shape: f32[128,2], index: 11, kind: input, shape index: {}]   ;;  %s7510_s12 = inlined_call_operand.vmem [shape: f32[2,32,64], index: 12, kind: output, shape index: {0}]   ;;  %s7511_s13 = inlined_call_operand.hbm [shape: f32[2,8,64,64], index: 13, kind: output, shape index: {1}]  }
   0x1   :  { %21 = vsyncpa [#allocation3 + $0x1], 0  ;;  %s6078_s25 = smov 0   ;;  %s6080_s26 = smov 0  }
   0x2   :  { %s6082_s27 = smov 0   ;;  %s6084_s28 = smov 0  }
   0x3 LB: > { %7528 = sst [smem:[#allocation5_spill]] %s5995_s27  ;;  %s6099_s29 = sadd.s32 4294967295, %s5999_s28   ;;  %s5999_s28 = sphi %s6084_s28, %s7556_s28   ;;  %s5995_s27 = sphi %s6082_s27, %s7558_s27   ;;  %s5991_s26 = sphi %s6080_s26, %s7560_s26   ;;  %s5987_s25 = sphi %s6078_s25, %s7559_s25  }
   0x4   : > { %s4264_s30 = sadd.s32 4294967294, %s5999_s28   ;;  %s6103_s14 = sadd.s32 1, %s5999_s28  }
   0x5   : > { %7529 = sst [smem:[#allocation6_spill]] %s6103_s14  ;;  %s322_s15 = sadd.s32 1, %s5995_s27 }
   0x6   : > { %s319_s16 = ssub.s32 %s5999_s28, %s6103_s14  ;;  %p332_p0 = scmp.ne.s32.totalorder %s5995_s27, %s5991_s26 }
   0x7   : > { %p320_p1 = scmp.eq.s32.totalorder %s319_s16, 0  ;;  %p333_p2 = scmp.eq.s32.totalorder %s6099_s29, 1 }
   0x8   : > { %p338_p3 = scmp.ne.s32.totalorder %s5991_s26, %s5987_s25  ;;  %p339_p4 = scmp.eq.s32.totalorder %s4264_s30, 1 }
   0x9   : > { %s6114_s17 = scalar_select %p320_p1, %s5995_s27, %s322_s15  }
   0xa   : > { %p6116_p5 = por %p333_p2, %p332_p0  ;;  %p6120_p6 = por %p339_p4, %p338_p3 }
   0xb   : > { %7530 = sst [smem:[#allocation7_spill]] %s6114_s17  ;;  %p4267_p7 = scmp.ge.s32.totalorder %s5999_s28, 1 }
   0xc   : > { %s7532_s19 = scalar_select %p6120_p6, 1, 0 }
   0xd   : > { %p403_p8 = scmp.lt.s32.totalorder %s5999_s28, 3 }
   0xe   : > { %7533 = sst [smem:[#allocation8_spill]] %s7532_s19 }
   0xf   : > { %p404_p9 = pnand %p4267_p7, %p403_p8 }
  0x11   : > { %407 = sbr.rel (%p404_p9) target bundleno = 3981 (0xf8d), region = 68 }
  0x18   : > { %p457_p10 = scmp.lt.s32.totalorder %s6099_s29, 1  ;;  %v480_v0 = vld [vmem:[%s7500_s2] sm:$0xff]  ;;  %vm494_vm0 = vcmask 261120   ;;  %v6001_v1 = vmov 0   ;;  %v483_v4 = vld [vmem:[%s7501_s3 + $0x8] sm:$0xff]  ;;  %s7516_s21 = smov 64  }
  0x19   : > { %4780 = vmatprep.mubr.msk.f32.mxu1 %vm494_vm0, %v480_v0  ;;  %5688 = vset.pattern.permute.xlu1 %v6001_v1  ;;  %v482_v2 = vld [vmem:[%s7501_s3] sm:$0xff]  ;;  %v611_v5 = vld [vmem:[%s7503_s5 + $0x8] sm:$0xff]  ;;  %vm900_vm1 = vcmask 523264   ;;  %v2498_v35 = vld [vmem:[%s7507_s9 + $0x30] sm:$0xff]  ;;  %vm907_vm2 = vcmask 130048   ;;  %vm1061_vm3 = vcmask 1048064  }
  0x1a   : > { %s458_s24 = scalar_select %p457_p10, %s6099_s29, 1  ;;  %486 = vperm.xlu1 %5688, %v482_v2   ;;  %5687 = vset.pattern.permute.xlu0 %v6001_v1  ;;  %v610_v3 = vld [vmem:[%s7503_s5] sm:$0xff]  ;;  %v481_v17 = vld [vmem:[%s7500_s2 + $0x8] sm:$0xff]  ;;  %v3281_v36 = vld [vmem:[%s7507_s9 + $0x38] sm:$0xff]  ;;  %vm1121_vm4 = vcmask 1041408   ;;  %vm1086_vm5 = vcmask 7168  }
  0x1b   : > { %614 = vperm.xlu0 %5687, %v610_v3   ;;  %v608_v19 = vld [vmem:[%s7502_s4] sm:$0xff]  ;;  %v609_v20 = vld [vmem:[%s7502_s4 + $0x8] sm:$0xff]  ;;  %v2497_v41 = vld [vmem:[%s7507_s9 + $0x10] sm:$0xff]  ;;  %vm1096_vm6 = vcmask 15360   ;;  %s6004_s30 = smov 96  }
  0x1c   : > { %s6141_s20 = sshll.u32 %s458_s24, 5  ;;  %v904_v33 = vld [vmem:[%s7507_s9 + $0x20] sm:$0xff]  ;;  %v1602_v34 = vld [vmem:[%s7507_s9 + $0x28] sm:$0xff]  ;;  %v3280_v42 = vld [vmem:[%s7507_s9 + $0x18] sm:$0xff] }
  0x1d   : > { %s466_s14 = scalar_lea.vmem %s7499_s1, %s6141_s20  ;;  %s461_s15 = scalar_lea.vmem %s7498_s0, %s6141_s20  ;;  %v903_v38 = vld [vmem:[%s7507_s9] sm:$0xff]  ;;  %v1601_v40 = vld [vmem:[%s7507_s9 + $0x8] sm:$0xff] }
  0x1e   : > { %v476_v6 = vld [vmem:[%s466_s14] sm:$0xff]  ;;  %v477_v7 = vld [vmem:[%s466_s14 + $0x8] sm:$0xff]  ;;  %v478_v8 = vld [vmem:[%s466_s14 + $0x10] sm:$0xff]  ;;  %491 = vperm.xlu1 %5688, %v483_v4  }
  0x1f   : > { %v5322_v9 = vpack.c.bf16 %v477_v7, %v476_v6  ;;  %v479_v10 = vld [vmem:[%s466_s14 + $0x18] sm:$0xff]  ;;  %619 = vperm.xlu0 %5687, %v611_v5   ;;  %v6154_v12 = vld [vmem:[%s461_s15] sm:$0xff]  ;;  %v6156_v13 = vld [vmem:[%s461_s15 + $0x8] sm:$0xff] }
  0x20   : > { %v5326_v11 = vpack.c.bf16 %v479_v10, %v478_v8  ;;  %v5330_v14 = vpack.c.bf16 %v6156_v13, %v6154_v12  ;;  %v6160_v15 = vld [vmem:[%s461_s15 + $0x10] sm:$0xff]  ;;  %v6162_v16 = vld [vmem:[%s461_s15 + $0x18] sm:$0xff]  ;;  %s454_s15 = sand.u32 1, %s5991_s26  }
  0x21   : > { %5323 = vmatprep.subr.bf16.mxu1 %v5322_v9  ;;  %v5334_v18 = vpack.c.bf16 %v6162_v16, %v6160_v15  ;;  %s4268_s27 = sshll.u32 %s454_s15, 9  ;;  %s7449_s16 = scalar_lea.sflag [#allocation3], %s454_s15 }
  0x22   : > { %5325 = vmatpush3.bf16.msra.mxu1 %v5322_v9  ;;  %s6574_s17 = scalar_lea.vmem [#allocation2], %s4268_s27 }
  0x23   : > { %5327 = vmatprep.subr.bf16.mxu1 %v5326_v11  ;;  %s4165_s24 = sshll.u32 %s6574_s17, 4  ;;  %s7445_s24 = int_to_ptr.vmem [resolvable:$true] %s4165_s24 }
  0x24   : > { %s5937_s22 = scalar_lea.vmem %s7445_s24, 8192 }
  0x25   : > { %p5938_p11 = scmp.ne.s32.totalorder %s7445_s24, %s5937_s22 }
  0x26   : > { %5329 = vmatpush3.bf16.msra.mxu1 %v5326_v11 }
  0x27   : > { %5331 = vmatprep.subr.bf16.mxu1 %v5330_v14  ;;  %p5939_p12 = pnand %p5938_p11, %p6116_p5 }
  0x29   : > { %4781 = vmatmul.mubr.msk.f32.vlgmr.msra.gmra.mrb[0].mxu1 %vm494_vm0, %v481_v17  ;;  %v6271_v17 = vld [vmem:[%s7508_s10] sm:$0x3]  ;;  %p5940_p13 = pneg %p5939_p12 }
  0x2a   : > { %5333 = vmatpush3.bf16.msra.mxu1 %v5330_v14  ;;  %4791 = vmatprep.mubr.msk.f32.mxu1 %vm494_vm0, %v608_v19 }
  0x2b   : > { %5335 = vmatprep.subr.bf16.mxu1 %v5334_v18 }
  0x2e   : > { %5337 = vmatpush3.bf16.msra.mxu1 %v5334_v18 }
  0x31   : > { %4792 = vmatmul.mubr.msk.f32.vlgmr.msra.gmra.mrb[2].mxu1 %vm494_vm0, %v609_v20 }
  0x99   : > { %v487_v29 = vpop.permute.xlu1 %486 }
  0x9a   : > { %v615_v22 = vpop.permute.xlu0 %614 }
  0x9d   : > { %v492_v31 = vpop.permute.xlu1 %491 }
  0x9e   : > { %v620_v24 = vpop.permute.xlu0 %619 }
  0xfc   : > { %v4782_v21 = vpop.f32.mrb[0].mxu1 }
  0xfd   : > { %v567_v23 = vpop.f32.mrb[1].mxu1  ;;  %v573_v32 = vadd.f32 %v4782_v21, %v492_v31  ;;  %v738_v31 = vld [vmem:[%s7504_s6 + $0x18] sm:$0xff] }
  0xfe   : > { %v568_v30 = vadd.f32 %v567_v23, %v487_v29 }
 0x104   : > { %v4793_v25 = vpop.f32.mrb[2].mxu1 }
 0x105   : > { %v700_v26 = vadd.f32 %v4793_v25, %v620_v24  ;;  %v694_v27 = vpop.f32.mrb[3].mxu1 }
 0x106   : > { %v695_v28 = vadd.f32 %v694_v27, %v615_v22 }
 0x107   : > { %896 = vrot.lane.b32.xlu1 %v700_v26, %s7516_s21 }
 0x108   : > { %894 = vrot.lane.b32.xlu0 %v695_v28, %s7516_s21  ;;  %s7544_s21 = smov 64  }
 0x126   : > { %576 = vxpose.xlu0.b32.start [1/2] (short) (narrow) %v568_v30, 64  ;;  %v736_v30 = vld [vmem:[%s7504_s6 + $0x8] sm:$0xff] }
 0x12a   : > { %577 = vxpose.xlu0.b32.end [2/2] (short) (narrow) %v573_v32, 64  ;;  %v735_v32 = vld [vmem:[%s7504_s6] sm:$0xff] }
 0x179   : > { %v897_v37 = vpop.permute.xlu1 %896 }
 0x17a   : > { %v902_v39 = vsel %vm900_vm1, %v700_v26, %v897_v37  ;;  %v895_v43 = vpop.permute.xlu0 %894  ;;  %v6003_v37 = vmov 0.0  }
 0x17b   : > { %v906_v44 = vmul.f32 %v904_v33, %v902_v39  ;;  %v1604_v45 = vmul.f32 %v1602_v34, %v902_v39  ;;  %v2500_v46 = vmul.f32 %v2498_v35, %v902_v39  ;;  %v3283_v47 = vmul.f32 %v3281_v36, %v902_v39  ;;  %v737_v34 = vld [vmem:[%s7504_s6 + $0x10] sm:$0xff]  ;;  %v740_v35 = vld [vmem:[%s7504_s6 + $0x28] sm:$0xff]  ;;  %v742_v36 = vld [vmem:[%s7504_s6 + $0x38] sm:$0xff]  ;;  %843 = vmatprep.mubr.f32.mxu0 %v6003_v37 }
 0x17c   : > { %v901_v48 = vsel %vm900_vm1, %v695_v28, %v895_v43  ;;  %v5338_v33 = vpack.c.bf16 %v738_v31, %v736_v30  ;;  %v5342_v39 = vpack.c.bf16 %v742_v36, %v740_v35  ;;  %v1254_v43 = vld [vmem:[%s7509_s11] sm:$0xff]  ;;  %v1259_v30 = vld [vmem:[%s7509_s11 + $0x28] sm:$0xff] }
 0x17d   : > { %v905_v49 = vmul.f32 %v903_v38, %v901_v48  ;;  %v1603_v50 = vmul.f32 %v1601_v40, %v901_v48  ;;  %v2499_v51 = vmul.f32 %v2497_v41, %v901_v48  ;;  %v3282_v52 = vmul.f32 %v3280_v42, %v901_v48  ;;  %v739_v40 = vld [vmem:[%s7504_s6 + $0x20] sm:$0xff]  ;;  %v741_v41 = vld [vmem:[%s7504_s6 + $0x30] sm:$0xff] }
 0x17e   : > { %v5340_v38 = vpack.c.bf16 %v737_v34, %v735_v32  ;;  %5339 = vmatprep.subr.bf16.mxu0 %v5338_v33  ;;  %v5344_v42 = vpack.c.bf16 %v741_v41, %v739_v40  ;;  %v1260_v33 = vld [vmem:[%s7509_s11 + $0x30] sm:$0xff]  ;;  %v1261_v34 = vld [vmem:[%s7509_s11 + $0x38] sm:$0xff] }
 0x17f   : > { %v5346_v53 = vpack.c.bf16 %v906_v44, %v905_v49  ;;  %v6206_v54 = vpack.c.bf16 %v1604_v45, %v1603_v50  ;;  %v6208_v55 = vpack.c.bf16 %v2500_v46, %v2499_v51  ;;  %v6210_v56 = vpack.c.bf16 %v3283_v47, %v3282_v52  ;;  %v1255_v44 = vld [vmem:[%s7509_s11 + $0x8] sm:$0xff] }
 0x180   : > { %5341 = vmatpush1.bf16.msra.mxu0 %v5340_v38  ;;  %v6335_v45 = vpack.c.bf16 %v1255_v44, %v1254_v43  ;;  %v6390_v35 = vpack.c.bf16 %v1261_v34, %v1260_v33  ;;  %v1262_v38 = vld [vmem:[%s7509_s11 + $0x40] sm:$0xff]  ;;  %v1265_v43 = vld [vmem:[%s7509_s11 + $0x58] sm:$0xff] }
 0x181   : > { %5347 = vmatprep.subr.bf16.mxu1 %v5346_v53  ;;  %5343 = vmatprep.subr.bf16.mxu0 %v5342_v39  ;;  %v1263_v39 = vld [vmem:[%s7509_s11 + $0x48] sm:$0xff] }
 0x182   : > { %5349 = vmatpush3.bf16.msra.mxu1 %v5346_v53  ;;  %v6402_v40 = vpack.c.bf16 %v1263_v39, %v1262_v38 }
 0x183   : > { %4810 = vmatprep.subr.msk.mxu1 %vm1121_vm4, %v6271_v17 }
 0x184   : > { %5345 = vmatpush1.bf16.msra.mxu0 %v5344_v42  ;;  %v1264_v42 = vld [vmem:[%s7509_s11 + $0x50] sm:$0xff] }
 0x185   : > { %5351 = vmatprep.subr.bf16.mxu0 %v6335_v45  ;;  %v6414_v44 = vpack.c.bf16 %v1265_v43, %v1264_v42 }
 0x1a6   : > { %v6212_v57 = vpop.trf.xlu0 }
 0x1a7   : > { %4798 = vmatprep.mubr.msk.f32.mxu1 %vm907_vm2, %v6212_v57 }
 0x1aa   : > { %v6216_v58 = vpop.trf.xlu0 }
 0x1ab   : > { %4799 = vmatmul.mubr.msk.f32.vlgmr.msra.gmra.mrb[4].mxu1 %vm907_vm2, %v6216_v58 }
 0x1ac   : > { %4811 = vmatpush3.msk.msra.mxu1 %vm1121_vm4, %v6271_v17 }
 0x1ad   : > { %4868 = vmatprep.subr.msk.mxu1 %vm1121_vm4, %v6271_v17 }
 0x1ae   : > { %v6220_v59 = vpop.trf.xlu0 }
 0x1af   : > { %4801 = vmatprep.mubr.msk.f32.mxu1 %vm907_vm2, %v6220_v59 }
 0x1b2   : > { %v6224_v60 = vpop.trf.xlu0 }
 0x1b3   : > { %4802 = vmatmul.mubr.msk.f32.gmra.mrb[6].mxu1 %vm907_vm2, %v6224_v60 }
 0x1b6   : > { %v6228_v61 = vpop.trf.xlu0 }
 0x1b7   : > { %4804 = vmatprep.mubr.msk.f32.mxu1 %vm907_vm2, %v6228_v61 }
 0x1ba   : > { %v6232_v62 = vpop.trf.xlu0 }
 0x1bb   : > { %4805 = vmatmul.mubr.msk.f32.gmra.mrb[8].mxu1 %vm907_vm2, %v6232_v62 }
 0x1be   : > { %v6236_v63 = vpop.trf.xlu0 }
 0x1bf   : > { %4807 = vmatprep.mubr.msk.f32.mxu1 %vm907_vm2, %v6236_v63 }
 0x1c2   : > { %v6240_v0 = vpop.trf.xlu0 }
 0x1c3   : > { %4808 = vmatmul.mubr.msk.f32.gmra.mrb[10].mxu1 %vm907_vm2, %v6240_v0 }
 0x27e   : > { %v6244_v1 = vpop.f32.mrb[4].mxu1 }
 0x27f   : > { %v6246_v2 = vpop.f32.mrb[5].mxu1  ;;  %v1040_v5 = vsel %vm900_vm1, %v6244_v1, -inf  ;;  %v1065_v8 = vsel %vm1061_vm3, %v6244_v1, -inf }
 0x280   : > { %v1062_v3 = vsel %vm1061_vm3, %v6246_v2, -inf  ;;  %v1037_v4 = vsel %vm900_vm1, %v6246_v2, -inf }
 0x281   : > { %1063 = vmax.xlane.f32.xlu0 %v1062_v3  ;;  %1038 = vmax.xlane.f32.xlu1 %v1037_v4 }
 0x285   : > { %1041 = vmax.xlane.f32.xlu1 %v1040_v5 }
 0x286   : > { %v6254_v6 = vpop.f32.mrb[6].mxu1 }
 0x287   : > { %v6256_v7 = vpop.f32.mrb[7].mxu1  ;;  %v1046_v9 = vsel %vm900_vm1, %v6254_v6, -inf  ;;  %v1071_v14 = vsel %vm1061_vm3, %v6254_v6, -inf }
 0x288   : > { %v1043_v18 = vsel %vm900_vm1, %v6256_v7, -inf  ;;  %v1068_v21 = vsel %vm1061_vm3, %v6256_v7, -inf }
 0x289   : > { %1066 = vmax.xlane.f32.xlu1 %v1065_v8 }
 0x28d   : > { %1047 = vmax.xlane.f32.xlu1 %v1046_v9 }
 0x28e   : > { %v6262_v10 = vpop.f32.mrb[8].mxu1 }
 0x28f   : > { %v6264_v11 = vpop.f32.mrb[9].mxu1  ;;  %v1052_v22 = vsel %vm900_vm1, %v6262_v10, -inf  ;;  %v1077_v23 = vsel %vm1061_vm3, %v6262_v10, -inf }
 0x290   : > { %v1049_v24 = vsel %vm900_vm1, %v6264_v11, -inf  ;;  %v1074_v25 = vsel %vm1061_vm3, %v6264_v11, -inf }
 0x291   : > { %1072 = vmax.xlane.f32.xlu1 %v1071_v14 }
 0x295   : > { %1044 = vmax.xlane.f32.xlu1 %v1043_v18 }
 0x296   : > { %v6281_v19 = vpop.f32.mrb[10].mxu1 }
 0x297   : > { %v6283_v20 = vpop.f32.mrb[11].mxu1  ;;  %v1058_v26 = vsel %vm900_vm1, %v6281_v19, -inf  ;;  %v1083_v29 = vsel %vm1061_vm3, %v6281_v19, -inf }
 0x298   : > { %v1055_v27 = vsel %vm900_vm1, %v6283_v20, -inf  ;;  %v1080_v28 = vsel %vm1061_vm3, %v6283_v20, -inf }
 0x299   : > { %1069 = vmax.xlane.f32.xlu1 %v1068_v21 }
 0x29d   : > { %1053 = vmax.xlane.f32.xlu1 %v1052_v22 }
 0x2a1   : > { %1078 = vmax.xlane.f32.xlu1 %v1077_v23 }
 0x2a5   : > { %1050 = vmax.xlane.f32.xlu1 %v1049_v24 }
 0x2a9   : > { %1075 = vmax.xlane.f32.xlu1 %v1074_v25  ;;  %v1256_v25 = vld [vmem:[%s7509_s11 + $0x10] sm:$0xff] }
 0x2ad   : > { %1059 = vmax.xlane.f32.xlu1 %v1058_v26  ;;  %v1257_v26 = vld [vmem:[%s7509_s11 + $0x18] sm:$0xff] }
 0x2b1   : > { %1056 = vmax.xlane.f32.xlu1 %v1055_v27  ;;  %v6366_v27 = vpack.c.bf16 %v1257_v26, %v1256_v25 }
 0x2b5   : > { %1081 = vmax.xlane.f32.xlu1 %v1080_v28 }
 0x2b9   : > { %1084 = vmax.xlane.f32.xlu1 %v1083_v29  ;;  %v1258_v29 = vld [vmem:[%s7509_s11 + $0x20] sm:$0xff] }
 0x2ba   : > { %v6378_v31 = vpack.c.bf16 %v1259_v30, %v1258_v29 }
 0x2ec   : > { %703 = vxpose.xlu1.b32.start [1/4] (short) (narrow) %v6154_v12, 64 }
 0x2f0   : > { %704 = vxpose.xlu1.b32.cont [2/4] (short) (narrow) %v6156_v13, 64 }
 0x2f4   : > { %705 = vxpose.xlu1.b32.cont [3/4] (short) (narrow) %v6160_v15, 64 }
 0x2f8   : > { %706 = vxpose.xlu1.b32.end [4/4] (short) (narrow) %v6162_v16, 64 }
 0x30e   : > { %v1039_v12 = vpop.xlane.xlu1 %1038  ;;  %v1064_v46 = vpop.xlane.xlu0 %1063 }
 0x30f   : > { %v1087_v47 = vsel %vm1086_vm5, %v1039_v12, %v1064_v46  ;;  %v1266_v46 = vld [vmem:[%s7509_s11 + $0x60] sm:$0xff] }
 0x310   : > { %4812 = vmatprep.mubr.msk.f32.mxu1 %vm1096_vm6, %v1087_v47  ;;  %v1267_v47 = vld [vmem:[%s7509_s11 + $0x68] sm:$0xff] }
 0x312   : > { %v1042_v48 = vpop.xlane.xlu1 %1041 }
 0x316   : > { %v1067_v49 = vpop.xlane.xlu1 %1066 }
 0x317   : > { %v1088_v50 = vsel %vm1086_vm5, %v1042_v48, %v1067_v49  ;;  %v6426_v48 = vpack.c.bf16 %v1267_v47, %v1266_v46 }
 0x318   : > { %4813 = vmatmul.mubr.msk.f32.vlgmr.msra.gmra.mrb[12].mxu1 %vm1096_vm6, %v1088_v50  ;;  %v1268_v50 = vld [vmem:[%s7509_s11 + $0x70] sm:$0xff] }
 0x319   : > { %4869 = vmatpush3.msk.msra.mxu1 %vm1121_vm4, %v6271_v17 }
 0x31a   : > { %5383 = vmatprep.subr.bf16.mxu1 %v6206_v54  ;;  %v1048_v13 = vpop.xlane.xlu1 %1047 }
 0x31e   : > { %v1073_v15 = vpop.xlane.xlu1 %1072 }
 0x31f   : > { %v1090_v53 = vsel %vm1086_vm5, %v1048_v13, %v1073_v15  ;;  %v1269_v13 = vld [vmem:[%s7509_s11 + $0x78] sm:$0xff] }
 0x320   : > { %v6438_v15 = vpack.c.bf16 %v1269_v13, %v1268_v50 }
 0x322   : > { %v1045_v16 = vpop.xlane.xlu1 %1044 }
 0x326   : > { %v1070_v51 = vpop.xlane.xlu1 %1069 }
 0x327   : > { %v1089_v52 = vsel %vm1086_vm5, %v1045_v16, %v1070_v51 }
 0x328   : > { %4815 = vmatprep.mubr.msk.f32.mxu1 %vm1096_vm6, %v1089_v52  ;;  %v745_v52 = vlaneseq }
 0x329   : > { %4816 = vmatmul.mubr.msk.f32.gmra.mrb[14].mxu1 %vm1096_vm6, %v1090_v53 }
 0x32a   : > { %v1054_v3 = vpop.xlane.xlu1 %1053  ;;  %v746_v53 = vshrl.u32 %v745_v52, 7 }
 0x32e   : > { %v1079_v4 = vpop.xlane.xlu1 %1078 }
 0x32f   : > { %v1092_v14 = vsel %vm1086_vm5, %v1054_v3, %v1079_v4  ;;  %v743_v3 = vld [vmem:[%s7505_s7] sm:$0x3]  ;;  %v751_v4 = vsub.s32 1, %v746_v53 }
 0x332   : > { %v1051_v5 = vpop.xlane.xlu1 %1050 }
 0x336   : > { %v1076_v8 = vpop.xlane.xlu1 %1075 }
 0x337   : > { %v1091_v9 = vsel %vm1086_vm5, %v1051_v5, %v1076_v8  ;;  %v6449_v5 = vrot.slane %v743_v3, %v751_v4 }
 0x338   : > { %4818 = vmatprep.mubr.msk.f32.mxu1 %vm1096_vm6, %v1091_v9 }
 0x339   : > { %4819 = vmatmul.mubr.msk.f32.gmra.mrb[16].mxu1 %vm1096_vm6, %v1092_v14 }
 0x33a   : > { %v1060_v17 = vpop.xlane.xlu1 %1059 }
 0x33e   : > { %v1057_v18 = vpop.xlane.xlu1 %1056 }
 0x342   : > { %v1082_v21 = vpop.xlane.xlu1 %1081 }
 0x343   : > { %v1093_v22 = vsel %vm1086_vm5, %v1057_v18, %v1082_v21 }
 0x344   : > { %4821 = vmatprep.mubr.msk.f32.mxu1 %vm1096_vm6, %v1093_v22 }
 0x346   : > { %v1085_v23 = vpop.xlane.xlu1 %1084 }
 0x347   : > { %v1094_v24 = vsel %vm1086_vm5, %v1060_v17, %v1085_v23 }
 0x348   : > { %4822 = vmatmul.mubr.msk.f32.gmra.mrb[18].mxu1 %vm1096_vm6, %v1094_v24 }
 0x36c   : > { %v719_v28 = vpop.trf.xlu1 }
 0x36d   : > { %4279 = vmatmul.mubr.msk.f32.vlgmr.msra.gmra.mrb[0].mxu0 %vm494_vm0, %v719_v28 }
 0x36e   : > { %5353 = vmatpush3.bf16.msra.mxu0 %v6335_v45  ;;  %849 = vmatprep.mubr.f32.mxu0 %v6003_v37 }
 0x36f   : > { %5355 = vmatprep.subr.bf16.mxu0 %v6366_v27 }
 0x370   : > { %v720_v32 = vpop.trf.xlu1 }
 0x371   : > { %4280 = vmatmul.mubr.msk.f32.gmra.mrb[2].mxu0 %vm494_vm0, %v720_v32 }
 0x372   : > { %5357 = vmatpush3.bf16.msra.mxu0 %v6366_v27  ;;  %855 = vmatprep.mubr.f32.mxu0 %v6003_v37 }
 0x373   : > { %5359 = vmatprep.subr.bf16.mxu0 %v6378_v31 }
 0x374   : > { %v721_v36 = vpop.trf.xlu1 }
 0x375   : > { %4281 = vmatmul.mubr.msk.f32.gmra.mrb[4].mxu0 %vm494_vm0, %v721_v36 }
 0x376   : > { %5361 = vmatpush3.bf16.msra.mxu0 %v6378_v31  ;;  %861 = vmatprep.mubr.f32.mxu0 %v6003_v37 }
 0x377   : > { %5363 = vmatprep.subr.bf16.mxu0 %v6390_v35 }
 0x378   : > { %v722_v41 = vpop.trf.xlu1 }
 0x379   : > { %4282 = vmatmul.mubr.msk.f32.gmra.mrb[6].mxu0 %vm494_vm0, %v722_v41 }
 0x37a   : > { %5365 = vmatpush3.bf16.msra.mxu0 %v6390_v35  ;;  %867 = vmatprep.mubr.f32.mxu0 %v6003_v37 }
 0x37b   : > { %5367 = vmatprep.subr.bf16.mxu0 %v6402_v40 }
 0x37c   : > { %v723_v12 = vpop.trf.xlu1 }
 0x37d   : > { %4283 = vmatmul.mubr.msk.f32.gmra.mrb[8].mxu0 %vm494_vm0, %v723_v12 }
 0x37e   : > { %5369 = vmatpush3.bf16.msra.mxu0 %v6402_v40  ;;  %873 = vmatprep.mubr.f32.mxu0 %v6003_v37 }
 0x37f   : > { %5371 = vmatprep.subr.bf16.mxu0 %v6414_v44 }
 0x380   : > { %v724_v49 = vpop.trf.xlu1 }
 0x381   : > { %4284 = vmatmul.mubr.msk.f32.gmra.mrb[10].mxu0 %vm494_vm0, %v724_v49 }
 0x382   : > { %5373 = vmatpush3.bf16.msra.mxu0 %v6414_v44  ;;  %879 = vmatprep.mubr.f32.mxu0 %v6003_v37 }
 0x383   : > { %5375 = vmatprep.subr.bf16.mxu0 %v6426_v48 }
 0x384   : > { %v725_v16 = vpop.trf.xlu1 }
 0x385   : > { %4285 = vmatmul.mubr.msk.f32.gmra.mrb[12].mxu0 %vm494_vm0, %v725_v16 }
 0x386   : > { %5377 = vmatpush3.bf16.msra.mxu0 %v6426_v48  ;;  %885 = vmatprep.mubr.f32.mxu0 %v6003_v37 }
 0x387   : > { %5379 = vmatprep.subr.bf16.mxu0 %v6438_v15 }
 0x388   : > { %v726_v51 = vpop.trf.xlu1 }
 0x389   : > { %4286 = vmatmul.mubr.msk.f32.gmra.mrb[14].mxu0 %vm494_vm0, %v726_v51 }
 0x38a   : > { %5381 = vmatpush3.bf16.msra.mxu0 %v6438_v15 }
 0x3eb   : > { %v4814_v8 = vpop.f32.mrb[12].mxu1 }
 0x3ec   : > { %v1231_v9 = vsub.f32 %v6244_v1, %v4814_v8  ;;  %v1191_v37 = vpop.f32.mrb[13].mxu1 }
 0x3ed   : > { %v1230_v14 = vsub.f32 %v6246_v2, %v1191_v37 }
 0x3ee   : > { %v1240_v17 = vmul.f32 1.442695, %v1231_v9 }
 0x3ef   : > { %v1238_v18 = vmul.f32 1.442695, %v1230_v14 }
 0x3f1   : > { %5809 = vpow2.f32 %v1238_v18 }
 0x3f2   : > { %5811 = vpow2.f32 %v1240_v17 }
 0x3fb   : > { %v6453_v21 = vpop.eup %5809 }
 0x3fc   : > { %v6455_v22 = vpop.eup %5811  ;;  %v4817_v23 = vpop.f32.mrb[14].mxu1  ;;  %4856 = vmatprep.mubr.f32.mxu0 %v6453_v21 }
 0x3fd   : > { %v1233_v24 = vsub.f32 %v6254_v6, %v4817_v23  ;;  %v1201_v25 = vpop.f32.mrb[15].mxu1  ;;  %4857 = vmatmul.mubr.f32.vlgmr.msra.gmra.mrb[16].mxu0 %v6455_v22 }
 0x3fe   : > { %v1232_v1 = vsub.f32 %v6256_v7, %v1201_v25 }
 0x3ff   : > { %v1244_v26 = vmul.f32 1.442695, %v1233_v24 }
 0x400   : > { %v1242_v2 = vmul.f32 1.442695, %v1232_v1 }
 0x402   : > { %5813 = vpow2.f32 %v1242_v2 }
 0x403   : > { %5815 = vpow2.f32 %v1244_v26 }
 0x40c   : > { %v6461_v28 = vpop.eup %5813  ;;  %v4820_v29 = vpop.f32.mrb[16].mxu1 }
 0x40d   : > { %v6463_v30 = vpop.eup %5815  ;;  %v1235_v32 = vsub.f32 %v6262_v10, %v4820_v29  ;;  %v1211_v33 = vpop.f32.mrb[17].mxu1  ;;  %4859 = vmatprep.mubr.f32.mxu0 %v6461_v28 }
 0x40e   : > { %v1234_v6 = vsub.f32 %v6264_v11, %v1211_v33  ;;  %4860 = vmatmul.mubr.f32.gmra.mrb[18].mxu0 %v6463_v30 }
 0x40f   : > { %v1248_v34 = vmul.f32 1.442695, %v1235_v32 }
 0x410   : > { %v1246_v7 = vmul.f32 1.442695, %v1234_v6 }
 0x412   : > { %5817 = vpow2.f32 %v1246_v7 }
 0x413   : > { %5819 = vpow2.f32 %v1248_v34 }
 0x41b   : > { %v4823_v36 = vpop.f32.mrb[18].mxu1 }
 0x41c   : > { %v6469_v38 = vpop.eup %5817  ;;  %v1237_v39 = vsub.f32 %v6281_v19, %v4823_v36  ;;  %v1221_v41 = vpop.f32.mrb[19].mxu1  ;;  %v747_v19 = vsub.s32 0, %v746_v53 }
 0x41d   : > { %v6472_v42 = vpop.eup %5819  ;;  %v1236_v10 = vsub.f32 %v6283_v20, %v1221_v41  ;;  %4862 = vmatprep.mubr.f32.mxu0 %v6469_v38 }
 0x41e   : > { %v1252_v43 = vmul.f32 1.442695, %v1237_v39  ;;  %4863 = vmatmul.mubr.f32.gmra.mrb[20].mxu0 %v6472_v42  ;;  %v748_v47 = vrot.slane %v743_v3, %v747_v19 }
 0x41f   : > { %v1250_v11 = vmul.f32 1.442695, %v1236_v10 }
 0x421   : > { %5821 = vpow2.f32 %v1250_v11 }
 0x422   : > { %5823 = vpow2.f32 %v1252_v43 }
 0x42b   : > { %v6477_v12 = vpop.eup %5821 }
 0x42c   : > { %v6479_v46 = vpop.eup %5823  ;;  %4865 = vmatprep.mubr.f32.mxu0 %v6477_v12 }
 0x42d   : > { %4866 = vmatmul.mubr.f32.gmra.mrb[22].mxu0 %v6479_v46 }
 0x440   : > { %v845_v49 = vpop.f32.mrb[0].mxu0 }
 0x441   : > { %v847_v20 = vpop.f32.mrb[1].mxu0  ;;  %v846_v13 = vadd.f32 %v845_v49, %v748_v47 }
 0x442   : > { %v848_v50 = vadd.f32 %v847_v20, %v6449_v5 }
 0x444   : > { %v851_v16 = vpop.f32.mrb[2].mxu0 }
 0x445   : > { %v852_v51 = vadd.f32 %v851_v16, %v748_v47  ;;  %v853_v52 = vpop.f32.mrb[3].mxu0 }
 0x446   : > { %v854_v4 = vadd.f32 %v853_v52, %v6449_v5 }
 0x447   : > { %v6485_v8 = vpack.i.bf16 %v852_v51, %v846_v13  ;;  %v6499_v41 = vpack.c.bf16 %v852_v51, %v846_v13 }
 0x448   : > { %v6487_v9 = vpack.i.bf16 %v854_v4, %v848_v50  ;;  %v857_v37 = vpop.f32.mrb[4].mxu0  ;;  %v6501_v43 = vpack.c.bf16 %v854_v4, %v848_v50 }
 0x449   : > { %v859_v14 = vpop.f32.mrb[5].mxu0  ;;  %v858_v53 = vadd.f32 %v857_v37, %v748_v47 }
 0x44a   : > { %v860_v17 = vadd.f32 %v859_v14, %v6449_v5 }
 0x44c   : > { %v863_v3 = vpop.f32.mrb[6].mxu0 }
 0x44d   : > { %v864_v18 = vadd.f32 %v863_v3, %v748_v47  ;;  %v865_v23 = vpop.f32.mrb[7].mxu0 }
 0x44e   : > { %v866_v24 = vadd.f32 %v865_v23, %v6449_v5 }
 0x44f   : > { %v6491_v25 = vpack.i.bf16 %v864_v18, %v858_v53  ;;  %v6507_v52 = vpack.c.bf16 %v864_v18, %v858_v53 }
 0x450   : > { %v869_v1 = vpop.f32.mrb[8].mxu0  ;;  %v6505_v16 = vpack.i.bf16 %v866_v24, %v860_v17  ;;  %v6509_v37 = vpack.c.bf16 %v866_v24, %v860_v17 }
 0x451   : > { %v871_v26 = vpop.f32.mrb[9].mxu0  ;;  %v870_v29 = vadd.f32 %v869_v1, %v748_v47 }
 0x452   : > { %v872_v2 = vadd.f32 %v871_v26, %v6449_v5  ;;  %7534 = vst [vmem:[#allocation9_spill] sm:$0xff] %v6509_v37 }
 0x454   : > { %v875_v32 = vpop.f32.mrb[10].mxu0 }
 0x455   : > { %v876_v33 = vadd.f32 %v875_v32, %v748_v47  ;;  %v877_v6 = vpop.f32.mrb[11].mxu0 }
 0x456   : > { %v878_v34 = vadd.f32 %v877_v6, %v6449_v5 }
 0x457   : > { %v6495_v7 = vpack.i.bf16 %v876_v33, %v870_v29  ;;  %v6511_v14 = vpack.c.bf16 %v876_v33, %v870_v29 }
 0x458   : > { %v6497_v36 = vpack.i.bf16 %v878_v34, %v872_v2  ;;  %v881_v39 = vpop.f32.mrb[12].mxu0  ;;  %v6513_v3 = vpack.c.bf16 %v878_v34, %v872_v2 }
 0x459   : > { %v883_v10 = vpop.f32.mrb[13].mxu0  ;;  %v882_v13 = vadd.f32 %v881_v39, %v748_v47 }
 0x45a   : > { %v884_v11 = vadd.f32 %v883_v10, %v6449_v5  ;;  %7535 = vst [vmem:[#allocation10_spill] sm:$0xff] %v6513_v3 }
 0x45c   : > { %v887_v19 = vpop.f32.mrb[14].mxu0 }
 0x45d   : > { %v889_v49 = vpop.f32.mrb[15].mxu0  ;;  %v888_v51 = vadd.f32 %v887_v19, %v748_v47 }
 0x45e   : > { %v890_v20 = vadd.f32 %v889_v49, %v6449_v5 }
 0x45f   : > { %v6515_v50 = vpack.i.bf16 %v888_v51, %v882_v13  ;;  %v6519_v23 = vpack.c.bf16 %v888_v51, %v882_v13 }
 0x460   : > { %v6517_v4 = vpack.i.bf16 %v890_v20, %v884_v11  ;;  %v6521_v1 = vpack.c.bf16 %v890_v20, %v884_v11 }
 0x462   : > { %7536 = vst [vmem:[#allocation11_spill] sm:$0xff] %v6521_v1 }
 0x4d0   : > { %v4858_v5 = vpop.f32.mrb[16].mxu0 }
 0x4d1   : > { %v1336_v26 = vpop.f32.mrb[17].mxu0 }
 0x4d2   : > { %5825 = vrcp.f32 %v1336_v26 }
 0x4d3   : > { %5827 = vrcp.f32 %v4858_v5 }
 0x4dc   : > { %v5826_v17 = vpop.eup %5825 }
 0x4dd   : > { %v5828_v53 = vpop.eup %5827  ;;  %4870 = vmatprep.mubr.msk.f32.mxu1 %vm1096_vm6, %v5826_v17 }
 0x4de   : > { %4871 = vmatmul.mubr.msk.f32.vlgmr.msra.gmra.mrb[20].mxu1 %vm1096_vm6, %v5828_v53 }
 0x4df   : > { %5385 = vmatpush3.bf16.msra.mxu1 %v6206_v54 }
 0x4e0   : > { %5387 = vmatprep.subr.bf16.mxu1 %v6335_v45 }
 0x4e1   : > { %v4861_v47 = vpop.f32.mrb[18].mxu0 }
 0x4e2   : > { %v1346_v18 = vpop.f32.mrb[19].mxu0 }
 0x4e3   : > { %5829 = vrcp.f32 %v1346_v18 }
 0x4e4   : > { %5831 = vrcp.f32 %v4861_v47 }
 0x4ed   : > { %v5830_v24 = vpop.eup %5829 }
 0x4ee   : > { %v5832_v2 = vpop.eup %5831  ;;  %4873 = vmatprep.mubr.msk.f32.mxu1 %vm1096_vm6, %v5830_v24 }
 0x4ef   : > { %4874 = vmatmul.mubr.msk.f32.gmra.mrb[22].mxu1 %vm1096_vm6, %v5832_v2 }
 0x4f1   : > { %v4864_v29 = vpop.f32.mrb[20].mxu0 }
 0x4f2   : > { %v1356_v32 = vpop.f32.mrb[21].mxu0 }
 0x4f3   : > { %5833 = vrcp.f32 %v1356_v32 }
 0x4f4   : > { %5835 = vrcp.f32 %v4864_v29 }
 0x4fd   : > { %v5834_v33 = vpop.eup %5833 }
 0x4fe   : > { %v5836_v6 = vpop.eup %5835  ;;  %4876 = vmatprep.mubr.msk.f32.mxu1 %vm1096_vm6, %v5834_v33 }
 0x4ff   : > { %4877 = vmatmul.mubr.msk.f32.gmra.mrb[24].mxu1 %vm1096_vm6, %v5836_v6 }
 0x500   : > { %v4867_v54 = vpop.f32.mrb[22].mxu0 }
 0x501   : > { %v1366_v34 = vpop.f32.mrb[23].mxu0 }
 0x502   : > { %5837 = vrcp.f32 %v1366_v34 }
 0x503   : > { %5839 = vrcp.f32 %v4867_v54 }
 0x50c   : > { %v5838_v39 = vpop.eup %5837 }
 0x50d   : > { %v5840_v10 = vpop.eup %5839  ;;  %4879 = vmatprep.mubr.msk.f32.mxu1 %vm1096_vm6, %v5838_v39 }
 0x50e   : > { %4880 = vmatmul.mubr.msk.f32.gmra.mrb[26].mxu1 %vm1096_vm6, %v5840_v10 }
 0x50f   : > { %4886 = vmatprep.mubr.msk.f32.mxu1 %vm907_vm2, %v6212_v57 }
 0x512   : > { %4887 = vmatmul.mubr.msk.f32.vlgmr.msra.gmra.mrb[28].mxu1 %vm907_vm2, %v6216_v58 }
 0x513   : > { %5389 = vmatpush3.bf16.msra.mxu1 %v6335_v45  ;;  %4889 = vmatprep.mubr.msk.f32.mxu1 %vm907_vm2, %v6220_v59 }
 0x514   : > { %5391 = vmatprep.subr.bf16.mxu1 %v6366_v27 }
 0x516   : > { %4890 = vmatmul.mubr.msk.f32.gmra.mrb[30].mxu1 %vm907_vm2, %v6224_v60 }
 0x517   : > { %5393 = vmatpush3.bf16.msra.mxu1 %v6366_v27  ;;  %4892 = vmatprep.mubr.msk.f32.mxu1 %vm907_vm2, %v6228_v61 }
 0x518   : > { %5395 = vmatprep.subr.bf16.mxu1 %v6378_v31 }
 0x51a   : > { %4893 = vmatmul.mubr.msk.f32.gmra.mrb[32].mxu1 %vm907_vm2, %v6232_v62 }
 0x51b   : > { %5397 = vmatpush3.bf16.msra.mxu1 %v6378_v31  ;;  %4895 = vmatprep.mubr.msk.f32.mxu1 %vm907_vm2, %v6236_v63 }
 0x51c   : > { %5399 = vmatprep.subr.bf16.mxu1 %v6390_v35 }
 0x51e   : > { %4896 = vmatmul.mubr.msk.f32.gmra.mrb[34].mxu1 %vm907_vm2, %v6240_v0 }
 0x51f   : > { %5401 = vmatpush3.bf16.msra.mxu1 %v6390_v35 }
 0x520   : > { %5403 = vmatprep.subr.bf16.mxu1 %v6402_v40 }
 0x523   : > { %5405 = vmatpush3.bf16.msra.mxu1 %v6402_v40 }
 0x524   : > { %5407 = vmatprep.subr.bf16.mxu1 %v6414_v44 }
 0x527   : > { %5409 = vmatpush3.bf16.msra.mxu1 %v6414_v44 }
 0x528   : > { %5411 = vmatprep.subr.bf16.mxu1 %v6426_v48 }
 0x52b   : > { %5413 = vmatpush3.bf16.msra.mxu1 %v6426_v48 }
 0x52c   : > { %5415 = vmatprep.subr.bf16.mxu1 %v6438_v15 }
 0x52f   : > { %5417 = vmatpush3.bf16.msra.mxu1 %v6438_v15 }
 0x530   : > { %5483 = vmatprep.subr.bf16.mxu1 %v6208_v55 }
 0x5b1   : > { %v4872_v11 = vpop.f32.mrb[20].mxu1 }
 0x5b2   : > { %v6569_v19 = vmul.f32 %v6455_v22, %v4872_v11  ;;  %v1473_v49 = vpop.f32.mrb[21].mxu1 }
 0x5b3   : > { %v6572_v20 = vmul.f32 %v6453_v21, %v1473_v49 }
 0x5b4   : > { %1521 = vst.msk [vmem:[%s6574_s17 + $0x8] sm:$0xff] %vm900_vm1, %v6569_v19 }
 0x5b5   : > { %1520 = vst.msk [vmem:[%s6574_s17] sm:$0xff] %vm900_vm1, %v6572_v20 }
 0x5c2   : > { %v4875_v22 = vpop.f32.mrb[22].mxu1 }
 0x5c3   : > { %v6583_v13 = vmul.f32 %v6463_v30, %v4875_v22  ;;  %v1483_v21 = vpop.f32.mrb[23].mxu1  ;;  %v1766_v22 = vld [vmem:[%s7508_s10] sm:$0x3] }
 0x5c4   : > { %v6586_v51 = vmul.f32 %v6461_v28, %v1483_v21  ;;  %4898 = vmatprep.subr.msk.mxu0 %vm1121_vm4, %v1766_v22 }
 0x5c5   : > { %1523 = vst.msk [vmem:[%s6574_s17 + $0x18] sm:$0xff] %vm900_vm1, %v6583_v13  ;;  %4899 = vmatpush3.msk.msra.mxu0 %vm1121_vm4, %v1766_v22 }
 0x5c6   : > { %1522 = vst.msk [vmem:[%s6574_s17 + $0x10] sm:$0xff] %vm900_vm1, %v6586_v51  ;;  %4956 = vmatprep.subr.msk.mxu0 %vm1121_vm4, %v1766_v22 }
 0x5d2   : > { %v4878_v5 = vpop.f32.mrb[24].mxu1 }
 0x5d3   : > { %v6595_v26 = vmul.f32 %v6472_v42, %v4878_v5  ;;  %v1493_v17 = vpop.f32.mrb[25].mxu1 }
 0x5d4   : > { %v6598_v53 = vmul.f32 %v6469_v38, %v1493_v17 }
 0x5d5   : > { %1525 = vst.msk [vmem:[%s6574_s17 + $0x28] sm:$0xff] %vm900_vm1, %v6595_v26 }
 0x5d6   : > { %1524 = vst.msk [vmem:[%s6574_s17 + $0x20] sm:$0xff] %vm900_vm1, %v6598_v53 }
 0x5e1   : > { %v4881_v28 = vpop.f32.mrb[26].mxu1 }
 0x5e2   : > { %v6607_v30 = vmul.f32 %v6479_v46, %v4881_v28  ;;  %v1503_v47 = vpop.f32.mrb[27].mxu1 }
 0x5e3   : > { %v6610_v18 = vmul.f32 %v6477_v12, %v1503_v47 }
 0x5e4   : > { %1527 = vst.msk [vmem:[%s6574_s17 + $0x38] sm:$0xff] %vm900_vm1, %v6607_v30 }
 0x5e5   : > { %1526 = vst.msk [vmem:[%s6574_s17 + $0x30] sm:$0xff] %vm900_vm1, %v6610_v18  ;;  %v6618_v38 = vpop.f32.mrb[28].mxu1 }
 0x5e6   : > { %v6620_v42 = vpop.f32.mrb[29].mxu1  ;;  %v1713_v24 = vsel %vm900_vm1, %v6618_v38, -inf  ;;  %v1737_v12 = vsel %vm1061_vm3, %v6618_v38, -inf }
 0x5e7   : > { %1714 = vmax.xlane.f32.xlu0 %v1713_v24  ;;  %v1710_v33 = vsel %vm900_vm1, %v6620_v42, -inf  ;;  %v1734_v34 = vsel %vm1061_vm3, %v6620_v42, -inf }
 0x5e9   : > { %v6624_v46 = vpop.f32.mrb[30].mxu1 }
 0x5ea   : > { %v6626_v2 = vpop.f32.mrb[31].mxu1  ;;  %v1719_v10 = vsel %vm900_vm1, %v6624_v46, -inf  ;;  %v1743_v11 = vsel %vm1061_vm3, %v6624_v46, -inf }
 0x5eb   : > { %1738 = vmax.xlane.f32.xlu0 %v1737_v12  ;;  %v1716_v49 = vsel %vm900_vm1, %v6626_v2, -inf  ;;  %v1740_v21 = vsel %vm1061_vm3, %v6626_v2, -inf }
 0x5ed   : > { %v6630_v29 = vpop.f32.mrb[32].mxu1 }
 0x5ee   : > { %v6632_v32 = vpop.f32.mrb[33].mxu1  ;;  %v1725_v5 = vsel %vm900_vm1, %v6630_v29, -inf  ;;  %v1749_v17 = vsel %vm1061_vm3, %v6630_v29, -inf }
 0x5ef   : > { %1711 = vmax.xlane.f32.xlu0 %v1710_v33  ;;  %v1722_v28 = vsel %vm900_vm1, %v6632_v32, -inf  ;;  %v1746_v47 = vsel %vm1061_vm3, %v6632_v32, -inf }
 0x5f1   : > { %v6636_v6 = vpop.f32.mrb[34].mxu1 }
 0x5f2   : > { %v6638_v54 = vpop.f32.mrb[35].mxu1  ;;  %v1731_v39 = vsel %vm900_vm1, %v6636_v6, -inf  ;;  %v1755_v33 = vsel %vm1061_vm3, %v6636_v6, -inf }
 0x5f3   : > { %1735 = vmax.xlane.f32.xlu0 %v1734_v34  ;;  %1732 = vmax.xlane.f32.xlu1 %v1731_v39  ;;  %v1728_v24 = vsel %vm900_vm1, %v6638_v54, -inf  ;;  %v1752_v12 = vsel %vm1061_vm3, %v6638_v54, -inf }
 0x5f7   : > { %1720 = vmax.xlane.f32.xlu0 %v1719_v10 }
 0x5fb   : > { %1744 = vmax.xlane.f32.xlu0 %v1743_v11 }
 0x5ff   : > { %1717 = vmax.xlane.f32.xlu0 %v1716_v49 }
 0x603   : > { %1741 = vmax.xlane.f32.xlu0 %v1740_v21 }
 0x607   : > { %1726 = vmax.xlane.f32.xlu0 %v1725_v5 }
 0x60b   : > { %1750 = vmax.xlane.f32.xlu0 %v1749_v17 }
 0x60f   : > { %1723 = vmax.xlane.f32.xlu0 %v1722_v28 }
 0x613   : > { %1747 = vmax.xlane.f32.xlu0 %v1746_v47 }
 0x617   : > { %1729 = vmax.xlane.f32.xlu0 %v1728_v24 }
 0x61b   : > { %1753 = vmax.xlane.f32.xlu0 %v1752_v12 }
 0x61f   : > { %1756 = vmax.xlane.f32.xlu0 %v1755_v33 }
 0x674   : > { %v1715_v34 = vpop.xlane.xlu0 %1714 }
 0x678   : > { %v1739_v39 = vpop.xlane.xlu0 %1738 }
 0x679   : > { %v1759_v21 = vsel %vm1086_vm5, %v1715_v34, %v1739_v39 }
 0x67c   : > { %v1712_v10 = vpop.xlane.xlu0 %1711 }
 0x680   : > { %v1736_v11 = vpop.xlane.xlu0 %1735 }
 0x681   : > { %v1758_v49 = vsel %vm1086_vm5, %v1712_v10, %v1736_v11 }
 0x682   : > { %4900 = vmatprep.mubr.msk.f32.mxu0 %vm1096_vm6, %v1758_v49 }
 0x683   : > { %4901 = vmatmul.mubr.msk.f32.vlgmr.msra.gmra.mrb[24].mxu0 %vm1096_vm6, %v1759_v21 }
 0x684   : > { %v1721_v5 = vpop.xlane.xlu0 %1720  ;;  %4957 = vmatpush3.msk.msra.mxu0 %vm1121_vm4, %v1766_v22 }
 0x688   : > { %v1745_v17 = vpop.xlane.xlu0 %1744 }
 0x689   : > { %v1761_v12 = vsel %vm1086_vm5, %v1721_v5, %v1745_v17  ;;  %v1733_v17 = vpop.xlane.xlu1 %1732 }
 0x68c   : > { %v1718_v28 = vpop.xlane.xlu0 %1717 }
 0x690   : > { %v1742_v47 = vpop.xlane.xlu0 %1741 }
 0x691   : > { %v1760_v24 = vsel %vm1086_vm5, %v1718_v28, %v1742_v47 }
 0x692   : > { %4903 = vmatprep.mubr.msk.f32.mxu0 %vm1096_vm6, %v1760_v24 }
 0x693   : > { %4904 = vmatmul.mubr.msk.f32.gmra.mrb[26].mxu0 %vm1096_vm6, %v1761_v12 }
 0x694   : > { %v1727_v33 = vpop.xlane.xlu0 %1726 }
 0x698   : > { %v1751_v34 = vpop.xlane.xlu0 %1750 }
 0x699   : > { %v1763_v49 = vsel %vm1086_vm5, %v1727_v33, %v1751_v34 }
 0x69c   : > { %v1724_v39 = vpop.xlane.xlu0 %1723 }
 0x6a0   : > { %v1748_v10 = vpop.xlane.xlu0 %1747 }
 0x6a1   : > { %v1762_v11 = vsel %vm1086_vm5, %v1724_v39, %v1748_v10 }
 0x6a2   : > { %4906 = vmatprep.mubr.msk.f32.mxu0 %vm1096_vm6, %v1762_v11 }
 0x6a3   : > { %4907 = vmatmul.mubr.msk.f32.gmra.mrb[28].mxu0 %vm1096_vm6, %v1763_v49 }
 0x6a4   : > { %v1730_v22 = vpop.xlane.xlu0 %1729 }
 0x6a8   : > { %v1754_v21 = vpop.xlane.xlu0 %1753 }
 0x6a9   : > { %v1764_v5 = vsel %vm1086_vm5, %v1730_v22, %v1754_v21 }
 0x6aa   : > { %4909 = vmatprep.mubr.msk.f32.mxu0 %vm1096_vm6, %v1764_v5 }
 0x6ac   : > { %v1757_v28 = vpop.xlane.xlu0 %1756 }
 0x6ad   : > { %v1765_v47 = vsel %vm1086_vm5, %v1733_v17, %v1757_v28 }
 0x6ae   : > { %4910 = vmatmul.mubr.msk.f32.gmra.mrb[30].mxu0 %vm1096_vm6, %v1765_v47 }
 0x756   : > { %v4902_v24 = vpop.f32.mrb[24].mxu0 }
 0x757   : > { %v1900_v12 = vsub.f32 %v6618_v38, %v4902_v24  ;;  %v1860_v33 = vpop.f32.mrb[25].mxu0 }
 0x758   : > { %v1899_v34 = vsub.f32 %v6620_v42, %v1860_v33 }
 0x759   : > { %v1909_v39 = vmul.f32 1.442695, %v1900_v12 }
 0x75a   : > { %v1907_v10 = vmul.f32 1.442695, %v1899_v34 }
 0x75c   : > { %5841 = vpow2.f32 %v1907_v10 }
 0x75d   : > { %5843 = vpow2.f32 %v1909_v39 }
 0x766   : > { %v6691_v11 = vpop.eup %5841  ;;  %v4905_v49 = vpop.f32.mrb[26].mxu0 }
 0x767   : > { %v6693_v22 = vpop.eup %5843  ;;  %v1902_v21 = vsub.f32 %v6624_v46, %v4905_v49  ;;  %v1870_v5 = vpop.f32.mrb[27].mxu0  ;;  %4944 = vmatprep.mubr.f32.mxu1 %v6691_v11 }
 0x768   : > { %v1901_v17 = vsub.f32 %v6626_v2, %v1870_v5  ;;  %4945 = vmatmul.mubr.f32.vlgmr.msra.gmra.mrb[36].mxu1 %v6693_v22 }
 0x769   : > { %v1913_v38 = vmul.f32 1.442695, %v1902_v21  ;;  %5485 = vmatpush3.bf16.msra.mxu1 %v6208_v55 }
 0x76a   : > { %v1911_v42 = vmul.f32 1.442695, %v1901_v17 }
 0x76c   : > { %5845 = vpow2.f32 %v1911_v42 }
 0x76d   : > { %5847 = vpow2.f32 %v1913_v38 }
 0x776   : > { %v6700_v28 = vpop.eup %5845  ;;  %v4908_v47 = vpop.f32.mrb[28].mxu0 }
 0x777   : > { %v6702_v24 = vpop.eup %5847  ;;  %v1904_v46 = vsub.f32 %v6630_v29, %v4908_v47  ;;  %v1880_v12 = vpop.f32.mrb[29].mxu0  ;;  %4947 = vmatprep.mubr.f32.mxu1 %v6700_v28 }
 0x778   : > { %v1903_v2 = vsub.f32 %v6632_v32, %v1880_v12  ;;  %4948 = vmatmul.mubr.f32.gmra.mrb[38].mxu1 %v6702_v24 }
 0x779   : > { %v1917_v33 = vmul.f32 1.442695, %v1904_v46 }
 0x77a   : > { %v1915_v34 = vmul.f32 1.442695, %v1903_v2 }
 0x77c   : > { %5849 = vpow2.f32 %v1915_v34 }
 0x77d   : > { %5851 = vpow2.f32 %v1917_v33 }
 0x781   : > { %v4911_v55 = vpop.f32.mrb[30].mxu0 }
 0x782   : > { %v1906_v39 = vsub.f32 %v6636_v6, %v4911_v55  ;;  %v1890_v10 = vpop.f32.mrb[31].mxu0 }
 0x783   : > { %v1905_v49 = vsub.f32 %v6638_v54, %v1890_v10 }
 0x784   : > { %v1921_v21 = vmul.f32 1.442695, %v1906_v39 }
 0x785   : > { %v1919_v5 = vmul.f32 1.442695, %v1905_v49 }
 0x786   : > { %v6710_v29 = vpop.eup %5849 }
 0x787   : > { %v6712_v17 = vpop.eup %5851  ;;  %5853 = vpow2.f32 %v1919_v5  ;;  %4950 = vmatprep.mubr.f32.mxu1 %v6710_v29 }
 0x788   : > { %5855 = vpow2.f32 %v1921_v21  ;;  %4951 = vmatmul.mubr.f32.gmra.mrb[40].mxu1 %v6712_v17 }
 0x791   : > { %v6716_v32 = vpop.eup %5853 }
 0x792   : > { %v6718_v38 = vpop.eup %5855  ;;  %4953 = vmatprep.mubr.f32.mxu1 %v6716_v32 }
 0x793   : > { %4954 = vmatmul.mubr.f32.gmra.mrb[42].mxu1 %v6718_v38 }
 0x794   : > { %5062 = vmatprep.mubr.msk.f32.mxu1 %vm907_vm2, %v6212_v57 }
 0x797   : > { %5063 = vmatmul.mubr.msk.f32.vlgmr.msra.gmra.mrb[44].mxu1 %vm907_vm2, %v6216_v58 }
 0x798   : > { %5065 = vmatprep.mubr.msk.f32.mxu1 %vm907_vm2, %v6220_v59 }
 0x79b   : > { %5066 = vmatmul.mubr.msk.f32.gmra.mrb[46].mxu1 %vm907_vm2, %v6224_v60 }
 0x79c   : > { %5068 = vmatprep.mubr.msk.f32.mxu1 %vm907_vm2, %v6228_v61 }
 0x79f   : > { %5069 = vmatmul.mubr.msk.f32.gmra.mrb[48].mxu1 %vm907_vm2, %v6232_v62 }
 0x7a0   : > { %5071 = vmatprep.mubr.msk.f32.mxu1 %vm907_vm2, %v6236_v63 }
 0x7a3   : > { %5072 = vmatmul.mubr.msk.f32.gmra.mrb[50].mxu1 %vm907_vm2, %v6240_v0 }
 0x83b   : > { %v4946_v6 = vpop.f32.mrb[36].mxu1 }
 0x83c   : > { %v2005_v54 = vpop.f32.mrb[37].mxu1 }
 0x83d   : > { %5857 = vrcp.f32 %v2005_v54 }
 0x83e   : > { %5859 = vrcp.f32 %v4946_v6 }
 0x847   : > { %v5858_v42 = vpop.eup %5857 }
 0x848   : > { %v5860_v47 = vpop.eup %5859  ;;  %4958 = vmatprep.mubr.msk.f32.mxu0 %vm1096_vm6, %v5858_v42 }
 0x849   : > { %4959 = vmatmul.mubr.msk.f32.vlgmr.msra.gmra.mrb[32].mxu0 %vm1096_vm6, %v5860_v47 }
 0x84b   : > { %v4949_v46 = vpop.f32.mrb[38].mxu1 }
 0x84c   : > { %v2015_v12 = vpop.f32.mrb[39].mxu1 }
 0x84d   : > { %5861 = vrcp.f32 %v2015_v12 }
 0x84e   : > { %5863 = vrcp.f32 %v4949_v46 }
 0x857   : > { %v5862_v2 = vpop.eup %5861 }
 0x858   : > { %v5864_v33 = vpop.eup %5863  ;;  %4961 = vmatprep.mubr.msk.f32.mxu0 %vm1096_vm6, %v5862_v2 }
 0x859   : > { %4962 = vmatmul.mubr.msk.f32.gmra.mrb[34].mxu0 %vm1096_vm6, %v5864_v33 }
 0x85b   : > { %v4952_v34 = vpop.f32.mrb[40].mxu1 }
 0x85c   : > { %v2025_v55 = vpop.f32.mrb[41].mxu1 }
 0x85d   : > { %5865 = vrcp.f32 %v2025_v55 }
 0x85e   : > { %5867 = vrcp.f32 %v4952_v34 }
 0x866   : > { %v4955_v39 = vpop.f32.mrb[42].mxu1 }
 0x867   : > { %v5866_v10 = vpop.eup %5865  ;;  %v2035_v49 = vpop.f32.mrb[43].mxu1 }
 0x868   : > { %v5868_v21 = vpop.eup %5867  ;;  %5869 = vrcp.f32 %v2035_v49  ;;  %4964 = vmatprep.mubr.msk.f32.mxu0 %vm1096_vm6, %v5866_v10 }
 0x869   : > { %5871 = vrcp.f32 %v4955_v39  ;;  %4965 = vmatmul.mubr.msk.f32.gmra.mrb[36].mxu0 %vm1096_vm6, %v5868_v21 }
 0x86a   : > { %v6744_v5 = vpop.f32.mrb[44].mxu1 }
 0x86b   : > { %v6746_v6 = vpop.f32.mrb[45].mxu1  ;;  %v2609_v54 = vsel %vm900_vm1, %v6744_v5, -inf  ;;  %v2633_v46 = vsel %vm1061_vm3, %v6744_v5, -inf }
 0x86c   : > { %2610 = vmax.xlane.f32.xlu0 %v2609_v54  ;;  %v2606_v55 = vsel %vm900_vm1, %v6746_v6, -inf  ;;  %v2630_v49 = vsel %vm1061_vm3, %v6746_v6, -inf }
 0x86e   : > { %v6750_v42 = vpop.f32.mrb[46].mxu1 }
 0x86f   : > { %v6752_v47 = vpop.f32.mrb[47].mxu1  ;;  %v2615_v54 = vsel %vm900_vm1, %v6750_v42, -inf }
 0x870   : > { %2634 = vmax.xlane.f32.xlu0 %v2633_v46 }
 0x872   : > { %v5870_v12 = vpop.eup %5869  ;;  %v6756_v2 = vpop.f32.mrb[48].mxu1 }
 0x873   : > { %v5872_v33 = vpop.eup %5871  ;;  %4967 = vmatprep.mubr.msk.f32.mxu0 %vm1096_vm6, %v5870_v12  ;;  %v6759_v34 = vpop.f32.mrb[49].mxu1  ;;  %v2639_v12 = vsel %vm1061_vm3, %v6750_v42, -inf }
 0x874   : > { %2607 = vmax.xlane.f32.xlu0 %v2606_v55  ;;  %4968 = vmatmul.mubr.msk.f32.gmra.mrb[38].mxu0 %vm1096_vm6, %v5872_v33  ;;  %v6781_v33 = vld [vmem:[%s7508_s10] sm:$0x3]  ;;  %v2612_v55 = vsel %vm900_vm1, %v6752_v47, -inf }
 0x875   : > { %5074 = vmatprep.subr.msk.mxu1 %vm1121_vm4, %v6781_v33 }
 0x876   : > { %v6764_v39 = vpop.f32.mrb[50].mxu1  ;;  %5075 = vmatpush3.msk.msra.mxu1 %vm1121_vm4, %v6781_v33 }
 0x877   : > { %v6766_v10 = vpop.f32.mrb[51].mxu1  ;;  %v2627_v46 = vsel %vm900_vm1, %v6764_v39, -inf  ;;  %5487 = vmatprep.subr.bf16.mxu1 %v6335_v45 }
 0x878   : > { %2631 = vmax.xlane.f32.xlu0 %v2630_v49  ;;  %v2624_v21 = vsel %vm900_vm1, %v6766_v10, -inf  ;;  %v2636_v49 = vsel %vm1061_vm3, %v6752_v47, -inf }
 0x879   : > { %2625 = vmax.xlane.f32.xlu1 %v2624_v21  ;;  %v2621_v21 = vsel %vm900_vm1, %v6756_v2, -inf }
 0x87c   : > { %2616 = vmax.xlane.f32.xlu0 %v2615_v54  ;;  %v2645_v54 = vsel %vm1061_vm3, %v6756_v2, -inf }
 0x87d   : > { %2628 = vmax.xlane.f32.xlu1 %v2627_v46  ;;  %v2618_v46 = vsel %vm900_vm1, %v6759_v34, -inf }
 0x880   : > { %2640 = vmax.xlane.f32.xlu0 %v2639_v12  ;;  %v2642_v12 = vsel %vm1061_vm3, %v6759_v34, -inf }
 0x884   : > { %2613 = vmax.xlane.f32.xlu0 %v2612_v55  ;;  %v2648_v55 = vsel %vm1061_vm3, %v6766_v10, -inf }
 0x888   : > { %2637 = vmax.xlane.f32.xlu0 %v2636_v49  ;;  %v2651_v49 = vsel %vm1061_vm3, %v6764_v39, -inf }
 0x88c   : > { %2622 = vmax.xlane.f32.xlu0 %v2621_v21 }
 0x890   : > { %2646 = vmax.xlane.f32.xlu0 %v2645_v54 }
 0x894   : > { %2619 = vmax.xlane.f32.xlu0 %v2618_v46 }
 0x898   : > { %2643 = vmax.xlane.f32.xlu0 %v2642_v12 }
 0x89c   : > { %2649 = vmax.xlane.f32.xlu0 %v2648_v55 }
 0x8a0   : > { %2652 = vmax.xlane.f32.xlu0 %v2651_v49 }
 0x8f9   : > { %v2611_v21 = vpop.xlane.xlu0 %2610 }
 0x8fd   : > { %v2635_v1 = vpop.xlane.xlu0 %2634 }
 0x8fe   : > { %v2655_v46 = vsel %vm1086_vm5, %v2611_v21, %v2635_v1 }
 0x901   : > { %v2608_v3 = vpop.xlane.xlu0 %2607 }
 0x905   : > { %v2632_v54 = vpop.xlane.xlu0 %2631 }
 0x906   : > { %v2654_v37 = vsel %vm1086_vm5, %v2608_v3, %v2632_v54 }
 0x907   : > { %5076 = vmatprep.mubr.msk.f32.mxu1 %vm1096_vm6, %v2654_v37 }
 0x908   : > { %5077 = vmatmul.mubr.msk.f32.vlgmr.msra.gmra.mrb[52].mxu1 %vm1096_vm6, %v2655_v46 }
 0x909   : > { %5489 = vmatpush3.bf16.msra.mxu1 %v6335_v45  ;;  %v2617_v12 = vpop.xlane.xlu0 %2616 }
 0x90a   : > { %5491 = vmatprep.subr.bf16.mxu1 %v6366_v27 }
 0x90d   : > { %5493 = vmatpush3.bf16.msra.mxu1 %v6366_v27  ;;  %v2641_v55 = vpop.xlane.xlu0 %2640 }
 0x90e   : > { %5495 = vmatprep.subr.bf16.mxu1 %v6378_v31  ;;  %v2657_v45 = vsel %vm1086_vm5, %v2617_v12, %v2641_v55 }
 0x911   : > { %5497 = vmatpush3.bf16.msra.mxu1 %v6378_v31  ;;  %v2614_v49 = vpop.xlane.xlu0 %2613 }
 0x912   : > { %5499 = vmatprep.subr.bf16.mxu1 %v6390_v35 }
 0x915   : > { %5501 = vmatpush3.bf16.msra.mxu1 %v6390_v35  ;;  %v2638_v37 = vpop.xlane.xlu0 %2637 }
 0x916   : > { %v2656_v3 = vsel %vm1086_vm5, %v2614_v49, %v2638_v37  ;;  %5503 = vmatprep.subr.bf16.mxu1 %v6402_v40 }
 0x917   : > { %5079 = vmatprep.mubr.msk.f32.mxu1 %vm1096_vm6, %v2656_v3 }
 0x918   : > { %5080 = vmatmul.mubr.msk.f32.gmra.mrb[54].mxu1 %vm1096_vm6, %v2657_v45 }
 0x919   : > { %5505 = vmatpush3.bf16.msra.mxu1 %v6402_v40  ;;  %v2623_v27 = vpop.xlane.xlu0 %2622 }
 0x91a   : > { %5507 = vmatprep.subr.bf16.mxu1 %v6414_v44 }
 0x91c   : > { %v4960_v31 = vpop.f32.mrb[32].mxu0 }
 0x91d   : > { %v6823_v35 = vmul.f32 %v6693_v22, %v4960_v31  ;;  %5509 = vmatpush3.bf16.msra.mxu1 %v6414_v44  ;;  %v2142_v1 = vpop.f32.mrb[33].mxu0  ;;  %v2647_v21 = vpop.xlane.xlu0 %2646 }
 0x91e   : > { %v6827_v54 = vmul.f32 %v6691_v11, %v2142_v1  ;;  %5511 = vmatprep.subr.bf16.mxu1 %v6426_v48  ;;  %v2626_v11 = vpop.xlane.xlu1 %2625  ;;  %v2659_v46 = vsel %vm1086_vm5, %v2623_v27, %v2647_v21 }
 0x91f   : > { %4348 = vst.msk [vmem:[%s6574_s17 + $0x88] sm:$0xff] %vm900_vm1, %v6823_v35 }
 0x920   : > { %4347 = vst.msk [vmem:[%s6574_s17 + $0x80] sm:$0xff] %vm900_vm1, %v6827_v54  ;;  %5002 = vmatprep.mubr.f32.mxu0 %v6827_v54 }
 0x921   : > { %5513 = vmatpush3.bf16.msra.mxu1 %v6426_v48  ;;  %v2620_v40 = vpop.xlane.xlu0 %2619 }
 0x922   : > { %5515 = vmatprep.subr.bf16.mxu1 %v6438_v15 }
 0x925   : > { %5517 = vmatpush3.bf16.msra.mxu1 %v6438_v15  ;;  %v2644_v44 = vpop.xlane.xlu0 %2643  ;;  %v2629_v15 = vpop.xlane.xlu1 %2628 }
 0x926   : > { %5551 = vmatprep.subr.bf16.mxu1 %v6210_v56  ;;  %v2658_v22 = vsel %vm1086_vm5, %v2620_v40, %v2644_v44 }
 0x927   : > { %5082 = vmatprep.mubr.msk.f32.mxu1 %vm1096_vm6, %v2658_v22 }
 0x928   : > { %5083 = vmatmul.mubr.msk.f32.gmra.mrb[56].mxu1 %vm1096_vm6, %v2659_v46 }
 0x929   : > { %v2650_v48 = vpop.xlane.xlu0 %2649 }
 0x92a   : > { %v2660_v12 = vsel %vm1086_vm5, %v2626_v11, %v2650_v48 }
 0x92b   : > { %5085 = vmatprep.mubr.msk.f32.mxu1 %vm1096_vm6, %v2660_v12 }
 0x92c   : > { %v4963_v55 = vpop.f32.mrb[34].mxu0 }
 0x92d   : > { %v6848_v49 = vmul.f32 %v6702_v24, %v4963_v55  ;;  %v2152_v37 = vpop.f32.mrb[35].mxu0  ;;  %v2653_v3 = vpop.xlane.xlu0 %2652 }
 0x92e   : > { %v6851_v45 = vmul.f32 %v6700_v28, %v2152_v37  ;;  %v2661_v27 = vsel %vm1086_vm5, %v2629_v15, %v2653_v3 }
 0x92f   : > { %4350 = vst.msk [vmem:[%s6574_s17 + $0x98] sm:$0xff] %vm900_vm1, %v6848_v49  ;;  %5086 = vmatmul.mubr.msk.f32.gmra.mrb[58].mxu1 %vm1096_vm6, %v2661_v27 }
 0x930   : > { %4349 = vst.msk [vmem:[%s6574_s17 + $0x90] sm:$0xff] %vm900_vm1, %v6851_v45 }
 0x93c   : > { %v4966_v31 = vpop.f32.mrb[36].mxu0 }
 0x93d   : > { %v6862_v24 = vmul.f32 %v6712_v17, %v4966_v31  ;;  %v2162_v1 = vpop.f32.mrb[37].mxu0 }
 0x93e   : > { %v6865_v21 = vmul.f32 %v6710_v29, %v2162_v1 }
 0x93f   : > { %4352 = vst.msk [vmem:[%s6574_s17 + $0xa8] sm:$0xff] %vm900_vm1, %v6862_v24 }
 0x940   : > { %4351 = vst.msk [vmem:[%s6574_s17 + $0xa0] sm:$0xff] %vm900_vm1, %v6865_v21 }
 0x947   : > { %v4969_v28 = vpop.f32.mrb[38].mxu0 }
 0x948   : > { %v6874_v40 = vmul.f32 %v6718_v38, %v4969_v28  ;;  %v2172_v44 = vpop.f32.mrb[39].mxu0 }
 0x949   : > { %v6877_v11 = vmul.f32 %v6716_v32, %v2172_v44 }
 0x94a   : > { %4354 = vst.msk [vmem:[%s6574_s17 + $0xb8] sm:$0xff] %vm900_vm1, %v6874_v40 }
 0x94b   : > { %4353 = vst.msk [vmem:[%s6574_s17 + $0xb0] sm:$0xff] %vm900_vm1, %v6877_v11 }
 0x9db   : > { %v5078_v29 = vpop.f32.mrb[52].mxu1 }
 0x9dc   : > { %v2796_v17 = vsub.f32 %v6744_v5, %v5078_v29  ;;  %v2756_v22 = vpop.f32.mrb[53].mxu1 }
 0x9dd   : > { %v2795_v46 = vsub.f32 %v6746_v6, %v2756_v22 }
 0x9de   : > { %v2805_v48 = vmul.f32 1.442695, %v2796_v17 }
 0x9df   : > { %v2803_v12 = vmul.f32 1.442695, %v2795_v46 }
 0x9e1   : > { %5873 = vpow2.f32 %v2803_v12 }
 0x9e2   : > { %5875 = vpow2.f32 %v2805_v48 }
 0x9eb   : > { %v6887_v38 = vpop.eup %5873  ;;  %v5081_v32 = vpop.f32.mrb[54].mxu1 }
 0x9ec   : > { %7537 = vst [vmem:[#allocation12_spill] sm:$0xff] %v6887_v38  ;;  %v6889_v15 = vpop.eup %5875  ;;  %v2798_v55 = vsub.f32 %v6750_v42, %v5081_v32  ;;  %v2766_v37 = vpop.f32.mrb[55].mxu1  ;;  %5120 = vmatprep.mubr.f32.mxu1 %v6887_v38 }
 0x9ed   : > { %v2797_v3 = vsub.f32 %v6752_v47, %v2766_v37  ;;  %5121 = vmatmul.mubr.f32.vlgmr.msra.gmra.mrb[60].mxu1 %v6889_v15 }
 0x9ee   : > { %v2809_v5 = vmul.f32 1.442695, %v2798_v55  ;;  %5553 = vmatpush3.bf16.msra.mxu1 %v6210_v56 }
 0x9ef   : > { %v2807_v6 = vmul.f32 1.442695, %v2797_v3 }
 0x9f1   : > { %5877 = vpow2.f32 %v2807_v6 }
 0x9f2   : > { %5879 = vpow2.f32 %v2809_v5 }
 0x9fb   : > { %v6896_v27 = vpop.eup %5877  ;;  %v5084_v31 = vpop.f32.mrb[56].mxu1 }
 0x9fc   : > { %7538 = vst [vmem:[#allocation13_spill] sm:$0xff] %v6896_v27  ;;  %v6898_v1 = vpop.eup %5879  ;;  %v2800_v42 = vsub.f32 %v6756_v2, %v5084_v31  ;;  %v2776_v28 = vpop.f32.mrb[57].mxu1  ;;  %5123 = vmatprep.mubr.f32.mxu1 %v6896_v27 }
 0x9fd   : > { %7539 = vst [vmem:[#allocation14_spill] sm:$0xff] %v6898_v1  ;;  %v2799_v47 = vsub.f32 %v6759_v34, %v2776_v28  ;;  %5124 = vmatmul.mubr.f32.gmra.mrb[62].mxu1 %v6898_v1 }
 0x9fe   : > { %v2813_v44 = vmul.f32 1.442695, %v2800_v42 }
 0x9ff   : > { %v2811_v29 = vmul.f32 1.442695, %v2799_v47 }
 0xa01   : > { %5881 = vpow2.f32 %v2811_v29 }
 0xa02   : > { %5883 = vpow2.f32 %v2813_v44  ;;  %v5087_v56 = vpop.f32.mrb[58].mxu1 }
 0xa03   : > { %v2802_v17 = vsub.f32 %v6764_v39, %v5087_v56  ;;  %v2786_v22 = vpop.f32.mrb[59].mxu1 }
 0xa04   : > { %v2801_v46 = vsub.f32 %v6766_v10, %v2786_v22 }
 0xa05   : > { %v2817_v48 = vmul.f32 1.442695, %v2802_v17 }
 0xa06   : > { %v2815_v12 = vmul.f32 1.442695, %v2801_v46 }
 0xa08   : > { %5885 = vpow2.f32 %v2815_v12 }
 0xa09   : > { %5887 = vpow2.f32 %v2817_v48 }
 0xa0b   : > { %v6906_v2 = vpop.eup %5881 }
 0xa0c   : > { %7540 = vst [vmem:[#allocation15_spill] sm:$0xff] %v6906_v2  ;;  %v6908_v32 = vpop.eup %5883  ;;  %5126 = vmatprep.mubr.f32.mxu1 %v6906_v2 }
 0xa0d   : > { %7541 = vst [vmem:[#allocation16_spill] sm:$0xff] %v6908_v32  ;;  %5127 = vmatmul.mubr.f32.gmra.mrb[64].mxu1 %v6908_v32 }
 0xa12   : > { %v6912_v34 = vpop.eup %5885 }
 0xa13   : > { %7542 = vst [vmem:[#allocation17_spill] sm:$0xff] %v6912_v34  ;;  %v6914_v55 = vpop.eup %5887  ;;  %5129 = vmatprep.mubr.f32.mxu1 %v6912_v34 }
 0xa14   : > { %7543 = vst [vmem:[#allocation18_spill] sm:$0xff] %v6914_v55  ;;  %5130 = vmatmul.mubr.f32.gmra.mrb[66].mxu1 %v6914_v55 }
 0xa15   : > { %5194 = vmatprep.mubr.msk.f32.mxu1 %vm907_vm2, %v6212_v57  ;;  %v6937_v57 = vld [vmem:[%s7508_s10] sm:$0x3] }
 0xa16   : > { %5206 = vmatprep.subr.msk.mxu1 %vm1121_vm4, %v6937_v57 }
 0xa18   : > { %5195 = vmatmul.mubr.msk.f32.vlgmr.msra.gmra.mrb[68].mxu1 %vm907_vm2, %v6216_v58 }
 0xa19   : > { %5197 = vmatprep.mubr.msk.f32.mxu1 %vm907_vm2, %v6220_v59  ;;  %5207 = vmatpush3.msk.msra.mxu1 %vm1121_vm4, %v6937_v57 }
 0xa1c   : > { %5198 = vmatmul.mubr.msk.f32.gmra.mrb[70].mxu1 %vm907_vm2, %v6224_v60 }
 0xa1d   : > { %5200 = vmatprep.mubr.msk.f32.mxu1 %vm907_vm2, %v6228_v61 }
 0xa20   : > { %5201 = vmatmul.mubr.msk.f32.gmra.mrb[72].mxu1 %vm907_vm2, %v6232_v62 }
 0xa21   : > { %5203 = vmatprep.mubr.msk.f32.mxu1 %vm907_vm2, %v6236_v63 }
 0xa24   : > { %5204 = vmatmul.mubr.msk.f32.gmra.mrb[74].mxu1 %vm907_vm2, %v6240_v0 }
 0xac0   : > { %v6943_v58 = vpop.f32.mrb[60].mxu1 }
 0xac1   : > { %v6945_v59 = vpop.f32.mrb[61].mxu1 }
 0xac2   : > { %5889 = vrcp.f32 %v6945_v59 }
 0xac3   : > { %5891 = vrcp.f32 %v6943_v58 }
 0xad0   : > { %v6947_v60 = vpop.f32.mrb[62].mxu1 }
 0xad1   : > { %v6949_v61 = vpop.f32.mrb[63].mxu1 }
 0xad2   : > { %5893 = vrcp.f32 %v6949_v61 }
 0xad3   : > { %5895 = vrcp.f32 %v6947_v60 }
 0xae0   : > { %v6951_v62 = vpop.f32.mrb[64].mxu1 }
 0xae1   : > { %v6953_v63 = vpop.f32.mrb[65].mxu1 }
 0xae2   : > { %5897 = vrcp.f32 %v6953_v63 }
 0xae3   : > { %5899 = vrcp.f32 %v6951_v62 }
 0xae7   : > { %v6955_v0 = vpop.f32.mrb[66].mxu1 }
 0xae8   : > { %v6957_v39 = vpop.f32.mrb[67].mxu1 }
 0xae9   : > { %5901 = vrcp.f32 %v6957_v39 }
 0xaea   : > { %5903 = vrcp.f32 %v6955_v0 }
 0xaeb   : > { %v6959_v10 = vpop.f32.mrb[68].mxu1 }
 0xaec   : > { %v6961_v37 = vpop.f32.mrb[69].mxu1  ;;  %v3416_v3 = vsel %vm1061_vm3, %v6959_v10, -inf  ;;  %v3392_v5 = vsel %vm900_vm1, %v6959_v10, -inf }
 0xaed   : > { %3417 = vmax.xlane.f32.xlu0 %v3416_v3  ;;  %3393 = vmax.xlane.f32.xlu1 %v3392_v5  ;;  %v3413_v42 = vsel %vm1061_vm3, %v6961_v37, -inf  ;;  %v3389_v28 = vsel %vm900_vm1, %v6961_v37, -inf }
 0xaef   : > { %v6967_v6 = vpop.f32.mrb[70].mxu1 }
 0xaf0   : > { %v6969_v31 = vpop.f32.mrb[71].mxu1  ;;  %v3422_v29 = vsel %vm1061_vm3, %v6967_v6, -inf  ;;  %v3398_v56 = vsel %vm900_vm1, %v6967_v6, -inf }
 0xaf1   : > { %3414 = vmax.xlane.f32.xlu0 %v3413_v42  ;;  %3390 = vmax.xlane.f32.xlu1 %v3389_v28  ;;  %v3419_v46 = vsel %vm1061_vm3, %v6969_v31, -inf  ;;  %v3395_v48 = vsel %vm900_vm1, %v6969_v31, -inf }
 0xaf3   : > { %v6975_v47 = vpop.f32.mrb[72].mxu1 }
 0xaf4   : > { %v6977_v44 = vpop.f32.mrb[73].mxu1  ;;  %v3428_v12 = vsel %vm1061_vm3, %v6975_v47, -inf  ;;  %v3404_v3 = vsel %vm900_vm1, %v6975_v47, -inf }
 0xaf5   : > { %3423 = vmax.xlane.f32.xlu0 %v3422_v29  ;;  %3399 = vmax.xlane.f32.xlu1 %v3398_v56  ;;  %v3425_v5 = vsel %vm1061_vm3, %v6977_v44, -inf  ;;  %v3401_v42 = vsel %vm900_vm1, %v6977_v44, -inf }
 0xaf7   : > { %v6983_v17 = vpop.f32.mrb[74].mxu1 }
 0xaf8   : > { %v6985_v22 = vpop.f32.mrb[75].mxu1  ;;  %v3434_v56 = vsel %vm1061_vm3, %v6983_v17, -inf }
 0xaf9   : > { %3420 = vmax.xlane.f32.xlu0 %v3419_v46  ;;  %3396 = vmax.xlane.f32.xlu1 %v3395_v48  ;;  %v3431_v28 = vsel %vm1061_vm3, %v6985_v22, -inf  ;;  %v3407_v29 = vsel %vm900_vm1, %v6985_v22, -inf  ;;  %v3410_v46 = vsel %vm900_vm1, %v6983_v17, -inf }
 0xafd   : > { %3429 = vmax.xlane.f32.xlu0 %v3428_v12  ;;  %3405 = vmax.xlane.f32.xlu1 %v3404_v3 }
 0xb01   : > { %3426 = vmax.xlane.f32.xlu0 %v3425_v5  ;;  %3402 = vmax.xlane.f32.xlu1 %v3401_v42 }
 0xb05   : > { %3432 = vmax.xlane.f32.xlu0 %v3431_v28  ;;  %3408 = vmax.xlane.f32.xlu1 %v3407_v29 }
 0xb09   : > { %3435 = vmax.xlane.f32.xlu0 %v3434_v56  ;;  %3411 = vmax.xlane.f32.xlu1 %v3410_v46 }
 0xb1a   : > { %5690 = vrot.lane.b32.xlu1 %v6485_v8, %s6004_s30 }
 0xb1e   : > { %5700 = vrot.lane.b32.xlu1 %v6495_v7, %s6004_s30 }
 0xb1f   : > { %5695 = vrot.lane.b32.xlu0 %v6491_v25, %s6004_s30 }
 0xb22   : > { %5705 = vrot.lane.b32.xlu1 %v6515_v50, %s6004_s30 }
 0xb23   : > { %5710 = vrot.lane.b32.xlu0 %v6485_v8, %s7544_s21 }
 0xb26   : > { %5715 = vrot.lane.b32.xlu1 %v6491_v25, %s7544_s21 }
 0xb27   : > { %5720 = vrot.lane.b32.xlu0 %v6495_v7, %s7544_s21 }
 0xb2a   : > { %5725 = vrot.lane.b32.xlu1 %v6515_v50, %s7544_s21 }
 0xb7a   : > { %v3418_v48 = vpop.xlane.xlu0 %3417  ;;  %v3394_v12 = vpop.xlane.xlu1 %3393 }
 0xb7b   : > { %v3438_v28 = vsel %vm1086_vm5, %v3394_v12, %v3418_v48 }
 0xb7e   : > { %v3415_v3 = vpop.xlane.xlu0 %3414  ;;  %v3391_v5 = vpop.xlane.xlu1 %3390 }
 0xb7f   : > { %v3437_v42 = vsel %vm1086_vm5, %v3391_v5, %v3415_v3 }
 0xb80   : > { %5208 = vmatprep.mubr.msk.f32.mxu1 %vm1096_vm6, %v3437_v42 }
 0xb81   : > { %5209 = vmatmul.mubr.msk.f32.vlgmr.msra.gmra.mrb[76].mxu1 %vm1096_vm6, %v3438_v28 }
 0xb82   : > { %v3424_v8 = vpop.xlane.xlu0 %3423  ;;  %v3400_v25 = vpop.xlane.xlu1 %3399 }
 0xb83   : > { %v3440_v50 = vsel %vm1086_vm5, %v3400_v25, %v3424_v8 }
 0xb86   : > { %v3421_v29 = vpop.xlane.xlu0 %3420  ;;  %v3397_v56 = vpop.xlane.xlu1 %3396 }
 0xb87   : > { %v3439_v7 = vsel %vm1086_vm5, %v3397_v56, %v3421_v29 }
 0xb88   : > { %5211 = vmatprep.mubr.msk.f32.mxu1 %vm1096_vm6, %v3439_v7 }
 0xb89   : > { %5212 = vmatmul.mubr.msk.f32.gmra.mrb[78].mxu1 %vm1096_vm6, %v3440_v50 }
 0xb8a   : > { %v3430_v46 = vpop.xlane.xlu0 %3429  ;;  %v3406_v3 = vpop.xlane.xlu1 %3405 }
 0xb8b   : > { %v3442_v42 = vsel %vm1086_vm5, %v3406_v3, %v3430_v46 }
 0xb8e   : > { %v3427_v5 = vpop.xlane.xlu0 %3426  ;;  %v3403_v48 = vpop.xlane.xlu1 %3402 }
 0xb8f   : > { %v3441_v12 = vsel %vm1086_vm5, %v3403_v48, %v3427_v5 }
 0xb90   : > { %5214 = vmatprep.mubr.msk.f32.mxu1 %vm1096_vm6, %v3441_v12 }
 0xb91   : > { %5215 = vmatmul.mubr.msk.f32.gmra.mrb[80].mxu1 %vm1096_vm6, %v3442_v42 }
 0xb92   : > { %v3433_v28 = vpop.xlane.xlu0 %3432  ;;  %v3409_v29 = vpop.xlane.xlu1 %3408 }
 0xb93   : > { %v3443_v8 = vsel %vm1086_vm5, %v3409_v29, %v3433_v28 }
 0xb94   : > { %5217 = vmatprep.mubr.msk.f32.mxu1 %vm1096_vm6, %v3443_v8 }
 0xb96   : > { %v3436_v25 = vpop.xlane.xlu0 %3435  ;;  %v3412_v56 = vpop.xlane.xlu1 %3411 }
 0xb97   : > { %v3444_v7 = vsel %vm1086_vm5, %v3412_v56, %v3436_v25 }
 0xb98   : > { %5218 = vmatmul.mubr.msk.f32.gmra.mrb[82].mxu1 %vm1096_vm6, %v3444_v7 }
 0xb9a   : > { %v5696_v50 = vpop.permute.xlu0 %5695  ;;  %v5691_v5 = vpop.permute.xlu1 %5690 }
 0xb9b   : > { %v5698_v48 = vunpack.i.h.bf16 %v5696_v50  ;;  %v5697_v46 = vunpack.i.l.bf16 %v5696_v50  ;;  %v5693_v3 = vunpack.i.h.bf16 %v5691_v5  ;;  %v5692_v12 = vunpack.i.l.bf16 %v5691_v5  ;;  %5735 = vrot.lane.b32.xlu1 %v5696_v50, %s7544_s21  ;;  %5730 = vrot.lane.b32.xlu0 %v5691_v5, %s7544_s21 }
 0xb9d   : > { %v7039_v34 = vpack.c.bf16 %v5698_v48, %v5697_v46  ;;  %v7041_v42 = vpack.c.bf16 %v5693_v3, %v5692_v12 }
 0xb9e   : > { %v5711_v55 = vpop.permute.xlu0 %5710  ;;  %v5701_v28 = vpop.permute.xlu1 %5700 }
 0xb9f   : > { %v5713_v29 = vunpack.i.h.bf16 %v5711_v55  ;;  %v5712_v8 = vunpack.i.l.bf16 %v5711_v55  ;;  %v5703_v2 = vunpack.i.h.bf16 %v5701_v28  ;;  %v5702_v32 = vunpack.i.l.bf16 %v5701_v28  ;;  %5740 = vrot.lane.b32.xlu0 %v5701_v28, %s7544_s21  ;;  %v3606_v28 = vld [vmem:[%s7509_s11 + $0x20] sm:$0xff] }
 0xba1   : > { %v5418_v25 = vpack.c.bf16 %v5713_v29, %v5712_v8  ;;  %v7045_v56 = vpack.c.bf16 %v5703_v2, %v5702_v32 }
 0xba2   : > { %v5706_v7 = vpop.permute.xlu1 %5705  ;;  %v5721_v48 = vpop.permute.xlu0 %5720 }
 0xba3   : > { %v5708_v27 = vunpack.i.h.bf16 %v5706_v7  ;;  %v5707_v1 = vunpack.i.l.bf16 %v5706_v7  ;;  %5419 = vmatprep.subr.bf16.mxu0 %v5418_v25  ;;  %v5723_v3 = vunpack.i.h.bf16 %v5721_v48  ;;  %v5722_v12 = vunpack.i.l.bf16 %v5721_v48  ;;  %5745 = vrot.lane.b32.xlu1 %v5706_v7, %s7544_s21  ;;  %v3608_v48 = vld [vmem:[%s7509_s11 + $0x30] sm:$0xff] }
 0xba4   : > { %5421 = vmatpush3.bf16.msra.mxu0 %v5418_v25  ;;  %5750 = vrot.lane.b32.xlu0 %v6487_v9, %s6004_s30  ;;  %v3607_v25 = vld [vmem:[%s7509_s11 + $0x28] sm:$0xff] }
 0xba5   : > { %v7048_v46 = vpack.c.bf16 %v5708_v27, %v5707_v1  ;;  %v5426_v5 = vpack.c.bf16 %v5723_v3, %v5722_v12  ;;  %v5562_v7 = vpack.c.bf16 %v3607_v25, %v3606_v28  ;;  %v3610_v12 = vld [vmem:[%s7509_s11 + $0x40] sm:$0xff] }
 0xba6   : > { %v5716_v55 = vpop.permute.xlu1 %5715 }
 0xba7   : > { %v5718_v38 = vunpack.i.h.bf16 %v5716_v55  ;;  %v5717_v50 = vunpack.i.l.bf16 %v5716_v55  ;;  %5755 = vrot.lane.b32.xlu1 %v6505_v16, %s6004_s30  ;;  %v3609_v55 = vld [vmem:[%s7509_s11 + $0x38] sm:$0xff] }
 0xba8   : > { %5760 = vrot.lane.b32.xlu0 %v6497_v36, %s6004_s30  ;;  %v5566_v3 = vpack.c.bf16 %v3609_v55, %v3608_v48 }
 0xba9   : > { %v5422_v2 = vpack.c.bf16 %v5718_v38, %v5717_v50  ;;  %v3602_v38 = vld [vmem:[%s7509_s11] sm:$0xff]  ;;  %v3611_v50 = vld [vmem:[%s7509_s11 + $0x48] sm:$0xff] }
 0xbaa   : > { %v5726_v32 = vpop.permute.xlu1 %5725 }
 0xbab   : > { %v5728_v29 = vunpack.i.h.bf16 %v5726_v32  ;;  %v5727_v8 = vunpack.i.l.bf16 %v5726_v32  ;;  %5423 = vmatprep.subr.bf16.mxu0 %v5422_v2  ;;  %5765 = vrot.lane.b32.xlu1 %v6517_v4, %s6004_s30  ;;  %v3612_v32 = vld [vmem:[%s7509_s11 + $0x50] sm:$0xff]  ;;  %s4455_s30 = sshll.u32 %s6099_s29, 13  ;;  %s6005_s29 = smov [#allocation2]  }
 0xbac   : > { %5425 = vmatpush3.bf16.msra.mxu0 %v5422_v2  ;;  %5770 = vrot.lane.b32.xlu0 %v6487_v9, %s7544_s21  ;;  %v3603_v9 = vld [vmem:[%s7509_s11 + $0x8] sm:$0xff]  ;;  %v5570_v2 = vpack.c.bf16 %v3611_v50, %v3610_v12  ;;  %s7442_s19 = scalar_lea.hbm %s7511_s13, %s4455_s30 }
 0xbad   : > { %5427 = vmatprep.subr.bf16.mxu0 %v5426_v5  ;;  %v5430_v27 = vpack.c.bf16 %v5728_v29, %v5727_v8  ;;  %v5554_v1 = vpack.c.bf16 %v3603_v9, %v3602_v38  ;;  %v3614_v8 = vld [vmem:[%s7509_s11 + $0x60] sm:$0xff]  ;;  %v3616_v9 = vld [vmem:[%s7509_s11 + $0x70] sm:$0xff] }
 0xbaf   : > { %5775 = vrot.lane.b32.xlu1 %v6505_v16, %s7544_s21  ;;  %5555 = vmatprep.subr.bf16.mxu1 %v5554_v1  ;;  %v3604_v16 = vld [vmem:[%s7509_s11 + $0x10] sm:$0xff] }
 0xbb0   : > { %5429 = vmatpush3.bf16.msra.mxu0 %v5426_v5  ;;  %5780 = vrot.lane.b32.xlu0 %v6497_v36, %s7544_s21  ;;  %v3605_v36 = vld [vmem:[%s7509_s11 + $0x18] sm:$0xff] }
 0xbb1   : > { %5431 = vmatprep.subr.bf16.mxu0 %v5430_v27  ;;  %5557 = vmatpush3.bf16.msra.mxu1 %v5554_v1  ;;  %v3613_v5 = vld [vmem:[%s7509_s11 + $0x58] sm:$0xff] }
 0xbb2   : > { %v5574_v29 = vpack.c.bf16 %v3613_v5, %v3612_v32  ;;  %v3617_v1 = vld [vmem:[%s7509_s11 + $0x78] sm:$0xff] }
 0xbb3   : > { %5785 = vrot.lane.b32.xlu1 %v6517_v4, %s7544_s21  ;;  %v5558_v4 = vpack.c.bf16 %v3605_v36, %v3604_v16  ;;  %v5582_v16 = vpack.c.bf16 %v3617_v1, %v3616_v9 }
 0xbb4   : > { %5433 = vmatpush3.bf16.msra.mxu0 %v5430_v27  ;;  %v3615_v27 = vld [vmem:[%s7509_s11 + $0x68] sm:$0xff] }
 0xbb5   : > { %5559 = vmatprep.subr.bf16.mxu1 %v5558_v4  ;;  %v5578_v38 = vpack.c.bf16 %v3615_v27, %v3614_v8 }
 0xbb6   : > { %5561 = vmatpush3.bf16.msra.mxu1 %v5558_v4 }
 0xbb7   : > { %5563 = vmatprep.subr.bf16.mxu1 %v5562_v7 }
 0xbba   : > { %5565 = vmatpush3.bf16.msra.mxu1 %v5562_v7 }
 0xbbb   : > { %5567 = vmatprep.subr.bf16.mxu1 %v5566_v3 }
 0xbbe   : > { %5569 = vmatpush3.bf16.msra.mxu1 %v5566_v3 }
 0xbbf   : > { %5571 = vmatprep.subr.bf16.mxu1 %v5570_v2 }
 0xbc2   : > { %5573 = vmatpush3.bf16.msra.mxu1 %v5570_v2 }
 0xbc3   : > { %5575 = vmatprep.subr.bf16.mxu1 %v5574_v29 }
 0xbc6   : > { %5577 = vmatpush3.bf16.msra.mxu1 %v5574_v29 }
 0xbc7   : > { %5579 = vmatprep.subr.bf16.mxu1 %v5578_v38 }
 0xbca   : > { %5581 = vmatpush3.bf16.msra.mxu1 %v5578_v38 }
 0xbcb   : > { %5583 = vmatprep.subr.bf16.mxu1 %v5582_v16 }
 0xbce   : > { %5585 = vmatpush3.bf16.msra.mxu1 %v5582_v16 }
 0xc0d   : > { %v5736_v36 = vpop.permute.xlu1 %5735  ;;  %v5731_v4 = vpop.permute.xlu0 %5730 }
 0xc0e   : > { %v5738_v28 = vunpack.i.h.bf16 %v5736_v36  ;;  %v5737_v25 = vunpack.i.l.bf16 %v5736_v36  ;;  %v5733_v7 = vunpack.i.h.bf16 %v5731_v4  ;;  %v5732_v48 = vunpack.i.l.bf16 %v5731_v4 }
 0xc10   : > { %v5434_v55 = vpack.c.bf16 %v5733_v7, %v5732_v48  ;;  %v5438_v12 = vpack.c.bf16 %v5738_v28, %v5737_v25 }
 0xc11   : > { %v5741_v3 = vpop.permute.xlu0 %5740 }
 0xc12   : > { %v5743_v50 = vunpack.i.h.bf16 %v5741_v3  ;;  %v5742_v2 = vunpack.i.l.bf16 %v5741_v3  ;;  %5435 = vmatprep.subr.bf16.mxu0 %v5434_v55 }
 0xc13   : > { %5437 = vmatpush3.bf16.msra.mxu0 %v5434_v55 }
 0xc14   : > { %5439 = vmatprep.subr.bf16.mxu0 %v5438_v12  ;;  %v5442_v32 = vpack.c.bf16 %v5743_v50, %v5742_v2 }
 0xc15   : > { %v5746_v5 = vpop.permute.xlu1 %5745 }
 0xc16   : > { %v5751_v29 = vpop.permute.xlu0 %5750  ;;  %v5748_v8 = vunpack.i.h.bf16 %v5746_v5  ;;  %v5747_v27 = vunpack.i.l.bf16 %v5746_v5 }
 0xc17   : > { %v5753_v38 = vunpack.i.h.bf16 %v5751_v29  ;;  %v5752_v9 = vunpack.i.l.bf16 %v5751_v29  ;;  %5441 = vmatpush3.bf16.msra.mxu0 %v5438_v12  ;;  %5790 = vrot.lane.b32.xlu0 %v5751_v29, %s7544_s21 }
 0xc18   : > { %5443 = vmatprep.subr.bf16.mxu0 %v5442_v32  ;;  %v5446_v36 = vpack.c.bf16 %v5748_v8, %v5747_v27 }
 0xc19   : > { %v7115_v1 = vpack.c.bf16 %v5753_v38, %v5752_v9  ;;  %v5756_v16 = vpop.permute.xlu1 %5755 }
 0xc1a   : > { %v5758_v4 = vunpack.i.h.bf16 %v5756_v16  ;;  %v5757_v28 = vunpack.i.l.bf16 %v5756_v16  ;;  %v5761_v25 = vpop.permute.xlu0 %5760  ;;  %5795 = vrot.lane.b32.xlu1 %v5756_v16, %s7544_s21 }
 0xc1b   : > { %v5763_v7 = vunpack.i.h.bf16 %v5761_v25  ;;  %v5762_v48 = vunpack.i.l.bf16 %v5761_v25  ;;  %5445 = vmatpush3.bf16.msra.mxu0 %v5442_v32  ;;  %5800 = vrot.lane.b32.xlu0 %v5761_v25, %s7544_s21 }
 0xc1c   : > { %v7118_v55 = vpack.c.bf16 %v5758_v4, %v5757_v28  ;;  %5447 = vmatprep.subr.bf16.mxu0 %v5446_v36 }
 0xc1d   : > { %v7120_v3 = vpack.c.bf16 %v5763_v7, %v5762_v48  ;;  %v5766_v50 = vpop.permute.xlu1 %5765 }
 0xc1e   : > { %v5768_v12 = vunpack.i.h.bf16 %v5766_v50  ;;  %v5767_v2 = vunpack.i.l.bf16 %v5766_v50  ;;  %5805 = vrot.lane.b32.xlu1 %v5766_v50, %s7544_s21  ;;  %v5771_v29 = vpop.permute.xlu0 %5770 }
 0xc1f   : > { %5449 = vmatpush3.bf16.msra.mxu0 %v5446_v36  ;;  %1536 = vrot.lane.b32.xlu0 %v6572_v20, %s7544_s21 }
 0xc20   : > { %v7124_v5 = vpack.c.bf16 %v5768_v12, %v5767_v2  ;;  %5451 = vmatprep.subr.bf16.mxu0 %v6499_v41 }
 0xc21   : > { %v7260_v8 = vpop.permute.xlu1 %5775 }
 0xc22   : > { %5003 = vmatmul.mubr.f32.vlgmr.msra.gmra.mrb[40].mxu0 %v6823_v35  ;;  %1538 = vrot.lane.b32.xlu1 %v6569_v19, %s7544_s21  ;;  %v7262_v27 = vpop.permute.xlu0 %5780 }
 0xc23   : > { %5005 = vmatprep.mubr.f32.mxu0 %v6851_v45  ;;  %5453 = vmatpush3.bf16.msra.mxu0 %v6499_v41  ;;  %v5890_v41 = vpop.eup %5889 }
 0xc24   : > { %5455 = vmatprep.subr.bf16.mxu0 %v6507_v52  ;;  %1540 = vrot.lane.b32.xlu0 %v6586_v51, %s7544_s21 }
 0xc25   : > { %v7264_v38 = vpop.permute.xlu1 %5785 }
 0xc26   : > { %5006 = vmatmul.mubr.f32.gmra.mrb[42].mxu0 %v6848_v49  ;;  %1542 = vrot.lane.b32.xlu1 %v6583_v13, %s7544_s21 }
 0xc27   : > { %5008 = vmatprep.mubr.f32.mxu0 %v6865_v21  ;;  %5457 = vmatpush3.bf16.msra.mxu0 %v6507_v52 }
 0xc28   : > { %5459 = vmatprep.subr.bf16.mxu0 %v6511_v14  ;;  %1544 = vrot.lane.b32.xlu0 %v6598_v53, %s7544_s21 }
 0xc2a   : > { %5009 = vmatmul.mubr.f32.gmra.mrb[44].mxu0 %v6862_v24  ;;  %1546 = vrot.lane.b32.xlu1 %v6595_v26, %s7544_s21 }
 0xc2b   : > { %5011 = vmatprep.mubr.f32.mxu0 %v6877_v11  ;;  %5461 = vmatpush3.bf16.msra.mxu0 %v6511_v14 }
 0xc2c   : > { %5463 = vmatprep.subr.bf16.mxu0 %v6519_v23  ;;  %1548 = vrot.lane.b32.xlu0 %v6610_v18, %s7544_s21 }
 0xc2e   : > { %5012 = vmatmul.mubr.f32.gmra.mrb[46].mxu0 %v6874_v40  ;;  %1550 = vrot.lane.b32.xlu1 %v6607_v30, %s7544_s21 }
 0xc2f   : > { %5046 = vmatprep.mubr.f32.mxu0 %v6572_v20  ;;  %5465 = vmatpush3.bf16.msra.mxu0 %v6519_v23 }
 0xc30   : > { %5467 = vmatprep.subr.bf16.mxu0 %v7041_v42  ;;  %2206 = vrot.lane.b32.xlu0 %v6827_v54, %s7544_s21 }
 0xc32   : > { %2208 = vrot.lane.b32.xlu1 %v6823_v35, %s7544_s21  ;;  %v7546_v35 = vld [vmem:[#allocation10_spill] sm:$0xff] }
 0xc33   : > { %5469 = vmatpush3.bf16.msra.mxu0 %v7041_v42 }
 0xc34   : > { %5471 = vmatprep.subr.bf16.mxu0 %v7039_v34  ;;  %2210 = vrot.lane.b32.xlu0 %v6851_v45, %s7544_s21 }
 0xc36   : > { %2212 = vrot.lane.b32.xlu1 %v6848_v49, %s7544_s21 }
 0xc37   : > { %5473 = vmatpush3.bf16.msra.mxu0 %v7039_v34 }
 0xc38   : > { %5475 = vmatprep.subr.bf16.mxu0 %v7045_v56  ;;  %2214 = vrot.lane.b32.xlu0 %v6865_v21, %s7544_s21 }
 0xc3a   : > { %2216 = vrot.lane.b32.xlu1 %v6862_v24, %s7544_s21 }
 0xc3b   : > { %5477 = vmatpush3.bf16.msra.mxu0 %v7045_v56 }
 0xc3c   : > { %5479 = vmatprep.subr.bf16.mxu0 %v7048_v46  ;;  %2218 = vrot.lane.b32.xlu0 %v6877_v11, %s7544_s21  ;;  %v7547_v11 = vld [vmem:[#allocation11_spill] sm:$0xff] }
 0xc3e   : > { %2220 = vrot.lane.b32.xlu1 %v6874_v40, %s7544_s21 }
 0xc3f   : > { %5481 = vmatpush3.bf16.msra.mxu0 %v7048_v46 }
 0xc40   : > { %5132 = vmatprep.subr.msk.mxu0 %vm1121_vm4, %v6781_v33 }
 0xc42   : > { %5047 = vmatmul.mubr.f32.vlgmr.msra.gmra.mrb[40].mxu0 %v6569_v19  ;;  %v5892_v19 = vpop.eup %5891 }
 0xc43   : > { %5049 = vmatprep.mubr.f32.mxu0 %v6586_v51  ;;  %5133 = vmatpush3.msk.msra.mxu0 %vm1121_vm4, %v6781_v33 }
 0xc44   : > { %5519 = vmatprep.subr.bf16.mxu0 %v6501_v43 }
 0xc46   : > { %5050 = vmatmul.mubr.f32.gmra.mrb[42].mxu0 %v6583_v13  ;;  %v5894_v13 = vpop.eup %5893 }
 0xc47   : > { %5052 = vmatprep.mubr.f32.mxu0 %v6598_v53  ;;  %v7545_v53 = vld [vmem:[#allocation9_spill] sm:$0xff] }
 0xc4a   : > { %5053 = vmatmul.mubr.f32.gmra.mrb[44].mxu0 %v6595_v26 }
 0xc4b   : > { %5055 = vmatprep.mubr.f32.mxu0 %v6610_v18 }
 0xc4e   : > { %5056 = vmatmul.mubr.f32.gmra.mrb[46].mxu0 %v6607_v30  ;;  %v5896_v30 = vpop.eup %5895 }
 0xc4f   : > { %5134 = vmatprep.mubr.msk.f32.mxu0 %vm1096_vm6, %v5890_v41  ;;  %v5898_v18 = vpop.eup %5897 }
 0xc50   : > { %v5900_v49 = vpop.eup %5899 }
 0xc51   : > { %v5902_v24 = vpop.eup %5901 }
 0xc52   : > { %5135 = vmatmul.mubr.msk.f32.vlgmr.msra.gmra.mrb[48].mxu0 %vm1096_vm6, %v5892_v19  ;;  %v5904_v34 = vpop.eup %5903 }
 0xc53   : > { %5521 = vmatpush3.bf16.msra.mxu0 %v6501_v43  ;;  %5137 = vmatprep.mubr.msk.f32.mxu0 %vm1096_vm6, %v5894_v13  ;;  %v5773_v13 = vunpack.i.h.bf16 %v5771_v29 }
 0xc54   : > { %v5210_v52 = vpop.f32.mrb[76].mxu1  ;;  %5523 = vmatprep.subr.bf16.mxu0 %v7545_v53 }
 0xc55   : > { %v3579_v14 = vsub.f32 %v6959_v10, %v5210_v52  ;;  %v3539_v23 = vpop.f32.mrb[77].mxu1 }
 0xc56   : > { %v3578_v20 = vsub.f32 %v6961_v37, %v3539_v23  ;;  %5138 = vmatmul.mubr.msk.f32.gmra.mrb[50].mxu0 %vm1096_vm6, %v5896_v30  ;;  %v7548_v30 = vld [vmem:[#allocation12_spill] sm:$0xff] }
 0xc57   : > { %v3588_v51 = vmul.f32 1.442695, %v3579_v14  ;;  %5525 = vmatpush3.bf16.msra.mxu0 %v7545_v53  ;;  %5140 = vmatprep.mubr.msk.f32.mxu0 %vm1096_vm6, %v5898_v18 }
 0xc58   : > { %v3586_v26 = vmul.f32 1.442695, %v3578_v20  ;;  %5527 = vmatprep.subr.bf16.mxu0 %v7546_v35 }
 0xc5a   : > { %5905 = vpow2.f32 %v3586_v26  ;;  %5141 = vmatmul.mubr.msk.f32.gmra.mrb[52].mxu0 %vm1096_vm6, %v5900_v49 }
 0xc5b   : > { %5907 = vpow2.f32 %v3588_v51  ;;  %5529 = vmatpush3.bf16.msra.mxu0 %v7546_v35  ;;  %5143 = vmatprep.mubr.msk.f32.mxu0 %vm1096_vm6, %v5902_v24  ;;  %v5772_v51 = vunpack.i.l.bf16 %v5771_v29 }
 0xc5c   : > { %v5213_v33 = vpop.f32.mrb[78].mxu1  ;;  %5531 = vmatprep.subr.bf16.mxu0 %v7547_v11 }
 0xc5d   : > { %v3581_v54 = vsub.f32 %v6967_v6, %v5213_v33  ;;  %v3549_v43 = vpop.f32.mrb[79].mxu1  ;;  %v5586_v35 = vpack.c.bf16 %v5773_v13, %v5772_v51 }
 0xc5e   : > { %v3580_v45 = vsub.f32 %v6969_v31, %v3549_v43  ;;  %5144 = vmatmul.mubr.msk.f32.gmra.mrb[54].mxu0 %vm1096_vm6, %v5904_v34  ;;  %v7552_v34 = vld [vmem:[#allocation15_spill] sm:$0xff] }
 0xc5f   : > { %v3592_v21 = vmul.f32 1.442695, %v3581_v54  ;;  %5533 = vmatpush3.bf16.msra.mxu0 %v7547_v11  ;;  %v7549_v54 = vld [vmem:[#allocation14_spill] sm:$0xff] }
 0xc60   : > { %v3590_v40 = vmul.f32 1.442695, %v3580_v45  ;;  %5535 = vmatprep.subr.bf16.mxu0 %v7115_v1 }
 0xc62   : > { %5909 = vpow2.f32 %v3590_v40 }
 0xc63   : > { %5911 = vpow2.f32 %v3592_v21  ;;  %5537 = vmatpush3.bf16.msra.mxu0 %v7115_v1  ;;  %v7551_v21 = vld [vmem:[#allocation16_spill] sm:$0xff] }
 0xc64   : > { %v7221_v58 = vpop.eup %5905  ;;  %v5216_v59 = vpop.f32.mrb[80].mxu1  ;;  %5539 = vmatprep.subr.bf16.mxu0 %v7118_v55 }
 0xc65   : > { %v7224_v60 = vpop.eup %5907  ;;  %v3583_v61 = vsub.f32 %v6975_v47, %v5216_v59  ;;  %v3559_v62 = vpop.f32.mrb[81].mxu1  ;;  %5252 = vmatprep.mubr.f32.mxu1 %v7221_v58 }
 0xc66   : > { %v3582_v63 = vsub.f32 %v6977_v44, %v3559_v62  ;;  %5253 = vmatmul.mubr.f32.vlgmr.msra.gmra.mrb[84].mxu1 %v7224_v60 }
 0xc67   : > { %v3596_v0 = vmul.f32 1.442695, %v3583_v61  ;;  %5541 = vmatpush3.bf16.msra.mxu0 %v7118_v55  ;;  %v7553_v61 = vld [vmem:[#allocation18_spill] sm:$0xff] }
 0xc68   : > { %v3594_v39 = vmul.f32 1.442695, %v3582_v63  ;;  %5543 = vmatprep.subr.bf16.mxu0 %v7120_v3 }
 0xc6a   : > { %5913 = vpow2.f32 %v3594_v39 }
 0xc6b   : > { %5915 = vpow2.f32 %v3596_v0  ;;  %v5219_v10 = vpop.f32.mrb[82].mxu1  ;;  %5545 = vmatpush3.bf16.msra.mxu0 %v7120_v3  ;;  %v7554_v0 = vld [vmem:[#allocation17_spill] sm:$0xff] }
 0xc6c   : > { %v7233_v37 = vpop.eup %5909  ;;  %v3585_v6 = vsub.f32 %v6983_v17, %v5219_v10  ;;  %v3569_v31 = vpop.f32.mrb[83].mxu1  ;;  %5547 = vmatprep.subr.bf16.mxu0 %v7124_v5 }
 0xc6d   : > { %v7237_v47 = vpop.eup %5911  ;;  %v3584_v44 = vsub.f32 %v6985_v22, %v3569_v31  ;;  %5255 = vmatprep.mubr.f32.mxu1 %v7233_v37 }
 0xc6e   : > { %v3600_v42 = vmul.f32 1.442695, %v3585_v6  ;;  %5256 = vmatmul.mubr.f32.gmra.mrb[86].mxu1 %v7237_v47 }
 0xc6f   : > { %v3598_v56 = vmul.f32 1.442695, %v3584_v44  ;;  %5549 = vmatpush3.bf16.msra.mxu0 %v7124_v5 }
 0xc70   : > { %5264 = vmatprep.subr.msk.mxu0 %vm1121_vm4, %v6937_v57 }
 0xc71   : > { %5917 = vpow2.f32 %v3598_v56  ;;  %v5777_v56 = vunpack.i.l.bf16 %v7260_v8 }
 0xc72   : > { %5919 = vpow2.f32 %v3600_v42  ;;  %v5778_v42 = vunpack.i.h.bf16 %v7260_v8  ;;  %v5788_v8 = vunpack.i.h.bf16 %v7264_v38 }
 0xc74   : > { %v7245_v17 = vpop.eup %5913 }
 0xc75   : > { %v7248_v46 = vpop.eup %5915  ;;  %5258 = vmatprep.mubr.f32.mxu1 %v7245_v17 }
 0xc76   : > { %5259 = vmatmul.mubr.f32.gmra.mrb[88].mxu1 %v7248_v46 }
 0xc7b   : > { %v7254_v22 = vpop.eup %5917 }
 0xc7c   : > { %v7256_v32 = vpop.eup %5919  ;;  %5261 = vmatprep.mubr.f32.mxu1 %v7254_v22 }
 0xc7d   : > { %5262 = vmatmul.mubr.f32.gmra.mrb[90].mxu1 %v7256_v32 }
 0xc89   : > { %v7266_v9 = vpop.permute.xlu0 %5790 }
 0xc8c   : > { %v7268_v1 = vpop.permute.xlu1 %5795 }
 0xc8d   : > { %v7270_v16 = vpop.permute.xlu0 %5800 }
 0xc8e   : > { %v5803_v51 = vunpack.i.h.bf16 %v7270_v16 }
 0xc90   : > { %v7272_v36 = vpop.permute.xlu1 %5805 }
 0xc91   : > { %v1537_v4 = vpop.permute.xlu0 %1536 }
 0xc92   : > { %4313 = vst.msk [vmem:[%s6574_s17 + $0x40] sm:$0xff] %vm900_vm1, %v1537_v4 }
 0xc94   : > { %v1539_v28 = vpop.permute.xlu1 %1538 }
 0xc95   : > { %4314 = vst.msk [vmem:[%s6574_s17 + $0x48] sm:$0xff] %vm900_vm1, %v1539_v28  ;;  %v5590_v28 = vpack.c.bf16 %v5778_v42, %v5777_v56 }
 0xc96   : > { %v1541_v25 = vpop.permute.xlu0 %1540 }
 0xc97   : > { %4315 = vst.msk [vmem:[%s6574_s17 + $0x50] sm:$0xff] %vm900_vm1, %v1541_v25  ;;  %v5783_v25 = vunpack.i.h.bf16 %v7262_v27 }
 0xc98   : > { %v1543_v7 = vpop.permute.xlu1 %1542 }
 0xc99   : > { %4316 = vst.msk [vmem:[%s6574_s17 + $0x58] sm:$0xff] %vm900_vm1, %v1543_v7  ;;  %v5782_v7 = vunpack.i.l.bf16 %v7262_v27 }
 0xc9a   : > { %v1545_v48 = vpop.permute.xlu0 %1544 }
 0xc9b   : > { %4317 = vst.msk [vmem:[%s6574_s17 + $0x60] sm:$0xff] %vm900_vm1, %v1545_v48 }
 0xc9c   : > { %v1547_v55 = vpop.permute.xlu1 %1546 }
 0xc9d   : > { %4318 = vst.msk [vmem:[%s6574_s17 + $0x68] sm:$0xff] %vm900_vm1, %v1547_v55 }
 0xc9e   : > { %v1549_v3 = vpop.permute.xlu0 %1548 }
 0xc9f   : > { %4319 = vst.msk [vmem:[%s6574_s17 + $0x70] sm:$0xff] %vm900_vm1, %v1549_v3  ;;  %v5594_v3 = vpack.c.bf16 %v5783_v25, %v5782_v7 }
 0xca0   : > { %v1551_v50 = vpop.permute.xlu1 %1550 }
 0xca1   : > { %4320 = vst.msk [vmem:[%s6574_s17 + $0x78] sm:$0xff] %vm900_vm1, %v1551_v50  ;;  %v5787_v50 = vunpack.i.l.bf16 %v7264_v38 }
 0xca2   : > { %v2207_v12 = vpop.permute.xlu0 %2206 }
 0xca3   : > { %4355 = vst.msk [vmem:[%s6574_s17 + $0xc0] sm:$0xff] %vm900_vm1, %v2207_v12  ;;  %v5598_v27 = vpack.c.bf16 %v5788_v8, %v5787_v50 }
 0xca4   : > { %v2209_v2 = vpop.permute.xlu1 %2208 }
 0xca5   : > { %4356 = vst.msk [vmem:[%s6574_s17 + $0xc8] sm:$0xff] %vm900_vm1, %v2209_v2 }
 0xca6   : > { %v2211_v5 = vpop.permute.xlu0 %2210 }
 0xca7   : > { %4357 = vst.msk [vmem:[%s6574_s17 + $0xd0] sm:$0xff] %vm900_vm1, %v2211_v5  ;;  %v5793_v5 = vunpack.i.h.bf16 %v7266_v9 }
 0xca8   : > { %v2213_v41 = vpop.permute.xlu1 %2212 }
 0xca9   : > { %4358 = vst.msk [vmem:[%s6574_s17 + $0xd8] sm:$0xff] %vm900_vm1, %v2213_v41  ;;  %v5792_v41 = vunpack.i.l.bf16 %v7266_v9 }
 0xcaa   : > { %v2215_v52 = vpop.permute.xlu0 %2214 }
 0xcab   : > { %4359 = vst.msk [vmem:[%s6574_s17 + $0xe0] sm:$0xff] %vm900_vm1, %v2215_v52  ;;  %v5602_v38 = vpack.c.bf16 %v5793_v5, %v5792_v41 }
 0xcac   : > { %v2217_v14 = vpop.permute.xlu1 %2216 }
 0xcad   : > { %4360 = vst.msk [vmem:[%s6574_s17 + $0xe8] sm:$0xff] %vm900_vm1, %v2217_v14 }
 0xcae   : > { %v2219_v23 = vpop.permute.xlu0 %2218 }
 0xcaf   : > { %4361 = vst.msk [vmem:[%s6574_s17 + $0xf0] sm:$0xff] %vm900_vm1, %v2219_v23  ;;  %v5798_v23 = vunpack.i.h.bf16 %v7268_v1 }
 0xcb0   : > { %v2221_v19 = vpop.permute.xlu1 %2220 }
 0xcb1   : > { %4362 = vst.msk [vmem:[%s6574_s17 + $0xf8] sm:$0xff] %vm900_vm1, %v2221_v19  ;;  %v5797_v19 = vunpack.i.l.bf16 %v7268_v1  ;;  %v5808_v1 = vunpack.i.h.bf16 %v7272_v36 }
 0xcb3   : > { %v5606_v9 = vpack.c.bf16 %v5798_v23, %v5797_v19 }
 0xd25   : > { %v5136_v20 = vpop.f32.mrb[48].mxu0 }
 0xd26   : > { %v3078_v26 = vmul.f32 %v6889_v15, %v5136_v20  ;;  %v3038_v53 = vpop.f32.mrb[49].mxu0  ;;  %v7550_v15 = vld [vmem:[#allocation13_spill] sm:$0xff] }
 0xd27   : > { %v3077_v18 = vmul.f32 %v7548_v30, %v3038_v53  ;;  %v5807_v30 = vunpack.i.l.bf16 %v7272_v36 }
 0xd28   : > { %4390 = vst.msk [vmem:[%s6574_s17 + $0x108] sm:$0xff] %vm900_vm1, %v3078_v26  ;;  %3104 = vrot.lane.b32.xlu1 %v3078_v26, %s7544_s21 }
 0xd29   : > { %4389 = vst.msk [vmem:[%s6574_s17 + $0x100] sm:$0xff] %vm900_vm1, %v3077_v18  ;;  %3102 = vrot.lane.b32.xlu0 %v3077_v18, %s7544_s21  ;;  %v5139_v33 = vpop.f32.mrb[50].mxu0  ;;  %5178 = vmatprep.mubr.f32.mxu0 %v3077_v18 }
 0xd2a   : > { %v3080_v43 = vmul.f32 %v7549_v54, %v5139_v33  ;;  %v3048_v49 = vpop.f32.mrb[51].mxu0  ;;  %5179 = vmatmul.mubr.f32.vlgmr.msra.gmra.mrb[40].mxu0 %v3078_v26  ;;  %v5802_v26 = vunpack.i.l.bf16 %v7270_v16  ;;  %v5614_v16 = vpack.c.bf16 %v5808_v1, %v5807_v30 }
 0xd2b   : > { %v3079_v45 = vmul.f32 %v7550_v15, %v3048_v49  ;;  %5265 = vmatpush3.msk.msra.mxu0 %vm1121_vm4, %v6937_v57 }
 0xd2c   : > { %4392 = vst.msk [vmem:[%s6574_s17 + $0x118] sm:$0xff] %vm900_vm1, %v3080_v43  ;;  %5587 = vmatprep.subr.bf16.mxu0 %v5586_v35  ;;  %3108 = vrot.lane.b32.xlu1 %v3080_v43, %s7544_s21  ;;  %v5610_v53 = vpack.c.bf16 %v5803_v51, %v5802_v26 }
 0xd2d   : > { %4391 = vst.msk [vmem:[%s6574_s17 + $0x110] sm:$0xff] %vm900_vm1, %v3079_v45  ;;  %3106 = vrot.lane.b32.xlu0 %v3079_v45, %s7544_s21  ;;  %v5142_v24 = vpop.f32.mrb[52].mxu0  ;;  %5181 = vmatprep.mubr.f32.mxu0 %v3079_v45 }
 0xd2e   : > { %v3082_v40 = vmul.f32 %v7551_v21, %v5142_v24  ;;  %v3058_v11 = vpop.f32.mrb[53].mxu0  ;;  %5182 = vmatmul.mubr.f32.gmra.mrb[42].mxu0 %v3080_v43 }
 0xd2f   : > { %v3081_v59 = vmul.f32 %v7552_v34, %v3058_v11 }
 0xd30   : > { %4394 = vst.msk [vmem:[%s6574_s17 + $0x128] sm:$0xff] %vm900_vm1, %v3082_v40  ;;  %3112 = vrot.lane.b32.xlu1 %v3082_v40, %s7544_s21 }
 0xd31   : > { %4393 = vst.msk [vmem:[%s6574_s17 + $0x120] sm:$0xff] %vm900_vm1, %v3081_v59  ;;  %3110 = vrot.lane.b32.xlu0 %v3081_v59, %s7544_s21  ;;  %v5145_v57 = vpop.f32.mrb[54].mxu0  ;;  %5184 = vmatprep.mubr.f32.mxu0 %v3081_v59 }
 0xd32   : > { %v3084_v62 = vmul.f32 %v7553_v61, %v5145_v57  ;;  %v3068_v63 = vpop.f32.mrb[55].mxu0  ;;  %5185 = vmatmul.mubr.f32.gmra.mrb[44].mxu0 %v3082_v40 }
 0xd33   : > { %v3083_v39 = vmul.f32 %v7554_v0, %v3068_v63 }
 0xd34   : > { %4396 = vst.msk [vmem:[%s6574_s17 + $0x138] sm:$0xff] %vm900_vm1, %v3084_v62  ;;  %3116 = vrot.lane.b32.xlu1 %v3084_v62, %s7544_s21 }
 0xd35   : > { %4395 = vst.msk [vmem:[%s6574_s17 + $0x130] sm:$0xff] %vm900_vm1, %v3083_v39  ;;  %3114 = vrot.lane.b32.xlu0 %v3083_v39, %s7544_s21  ;;  %5187 = vmatprep.mubr.f32.mxu0 %v3083_v39 }
 0xd36   : > { %5188 = vmatmul.mubr.f32.gmra.mrb[46].mxu0 %v3084_v62 }
 0xd39   : > { %v5254_v10 = vpop.f32.mrb[84].mxu1 }
 0xd3a   : > { %v3684_v6 = vpop.f32.mrb[85].mxu1 }
 0xd3b   : > { %5921 = vrcp.f32 %v3684_v6 }
 0xd3c   : > { %5923 = vrcp.f32 %v5254_v10 }
 0xd41   : > { %v5257_v31 = vpop.f32.mrb[86].mxu1 }
 0xd42   : > { %v3694_v44 = vpop.f32.mrb[87].mxu1 }
 0xd43   : > { %5925 = vrcp.f32 %v3694_v44 }
 0xd44   : > { %5927 = vrcp.f32 %v5257_v31 }
 0xd45   : > { %v5922_v29 = vpop.eup %5921 }
 0xd46   : > { %v5924_v4 = vpop.eup %5923  ;;  %5266 = vmatprep.mubr.msk.f32.mxu0 %vm1096_vm6, %v5922_v29 }
 0xd47   : > { %5267 = vmatmul.mubr.msk.f32.vlgmr.msra.gmra.mrb[56].mxu0 %vm1096_vm6, %v5924_v4 }
 0xd48   : > { %5589 = vmatpush3.bf16.msra.mxu0 %v5586_v35 }
 0xd49   : > { %5591 = vmatprep.subr.bf16.mxu0 %v5590_v28  ;;  %v5260_v48 = vpop.f32.mrb[88].mxu1 }
 0xd4a   : > { %v3704_v55 = vpop.f32.mrb[89].mxu1 }
 0xd4b   : > { %5929 = vrcp.f32 %v3704_v55 }
 0xd4c   : > { %5931 = vrcp.f32 %v5260_v48  ;;  %5593 = vmatpush3.bf16.msra.mxu0 %v5590_v28 }
 0xd4d   : > { %v5926_v12 = vpop.eup %5925  ;;  %5595 = vmatprep.subr.bf16.mxu0 %v5594_v3 }
 0xd4e   : > { %v5928_v2 = vpop.eup %5927  ;;  %5269 = vmatprep.mubr.msk.f32.mxu0 %vm1096_vm6, %v5926_v12 }
 0xd4f   : > { %5270 = vmatmul.mubr.msk.f32.gmra.mrb[58].mxu0 %vm1096_vm6, %v5928_v2 }
 0xd50   : > { %5597 = vmatpush3.bf16.msra.mxu0 %v5594_v3  ;;  %v5263_v52 = vpop.f32.mrb[90].mxu1 }
 0xd51   : > { %5599 = vmatprep.subr.bf16.mxu0 %v5598_v27  ;;  %v3714_v14 = vpop.f32.mrb[91].mxu1 }
 0xd52   : > { %5933 = vrcp.f32 %v3714_v14 }
 0xd53   : > { %5935 = vrcp.f32 %v5263_v52 }
 0xd54   : > { %5601 = vmatpush3.bf16.msra.mxu0 %v5598_v27 }
 0xd55   : > { %v5930_v20 = vpop.eup %5929  ;;  %5603 = vmatprep.subr.bf16.mxu0 %v5602_v38 }
 0xd56   : > { %v5932_v13 = vpop.eup %5931  ;;  %5272 = vmatprep.mubr.msk.f32.mxu0 %vm1096_vm6, %v5930_v20 }
 0xd57   : > { %5273 = vmatmul.mubr.msk.f32.gmra.mrb[60].mxu0 %vm1096_vm6, %v5932_v13 }
 0xd58   : > { %5605 = vmatpush3.bf16.msra.mxu0 %v5602_v38 }
 0xd59   : > { %5607 = vmatprep.subr.bf16.mxu0 %v5606_v9 }
 0xd5c   : > { %v5934_v18 = vpop.eup %5933  ;;  %5609 = vmatpush3.bf16.msra.mxu0 %v5606_v9 }
 0xd5d   : > { %v5936_v33 = vpop.eup %5935  ;;  %5611 = vmatprep.subr.bf16.mxu0 %v5610_v53  ;;  %5275 = vmatprep.mubr.msk.f32.mxu0 %vm1096_vm6, %v5934_v18 }
 0xd5e   : > { %5276 = vmatmul.mubr.msk.f32.gmra.mrb[62].mxu0 %vm1096_vm6, %v5936_v33 }
 0xd60   : > { %5613 = vmatpush3.bf16.msra.mxu0 %v5610_v53 }
 0xd61   : > { %5615 = vmatprep.subr.bf16.mxu0 %v5614_v16 }
 0xd64   : > { %5617 = vmatpush3.bf16.msra.mxu0 %v5614_v16 }
 0xd9a   : > { %v3105_v35 = vpop.permute.xlu1 %3104 }
 0xd9b   : > { %4398 = vst.msk [vmem:[%s6574_s17 + $0x148] sm:$0xff] %vm900_vm1, %v3105_v35  ;;  %v3103_v36 = vpop.permute.xlu0 %3102 }
 0xd9c   : > { %4397 = vst.msk [vmem:[%s6574_s17 + $0x140] sm:$0xff] %vm900_vm1, %v3103_v36 }
 0xd9e   : > { %v3109_v54 = vpop.permute.xlu1 %3108 }
 0xd9f   : > { %4400 = vst.msk [vmem:[%s6574_s17 + $0x158] sm:$0xff] %vm900_vm1, %v3109_v54  ;;  %v3107_v43 = vpop.permute.xlu0 %3106 }
 0xda0   : > { %4399 = vst.msk [vmem:[%s6574_s17 + $0x150] sm:$0xff] %vm900_vm1, %v3107_v43 }
 0xda2   : > { %v3113_v49 = vpop.permute.xlu1 %3112 }
 0xda3   : > { %4402 = vst.msk [vmem:[%s6574_s17 + $0x168] sm:$0xff] %vm900_vm1, %v3113_v49  ;;  %v3111_v15 = vpop.permute.xlu0 %3110 }
 0xda4   : > { %4401 = vst.msk [vmem:[%s6574_s17 + $0x160] sm:$0xff] %vm900_vm1, %v3111_v15 }
 0xda6   : > { %v3117_v45 = vpop.permute.xlu1 %3116 }
 0xda7   : > { %4404 = vst.msk [vmem:[%s6574_s17 + $0x178] sm:$0xff] %vm900_vm1, %v3117_v45  ;;  %v3115_v24 = vpop.permute.xlu0 %3114 }
 0xda8   : > { %4403 = vst.msk [vmem:[%s6574_s17 + $0x170] sm:$0xff] %vm900_vm1, %v3115_v24 }
 0xe1a   : > { %v5268_v21 = vpop.f32.mrb[56].mxu0 }
 0xe1b   : > { %v3861_v40 = vmul.f32 %v7224_v60, %v5268_v21  ;;  %v3821_v11 = vpop.f32.mrb[57].mxu0 }
 0xe1c   : > { %v3860_v34 = vmul.f32 %v7221_v58, %v3821_v11 }
 0xe1d   : > { %4432 = vst.msk [vmem:[%s6574_s17 + $0x188] sm:$0xff] %vm900_vm1, %v3861_v40  ;;  %3887 = vrot.lane.b32.xlu1 %v3861_v40, %s7544_s21 }
 0xe1e   : > { %4431 = vst.msk [vmem:[%s6574_s17 + $0x180] sm:$0xff] %vm900_vm1, %v3860_v34  ;;  %3885 = vrot.lane.b32.xlu0 %v3860_v34, %s7544_s21  ;;  %5310 = vmatprep.mubr.f32.mxu0 %v3860_v34 }
 0xe1f   : > { %5311 = vmatmul.mubr.f32.vlgmr.msra.gmra.mrb[40].mxu0 %v3861_v40 }
 0xe22   : > { %v5271_v59 = vpop.f32.mrb[58].mxu0 }
 0xe23   : > { %v3863_v57 = vmul.f32 %v7237_v47, %v5271_v59  ;;  %v3831_v61 = vpop.f32.mrb[59].mxu0 }
 0xe24   : > { %v3862_v60 = vmul.f32 %v7233_v37, %v3831_v61 }
 0xe25   : > { %4434 = vst.msk [vmem:[%s6574_s17 + $0x198] sm:$0xff] %vm900_vm1, %v3863_v57  ;;  %3891 = vrot.lane.b32.xlu1 %v3863_v57, %s7544_s21 }
 0xe26   : > { %4433 = vst.msk [vmem:[%s6574_s17 + $0x190] sm:$0xff] %vm900_vm1, %v3862_v60  ;;  %3889 = vrot.lane.b32.xlu0 %v3862_v60, %s7544_s21  ;;  %5313 = vmatprep.mubr.f32.mxu0 %v3862_v60 }
 0xe27   : > { %5314 = vmatmul.mubr.f32.gmra.mrb[42].mxu0 %v3863_v57 }
 0xe2a   : > { %v5274_v58 = vpop.f32.mrb[60].mxu0 }
 0xe2b   : > { %v3865_v62 = vmul.f32 %v7248_v46, %v5274_v58  ;;  %v3841_v63 = vpop.f32.mrb[61].mxu0  ;;  %v4112_v46 = vld [vmem:[%s7506_s8 + $0x8] sm:$0xff] }
 0xe2c   : > { %v3864_v47 = vmul.f32 %v7245_v17, %v3841_v63  ;;  %v4111_v17 = vld [vmem:[%s7506_s8] sm:$0xff] }
 0xe2d   : > { %4436 = vst.msk [vmem:[%s6574_s17 + $0x1a8] sm:$0xff] %vm900_vm1, %v3865_v62  ;;  %3895 = vrot.lane.b32.xlu1 %v3865_v62, %s7544_s21 }
 0xe2e   : > { %4435 = vst.msk [vmem:[%s6574_s17 + $0x1a0] sm:$0xff] %vm900_vm1, %v3864_v47  ;;  %3893 = vrot.lane.b32.xlu0 %v3864_v47, %s7544_s21  ;;  %5316 = vmatprep.mubr.f32.mxu0 %v3864_v47 }
 0xe2f   : > { %5317 = vmatmul.mubr.f32.gmra.mrb[44].mxu0 %v3865_v62 }
 0xe31   : > { %v5277_v37 = vpop.f32.mrb[62].mxu0 }
 0xe32   : > { %v3867_v0 = vmul.f32 %v7256_v32, %v5277_v37  ;;  %v3851_v39 = vpop.f32.mrb[63].mxu0  ;;  %v4114_v32 = vld [vmem:[%s7506_s8 + $0x18] sm:$0xff] }
 0xe33   : > { %v3866_v10 = vmul.f32 %v7254_v22, %v3851_v39  ;;  %v4113_v22 = vld [vmem:[%s7506_s8 + $0x10] sm:$0xff] }
 0xe34   : > { %4438 = vst.msk [vmem:[%s6574_s17 + $0x1b8] sm:$0xff] %vm900_vm1, %v3867_v0  ;;  %3899 = vrot.lane.b32.xlu1 %v3867_v0, %s7544_s21 }
 0xe35   : > { %4437 = vst.msk [vmem:[%s6574_s17 + $0x1b0] sm:$0xff] %vm900_vm1, %v3866_v10  ;;  %3897 = vrot.lane.b32.xlu0 %v3866_v10, %s7544_s21  ;;  %5319 = vmatprep.mubr.f32.mxu0 %v3866_v10  ;;  %s5941_s21 = sshll.u32 %s6005_s29, 4  ;;  %s5942_s21 = int_to_ptr.vmem [resolvable:$false] %s5941_s21 }
 0xe36   : > { %5320 = vmatmul.mubr.f32.gmra.mrb[46].mxu0 %v3867_v0  ;;  %s5943_s23 = scalar_lea.vmem %s5942_s21, 16384  ;;  %p5944_p0 = scmp.lt.s32.totalorder %s7445_s24, %s5942_s21 }
 0xe37   : > { %p5945_p1 = scmp.lt.s32.totalorder %s5943_s23, %s5937_s22 }
 0xe38   : > { %4117 = vperm.xlu1 %5688, %v4111_v17  }
 0xe39   : > { %p5946_p2 = por %p5945_p1, %p5944_p0 }
 0xe3b   : > { %p5947_p3 = pnand %p5946_p2, %p5940_p13 }
 0xe3c   : > { %4122 = vperm.xlu1 %5688, %v4112_v46  }
 0xe40   : > { %4127 = vperm.xlu1 %5688, %v4113_v22  }
 0xe44   : > { %4132 = vperm.xlu1 %5688, %v4114_v32  }
 0xe8f   : > { %v3888_v6 = vpop.permute.xlu1 %3887 }
 0xe90   : > { %4440 = vst.msk [vmem:[%s6574_s17 + $0x1c8] sm:$0xff] %vm900_vm1, %v3888_v6  ;;  %v3886_v31 = vpop.permute.xlu0 %3885 }
 0xe91   : > { %4439 = vst.msk [vmem:[%s6574_s17 + $0x1c0] sm:$0xff] %vm900_vm1, %v3886_v31 }
 0xe97   : > { %v3892_v44 = vpop.permute.xlu1 %3891 }
 0xe98   : > { %4442 = vst.msk [vmem:[%s6574_s17 + $0x1d8] sm:$0xff] %vm900_vm1, %v3892_v44  ;;  %v3890_v42 = vpop.permute.xlu0 %3889 }
 0xe99   : > { %4441 = vst.msk [vmem:[%s6574_s17 + $0x1d0] sm:$0xff] %vm900_vm1, %v3890_v42 }
 0xe9f   : > { %v3896_v56 = vpop.permute.xlu1 %3895 }
 0xea0   : > { %4444 = vst.msk [vmem:[%s6574_s17 + $0x1e8] sm:$0xff] %vm900_vm1, %v3896_v56  ;;  %v3894_v29 = vpop.permute.xlu0 %3893 }
 0xea1   : > { %4443 = vst.msk [vmem:[%s6574_s17 + $0x1e0] sm:$0xff] %vm900_vm1, %v3894_v29 }
 0xea6   : > { %v3900_v4 = vpop.permute.xlu1 %3899 }
 0xea7   : > { %4446 = vst.msk [vmem:[%s6574_s17 + $0x1f8] sm:$0xff] %vm900_vm1, %v3900_v4  ;;  %v3898_v28 = vpop.permute.xlu0 %3897 }
 0xea8   : > { %4445 = vst.msk [vmem:[%s6574_s17 + $0x1f0] sm:$0xff] %vm900_vm1, %v3898_v28 }
 0xef2   : > { %v5312_v25 = vpop.f32.mrb[40].mxu0 }
 0xef3   : > { %v4032_v7 = vpop.f32.mrb[41].mxu0 }
 0xef4   : > { %4079 = vxpose.xlu0.b32.start [1/8] (short) (narrow) %v4032_v7, 32 }
 0xef8   : > { %4080 = vxpose.xlu0.b32.cont [2/8] (short) (narrow) %v5312_v25, 32 }
 0xefa   : > { %v5315_v48 = vpop.f32.mrb[42].mxu0 }
 0xefb   : > { %v4042_v55 = vpop.f32.mrb[43].mxu0 }
 0xefc   : > { %4081 = vxpose.xlu0.b32.cont [3/8] (short) (narrow) %v4042_v55, 32 }
 0xf00   : > { %4082 = vxpose.xlu0.b32.cont [4/8] (short) (narrow) %v5315_v48, 32 }
 0xf02   : > { %v5318_v3 = vpop.f32.mrb[44].mxu0 }
 0xf03   : > { %v4052_v8 = vpop.f32.mrb[45].mxu0 }
 0xf04   : > { %4083 = vxpose.xlu0.b32.cont [5/8] (short) (narrow) %v4052_v8, 32 }
 0xf05   : > { %5950 = shalt.err (!%p5947_p3)
}
 0xf06   : > { %s5951_s15 = scalar_lea.hbm %s7442_s19, 8192  ;;  %s5955_s27 = scalar_lea.hbm %s7511_s13, 16384 }
 0xf07   : > { %p5952_p4 = scmp.ne.s32.totalorder %s7442_s19, %s5951_s15  ;;  %p5956_p9 = scmp.lt.u32.totalorder %s7442_s19, %s7511_s13 }
 0xf08   : > { %p5957_p10 = scmp.lt.u32.totalorder %s5955_s27, %s5951_s15  ;;  %p5959_p12 = scmp.lt.u32.totalorder %s5951_s15, %s7442_s19 }
 0xf09   : > { %p5953_p7 = pnand %p5952_p4, %p6116_p5 }
 0xf0a   : > { %p5958_p11 = por %p5957_p10, %p5956_p9 }
 0xf0b   : > { %p5954_p8 = pneg %p5953_p7 }
 0xf0c   : > { %p5960_p13 = por %p5959_p12, %p5958_p11 }
 0xf0e   : > { %p5961_p0 = pnand %p5960_p13, %p5954_p8 }
 0xf10   : > { %5964 = shalt.err (!%p5961_p0)
}
 0xf11   : > { %s6006_s22 = smov 128   ;;  %s6007_s21 = smov 8   ;;  %4084 = vxpose.xlu0.b32.cont [6/8] (short) (narrow) %v5318_v3, 32  ;;  %v5321_v50 = vpop.f32.mrb[46].mxu0  ;;  %v4118_v2 = vpop.permute.xlu1 %4117 }
 0xf12   : > { %5642 = dma.vmem_to_hbm [thread:$0]  (%p6116_p5), %s7445_s24, 8192, %s7442_s19, %s7449_s16, %s6006_s22, %s6006_s22, %s6007_s21   ;;  %v4062_v12 = vpop.f32.mrb[47].mxu0 }
 0xf13   : > { %s471_s17 = scalar_lea.vmem %s7510_s12, %s6141_s20 }
 0xf15   : > { %4085 = vxpose.xlu0.b32.cont [7/8] (short) (narrow) %v4062_v12, 32  ;;  %v4123_v27 = vpop.permute.xlu1 %4122 }
 0xf19   : > { %4086 = vxpose.xlu0.b32.end [8/8] (short) (narrow) %v5321_v50, 32  ;;  %v4128_v38 = vpop.permute.xlu1 %4127 }
 0xf1d   : > { %v4133_v20 = vpop.permute.xlu1 %4132 }
 0xf7d   : > { %v4095_v5 = vpop.trf.xlu0 }
 0xf7e   : > { %v4135_v41 = vadd.f32 %v4118_v2, %v4095_v5 }
 0xf80   : > { %4139 = vst.msk [vmem:[%s471_s17] sm:$0xff] %vm900_vm1, %v4135_v41 }
 0xf81   : > { %v4096_v52 = vpop.trf.xlu0 }
 0xf82   : > { %v4136_v14 = vadd.f32 %v4123_v27, %v4096_v52 }
 0xf84   : > { %4140 = vst.msk [vmem:[%s471_s17 + $0x8] sm:$0xff] %vm900_vm1, %v4136_v14 }
 0xf85   : > { %v4097_v23 = vpop.trf.xlu0 }
 0xf86   : > { %v4137_v19 = vadd.f32 %v4128_v38, %v4097_v23 }
 0xf88   : > { %4141 = vst.msk [vmem:[%s471_s17 + $0x10] sm:$0xff] %vm900_vm1, %v4137_v19 }
 0xf89   : > { %v4098_v13 = vpop.trf.xlu0 }
 0xf8a   : > { %v4138_v9 = vadd.f32 %v4133_v20, %v4098_v13 }
 0xf8c   : > { %4142 = vst.msk [vmem:[%s471_s17 + $0x18] sm:$0xff] %vm900_vm1, %v4138_v9 }
 0xf8d PF: > { %p5648_p5 = scmp.ge.s32.totalorder %s5999_s28, 2  ;;  %s4188_s20 = sand.u32 1, %s5987_s25  }
 0xf8e   : > { %s4189_s19 = scalar_lea.sflag [#allocation3], %s4188_s20 }
 0xf8f   : > { %p5645_p1 = pnand %p5648_p5, %p6120_p6 }
 0xf91   : > { %5982 = dma.done.wait (!%p5645_p1), %s4189_s19, 8192  }
 0xf92   : > { %5984 = vsyncadd (!%p5645_p1), %s4189_s19, 4294959104  ;;  %s7556_s28 = sld [smem:[#allocation6_spill]]  ;;  %s7557_s24 = sld [smem:[#allocation5_spill]] }
 0xf93   : > { %s7558_s27 = sld [smem:[#allocation7_spill]]  ;;  %s7559_s25 = smov %s5991_s26 }
 0xf98   : > { %p24_p2 = scmp.ge.s32.totalorder %s7556_s28, 4   ;;  %s7560_s26 = smov %s7557_s24 }
 0xf9a   :  { %26 = sbr.rel (!%p24_p2) target bundleno = 3 (0x3), region = 125 }
 0xfa1   :  { %4194 = vsyncpa [#allocation3], 1 }
 0xfa2   :  { %4196 = vsyncpa [#allocation3 + $0x1], 1 }

</bundles_post_ra>
